<compile_context>
chip_gen: v6e
topology: v6e:2x2x1
jax: 0.10.0
libtpu: 0.0.40
codegen_flags: <defaults>
</compile_context>

<pallas_src>
import jax
import jax.numpy as jnp
from jax import lax
from jax.experimental import pallas as pl
from jax.experimental.pallas import tpu as pltpu


def _round_up(x, m):
    return (x + m - 1) // m * m


# ----------------------------------------------------------------------------
# Fused Pallas kernel: [LSTM layer]*L + Linear head, grid over batch blocks.
# ----------------------------------------------------------------------------
def _make_fused_kernel(num_layers, T, bb, H, GW, mm_dtype):
    """GW = packed gate / state container width (= round_up(4H,128) = 128 for H=32)."""
    g_lo, g_hi = 2 * H, 3 * H  # lane range of the tanh (cell-candidate) gate

    def kernel(*refs):
        # refs: x | (w_ih, w_hh, bias)*L | w_fc, b_fc | out | seq, gx, h, c
        x_ref = refs[0]
        layer_refs = [tuple(refs[1 + 3 * l: 4 + 3 * l]) for l in range(num_layers)]
        wfc_ref = refs[1 + 3 * num_layers]
        bfc_ref = refs[2 + 3 * num_layers]
        out_ref = refs[3 + 3 * num_layers]
        seq_scr, gx_scr, h_scr, c_scr = refs[4 + 3 * num_layers:]

        # Lane mask selecting the tanh gate inside the packed gate block.
        # Built once (outside all loops) -- broadcast is not CSE'd by JAX.
        lane = lax.broadcasted_iota(jnp.int32, (bb, GW), 1)
        g_mask = (lane >= g_lo) & (lane < g_hi)

        for l, (wih_ref, whh_ref, b_ref) in enumerate(layer_refs):
            # ---- Phase A: hoisted input projection over all timesteps,
            #      bias folded in here instead of per step. (T*bb, GW)
            if l == 0:
                xin = x_ref[...].reshape(T * bb, -1)     # leading-dim merge, no relayout
            else:
                xin = seq_scr[...].reshape(T * bb, GW)
            gx = jnp.dot(xin.astype(mm_dtype), wih_ref[...],
                         preferred_element_type=jnp.float32) + b_ref[...]
            gx_scr[...] = gx.reshape(T, bb, GW)

            # ---- Phase B: serial recurrence; h/c resident in VMEM.
            h_scr[...] = jnp.zeros_like(h_scr)
            c_scr[...] = jnp.zeros_like(c_scr)

            def step(t, carry):
                h_prev = h_scr[...]
                c_prev = c_scr[...]
                # NOTE: whh_ref is read INSIDE the loop (MXU streams it from VMEM);
                # hoisting it would pin a huge vreg live range across the unroll.
                gates = gx_scr[t] + jnp.dot(
                    h_prev.astype(mm_dtype), whh_ref[...],
                    preferred_element_type=jnp.float32)            # (bb, GW)
                # Two full-vreg EUP passes + select over the packed gates.
                act = jnp.where(g_mask, jnp.tanh(gates), jax.nn.sigmoid(gates))
                # XLU rolls align f / g / o with the c/h lanes [0, H).
                f_al = pltpu.roll(act, GW - 1 * H, axis=1)
                g_al = pltpu.roll(act, GW - 2 * H, axis=1)
                o_al = pltpu.roll(act, GW - 3 * H, axis=1)
                # Lanes [0,H) are exact; pad lanes carry bounded garbage that is
                # annihilated by the zero pad-rows of every consuming weight.
                c_new = f_al * c_prev + act * g_al
                h_new = o_al * jnp.tanh(c_new)
                c_scr[...] = c_new
                h_scr[...] = h_new
                seq_scr[t] = h_new
                return carry

            unroll_amt = T if T <= 16 else 8   # bounded unroll for non-toy T
            lax.fori_loop(0, T, step, 0, unroll=unroll_amt)
            # Inter-layer dropout: identity in eval mode.

        # ---- FC head on the last hidden state (pad rows/cols of w_fc are 0).
        out_ref[...] = (jnp.dot(h_scr[...].astype(mm_dtype), wfc_ref[...],
                                preferred_element_type=jnp.float32)
                        + bfc_ref[...])

    return kernel


def _full_spec(shape):
    nd = len(shape)
    return pl.BlockSpec(shape, lambda *_: (0,) * nd)


# ----------------------------------------------------------------------------
# Wrapper
# ----------------------------------------------------------------------------
def stock_lstm_forward(x, kernel_params, num_stocks, hidden_size, *, batch_block=8):
    """x: (batch, seq, n_stocks, n_features) -> (batch, 1, num_stocks)."""
    B, T, S, F = x.shape
    D = S * F
    H = hidden_size
    GW = kernel_params["dims"]["GW"]
    Np = kernel_params["dims"]["Np"]
    num_layers = len(kernel_params["lstm"])
    mm_dtype = kernel_params["lstm"][0]["w_ih_p"].dtype

    bb = batch_block
    assert bb % 8 == 0, "batch block must be a multiple of the f32 sublane count"
    Bp = _round_up(max(B, bb), bb)

    # Time-major, batch-padded input. D=16 is lane-sparse in VMEM but tiny here;
    # for long T leave x in HBM (pl.ANY) and DMA per T-chunk instead.
    x_flat = x.reshape(B, T, D).astype(jnp.float32)
    x_tbd = jnp.transpose(x_flat, (1, 0, 2))                 # (T, B, D)
    x_pad = jnp.pad(x_tbd, ((0, 0), (0, Bp - B), (0, 0)))    # (T, Bp, D)

    inputs = [x_pad]
    in_specs = [pl.BlockSpec((T, bb, D), lambda i: (0, i, 0))]
    for layer in kernel_params["lstm"]:
        for name in ("w_ih_p", "w_hh_p", "bias_p"):
            inputs.append(layer[name])
            in_specs.append(_full_spec(layer[name].shape))
    for name in ("w_p", "b_p"):
        inputs.append(kernel_params["fc"][name])
        in_specs.append(_full_spec(kernel_params["fc"][name].shape))

    out_specs = pl.BlockSpec((bb, Np), lambda i: (i, 0))     # lane-dense output block
    scratch_shapes = [
        pltpu.VMEM((T, bb, GW), jnp.float32),   # inter-layer hidden sequence
        pltpu.VMEM((T, bb, GW), jnp.float32),   # hoisted gate pre-activations (packed)
        pltpu.VMEM((bb, GW), jnp.float32),      # h state
        pltpu.VMEM((bb, GW), jnp.float32),      # c state
    ]

    # Explicit VMEM budget (tiny here; headroom for larger T/B, v7x has 64 MiB).
    scratch_bytes = (2 * T * bb * GW + 2 * bb * GW) * 4
    in_bytes = sum(int(a.size) * a.dtype.itemsize for a in inputs)
    out_bytes = bb * Np * 4
    vmem_limit = int(min(64 * 2**20,
                         max(32 * 2**20, 4 * (scratch_bytes + in_bytes + out_bytes))))

    out_pad = pl.pallas_call(
        _make_fused_kernel(num_layers, T, bb, H, GW, mm_dtype),
        out_shape=jax.ShapeDtypeStruct((Bp, Np), jnp.float32),
        grid=(Bp // bb,),
        in_specs=in_specs,
        out_specs=out_specs,
        scratch_shapes=scratch_shapes,
        compiler_params=pltpu.CompilerParams(
            dimension_semantics=("parallel",),     # batch blocks shard across TCs (v7x)
            vmem_limit_bytes=vmem_limit),
    )(*inputs)

    return out_pad[:B, :num_stocks].reshape(B, 1, num_stocks)


# ----------------------------------------------------------------------------
# Parameters: raw (PyTorch layout) + packed/padded kernel versions
# ----------------------------------------------------------------------------
def init_params(key, input_size, hidden_size, num_layers, num_stocks):
    params = {"lstm": [], "fc": {}}
    scale = 1.0 / float(hidden_size) ** 0.5
    for layer in range(num_layers):
        d_in = input_size if layer == 0 else hidden_size
        key, k1, k2, k3, k4 = jax.random.split(key, 5)
        params["lstm"].append({
            "w_ih": jax.random.uniform(k1, (4 * hidden_size, d_in), jnp.float32,
                                       -scale, scale),
            "w_hh": jax.random.uniform(k2, (4 * hidden_size, hidden_size),
                                       jnp.float32, -scale, scale),
            "b_ih": jax.random.uniform(k3, (4 * hidden_size,), jnp.float32,
                                       -scale, scale),
            "b_hh": jax.random.uniform(k4, (4 * hidden_size,), jnp.float32,
                                       -scale, scale),
        })
    key, k1, k2 = jax.random.split(key, 3)
    params["fc"]["w"] = jax.random.uniform(k1, (num_stocks, hidden_size),
                                           jnp.float32, -scale, scale)
    params["fc"]["b"] = jax.random.uniform(k2, (num_stocks,), jnp.float32,
                                           -scale, scale)
    return params


def prepare_kernel_params(params, hidden_size, num_stocks, param_dtype=jnp.float32):
    """Packed-gate layout: gates [i|f|g|o] share one GW=round_up(4H,128) lane block.
    Weight rows are zero-padded from H to GW so garbage pad lanes of h contribute 0.
    param_dtype=bfloat16 halves weight VMEM and uses the native bf16 MXU path
    (f32 accumulation); biases and state stay f32."""
    H = hidden_size
    GW = max(_round_up(4 * H, 128), 128)
    Np = _round_up(num_stocks, 128)
    kp = {"lstm": [], "fc": {}, "dims": {"H": H, "GW": GW, "Np": Np}}

    for l, layer in enumerate(params["lstm"]):
        w_ih_t = layer["w_ih"].T                              # (d_in, 4H), cols [i|f|g|o]
        w_hh_t = layer["w_hh"].T                              # (H, 4H)
        bias = (layer["b_ih"] + layer["b_hh"]).reshape(1, 4 * H)

        w_ih_p = jnp.pad(w_ih_t, ((0, 0), (0, GW - 4 * H)))   # lane-pad packed gates
        if l > 0:                                             # input is padded hidden state
            w_ih_p = jnp.pad(w_ih_p, ((0, GW - H), (0, 0)))
        w_hh_p = jnp.pad(w_hh_t, ((0, GW - H), (0, GW - 4 * H)))
        bias_p = jnp.pad(bias, ((0, 0), (0, GW - 4 * H)))
        kp["lstm"].append({
            "w_ih_p": w_ih_p.astype(param_dtype),
            "w_hh_p": w_hh_p.astype(param_dtype),
            "bias_p": bias_p.astype(jnp.float32),
        })

    w_fc_t = params["fc"]["w"].T                              # (H, N)
    kp["fc"]["w_p"] = jnp.pad(w_fc_t, ((0, GW - H), (0, Np - num_stocks))
                              ).astype(param_dtype)
    kp["fc"]["b_p"] = jnp.pad(params["fc"]["b"].reshape(1, -1),
                              ((0, 0), (0, Np - num_stocks))).astype(jnp.float32)
    return kp


# ----------------------------------------------------------------------------
# Pure-JAX reference (unpadded, PyTorch-equivalent semantics)
# ----------------------------------------------------------------------------
def reference_forward(x, params, num_stocks, hidden_size, param_dtype=jnp.float32):
    B, T, S, F = x.shape
    H = hidden_size
    seq = jnp.transpose(x.reshape(B, T, S * F).astype(jnp.float32), (1, 0, 2))

    def mm(a, w):  # mirror the kernel's matmul precision (bf16 operands, f32 acc)
        return jnp.dot(a.astype(param_dtype), w.astype(param_dtype),
                       preferred_element_type=jnp.float32)

    for layer in params["lstm"]:
        w_ih_t, w_hh_t = layer["w_ih"].T, layer["w_hh"].T
        bias = (layer["b_ih"] + layer["b_hh"]).astype(jnp.float32)

        def step(carry, x_t):
            h, c = carry
            gates = mm(x_t, w_ih_t) + mm(h, w_hh_t) + bias
            i = jax.nn.sigmoid(gates[:, 0 * H:1 * H])
            f = jax.nn.sigmoid(gates[:, 1 * H:2 * H])
            g = jnp.tanh(gates[:, 2 * H:3 * H])
            o = jax.nn.sigmoid(gates[:, 3 * H:4 * H])
            c = f * c + i * g
            h = o * jnp.tanh(c)
            return (h, c), h

        init = (jnp.zeros((B, H), jnp.float32), jnp.zeros((B, H), jnp.float32))
        _, seq = lax.scan(step, init, seq)

    h_last = seq[-1]
    out = mm(h_last, params["fc"]["w"].T) + params["fc"]["b"]
    return out.reshape(B, 1, num_stocks)


# ----------------------------------------------------------------------------
if __name__ == "__main__":
    batch = 2
    seq_len = 8
    num_stocks = 4
    num_features = 4
    hidden_size = 32
    num_layers = 2
    input_size = num_stocks * num_features

    key = jax.random.PRNGKey(0)
    key, xk, pk = jax.random.split(key, 3)
    x = jax.random.normal(xk, (batch, seq_len, num_stocks, num_features),
                          dtype=jnp.float32)
    params = init_params(pk, input_size, hidden_size, num_layers, num_stocks)

    # ---- exact f32 path ----
    kp32 = prepare_kernel_params(params, hidden_size, num_stocks, jnp.float32)
    out32 = jax.block_until_ready(
        stock_lstm_forward(x, kp32, num_stocks, hidden_size))
    assert out32.shape == (batch, 1, num_stocks), out32.shape
    ref32 = jax.block_until_ready(
        reference_forward(x, params, num_stocks, hidden_size, jnp.float32))
    assert jnp.allclose(out32, ref32, atol=1e-4, rtol=1e-4), (
        "f32 Pallas output mismatch vs JAX reference")

    # ---- bf16 matmul path (v6e/v7x MXU), checked vs bf16-matched reference ----
    kpbf = prepare_kernel_params(params, hidden_size, num_stocks, jnp.bfloat16)
    outbf = jax.block_until_ready(
        stock_lstm_forward(x, kpbf, num_stocks, hidden_size))
    refbf = jax.block_until_ready(
        reference_forward(x, params, num_stocks, hidden_size, jnp.bfloat16))
    assert jnp.allclose(outbf, refbf, atol=2e-2, rtol=2e-2), (
        "bf16 Pallas output mismatch vs bf16 JAX reference")

    print("KERNEL_OK")
</pallas_src>

<mosaic_0001>
module attributes {stable_mosaic.version = 11 : i64} {
  func.func @kernel(%arg0: i32, %arg1: memref<8x8x16xf32, #tpu.memory_space<vmem>>, %arg2: memref<16x128xf32, #tpu.memory_space<vmem>>, %arg3: memref<128x128xf32, #tpu.memory_space<vmem>>, %arg4: memref<1x128xf32, #tpu.memory_space<vmem>>, %arg5: memref<128x128xf32, #tpu.memory_space<vmem>>, %arg6: memref<128x128xf32, #tpu.memory_space<vmem>>, %arg7: memref<1x128xf32, #tpu.memory_space<vmem>>, %arg8: memref<128x128xf32, #tpu.memory_space<vmem>>, %arg9: memref<1x128xf32, #tpu.memory_space<vmem>>, %arg10: memref<8x128xf32, #tpu.memory_space<vmem>>, %arg11: memref<8x8x128xf32, #tpu.memory_space<vmem>>, %arg12: memref<8x8x128xf32, #tpu.memory_space<vmem>>, %arg13: memref<8x128xf32, #tpu.memory_space<vmem>>, %arg14: memref<8x128xf32, #tpu.memory_space<vmem>>) attributes {dimension_semantics = [#tpu.dimension_semantics<parallel>], iteration_bounds = array<i64: 1>, scalar_prefetch = 0 : i64, scratch_operands = 4 : i64, tpu.core_type = #tpu.core_type<tc>, window_params = [{transform_indices = @transform_0, window_bounds = array<i64: 8, 8, 16>}, {pipeline_mode = #tpu.pipeline_mode<synchronous>, transform_indices = @transform_1, window_bounds = array<i64: 16, 128>}, {pipeline_mode = #tpu.pipeline_mode<synchronous>, transform_indices = @transform_2, window_bounds = array<i64: 128, 128>}, {pipeline_mode = #tpu.pipeline_mode<synchronous>, transform_indices = @transform_3, window_bounds = array<i64: 1, 128>}, {pipeline_mode = #tpu.pipeline_mode<synchronous>, transform_indices = @transform_4, window_bounds = array<i64: 128, 128>}, {pipeline_mode = #tpu.pipeline_mode<synchronous>, transform_indices = @transform_5, window_bounds = array<i64: 128, 128>}, {pipeline_mode = #tpu.pipeline_mode<synchronous>, transform_indices = @transform_6, window_bounds = array<i64: 1, 128>}, {pipeline_mode = #tpu.pipeline_mode<synchronous>, transform_indices = @transform_7, window_bounds = array<i64: 128, 128>}, {pipeline_mode = #tpu.pipeline_mode<synchronous>, transform_indices = @transform_8, window_bounds = array<i64: 1, 128>}, {transform_indices = @transform_9, window_bounds = array<i64: 8, 128>}]} {
    %0 = tpu.iota {dimensions = array<i32: 1>} : vector<8x128xi32>
    %c64_i32 = arith.constant 64 : i32
    %1 = vector.broadcast %c64_i32 : i32 to vector<8x128xi32>
    %2 = arith.cmpi sge, %0, %1 : vector<8x128xi32>
    %c96_i32 = arith.constant 96 : i32
    %3 = vector.broadcast %c96_i32 : i32 to vector<8x128xi32>
    %4 = arith.cmpi slt, %0, %3 : vector<8x128xi32>
    %5 = arith.andi %2, %4 : vector<8x128xi1>
    %c0 = arith.constant 0 : index
    %c0_0 = arith.constant 0 : index
    %c0_1 = arith.constant 0 : index
    %6 = vector.load %arg1[%c0, %c0_0, %c0_1] : memref<8x8x16xf32, #tpu.memory_space<vmem>>, vector<8x8x16xf32>
    %7 = vector.shape_cast %6 : vector<8x8x16xf32> to vector<64x16xf32>
    %c0_2 = arith.constant 0 : index
    %c0_3 = arith.constant 0 : index
    %8 = vector.load %arg2[%c0_2, %c0_3] : memref<16x128xf32, #tpu.memory_space<vmem>>, vector<16x128xf32>
    %cst = arith.constant dense<0.000000e+00> : vector<64x128xf32>
    %9 = tpu.matmul %7, %8, %cst {dimension_numbers = #tpu.dot_dimension_numbers<[1], [0], [0], [1], [0, 0, 1, 1], [], []>} : vector<64x16xf32>, vector<16x128xf32>, vector<64x128xf32> -> vector<64x128xf32>
    %c0_4 = arith.constant 0 : index
    %c0_5 = arith.constant 0 : index
    %10 = vector.load %arg4[%c0_4, %c0_5] : memref<1x128xf32, #tpu.memory_space<vmem>>, vector<1x128xf32>
    %11 = vector.broadcast %10 : vector<1x128xf32> to vector<64x128xf32>
    %12 = arith.addf %9, %11 : vector<64x128xf32>
    %13 = vector.shape_cast %12 : vector<64x128xf32> to vector<8x8x128xf32>
    %c0_6 = arith.constant 0 : index
    %c0_7 = arith.constant 0 : index
    %c0_8 = arith.constant 0 : index
    %14 = vector.load %arg12[%c0_6, %c0_7, %c0_8] : memref<8x8x128xf32, #tpu.memory_space<vmem>>, vector<8x8x128xf32>
    tpu.vector_store %arg12[%c0_6, %c0_7, %c0_8], %13 {strides = array<i32>} : memref<8x8x128xf32, #tpu.memory_space<vmem>>, vector<8x8x128xf32>,
    %cst_9 = arith.constant 0.000000e+00 : f32
    %15 = vector.broadcast %cst_9 : f32 to vector<8x128xf32>
    %c0_10 = arith.constant 0 : index
    %c0_11 = arith.constant 0 : index
    %16 = vector.load %arg13[%c0_10, %c0_11] : memref<8x128xf32, #tpu.memory_space<vmem>>, vector<8x128xf32>
    tpu.vector_store %arg13[%c0_10, %c0_11], %15 {strides = array<i32>} : memref<8x128xf32, #tpu.memory_space<vmem>>, vector<8x128xf32>,
    %cst_12 = arith.constant 0.000000e+00 : f32
    %17 = vector.broadcast %cst_12 : f32 to vector<8x128xf32>
    %c0_13 = arith.constant 0 : index
    %c0_14 = arith.constant 0 : index
    %18 = vector.load %arg14[%c0_13, %c0_14] : memref<8x128xf32, #tpu.memory_space<vmem>>, vector<8x128xf32>
    tpu.vector_store %arg14[%c0_13, %c0_14], %17 {strides = array<i32>} : memref<8x128xf32, #tpu.memory_space<vmem>>, vector<8x128xf32>,
    %c0_i32 = arith.constant 0 : i32
    %c0_15 = arith.constant 0 : index
    %c0_16 = arith.constant 0 : index
    %19 = vector.load %arg13[%c0_15, %c0_16] : memref<8x128xf32, #tpu.memory_space<vmem>>, vector<8x128xf32>
    %c0_17 = arith.constant 0 : index
    %c0_18 = arith.constant 0 : index
    %20 = vector.load %arg14[%c0_17, %c0_18] : memref<8x128xf32, #tpu.memory_space<vmem>>, vector<8x128xf32>
    %21 = arith.index_cast %c0_i32 : i32 to index
    %c0_19 = arith.constant 0 : index
    %c0_20 = arith.constant 0 : index
    %22 = vector.load %arg12[%21, %c0_19, %c0_20] : memref<8x8x128xf32, #tpu.memory_space<vmem>>, vector<1x8x128xf32>
    %23 = vector.shape_cast %22 : vector<1x8x128xf32> to vector<8x128xf32>
    %c0_21 = arith.constant 0 : index
    %c0_22 = arith.constant 0 : index
    %24 = vector.load %arg3[%c0_21, %c0_22] : memref<128x128xf32, #tpu.memory_space<vmem>>, vector<128x128xf32>
    %cst_23 = arith.constant dense<0.000000e+00> : vector<8x128xf32>
    %25 = tpu.matmul %19, %24, %cst_23 {dimension_numbers = #tpu.dot_dimension_numbers<[1], [0], [0], [1], [0, 0, 1, 1], [], []>} : vector<8x128xf32>, vector<128x128xf32>, vector<8x128xf32> -> vector<8x128xf32>
    %26 = arith.addf %23, %25 : vector<8x128xf32>
    %27 = math.tanh %26 : vector<8x128xf32>
    %28 = arith.negf %26 : vector<8x128xf32>
    %29 = math.exp %28 : vector<8x128xf32>
    %cst_24 = arith.constant 1.000000e+00 : f32
    %30 = vector.broadcast %cst_24 : f32 to vector<8x128xf32>
    %31 = arith.addf %30, %29 : vector<8x128xf32>
    %32 = arith.divf %30, %31 : vector<8x128xf32>
    %33 = arith.select %5, %27, %32 : vector<8x128xi1>, vector<8x128xf32>
    %c96_i32_25 = arith.constant 96 : i32
    %34 = tpu.dynamic_rotate %33 by %c96_i32_25 dim 1 : vector<8x128xf32>, i32 -> vector<8x128xf32>
    %c64_i32_26 = arith.constant 64 : i32
    %35 = tpu.dynamic_rotate %33 by %c64_i32_26 dim 1 : vector<8x128xf32>, i32 -> vector<8x128xf32>
    %c32_i32 = arith.constant 32 : i32
    %36 = tpu.dynamic_rotate %33 by %c32_i32 dim 1 : vector<8x128xf32>, i32 -> vector<8x128xf32>
    %37 = arith.mulf %34, %20 : vector<8x128xf32>
    %38 = arith.mulf %33, %35 : vector<8x128xf32>
    %39 = arith.addf %37, %38 : vector<8x128xf32>
    %40 = math.tanh %39 : vector<8x128xf32>
    %41 = arith.mulf %36, %40 : vector<8x128xf32>
    %c0_27 = arith.constant 0 : index
    %c0_28 = arith.constant 0 : index
    %42 = vector.load %arg14[%c0_27, %c0_28] : memref<8x128xf32, #tpu.memory_space<vmem>>, vector<8x128xf32>
    tpu.vector_store %arg14[%c0_27, %c0_28], %39 {strides = array<i32>} : memref<8x128xf32, #tpu.memory_space<vmem>>, vector<8x128xf32>,
    %c0_29 = arith.constant 0 : index
    %c0_30 = arith.constant 0 : index
    %43 = vector.load %arg13[%c0_29, %c0_30] : memref<8x128xf32, #tpu.memory_space<vmem>>, vector<8x128xf32>
    tpu.vector_store %arg13[%c0_29, %c0_30], %41 {strides = array<i32>} : memref<8x128xf32, #tpu.memory_space<vmem>>, vector<8x128xf32>,
    %44 = arith.index_cast %c0_i32 : i32 to index
    %c0_31 = arith.constant 0 : index
    %c0_32 = arith.constant 0 : index
    %45 = vector.load %arg11[%44, %c0_31, %c0_32] : memref<8x8x128xf32, #tpu.memory_space<vmem>>, vector<1x8x128xf32>
    %46 = vector.shape_cast %45 : vector<1x8x128xf32> to vector<8x128xf32>
    %47 = vector.shape_cast %41 : vector<8x128xf32> to vector<1x8x128xf32>
    tpu.vector_store %arg11[%44, %c0_31, %c0_32], %47 {strides = array<i32>} : memref<8x8x128xf32, #tpu.memory_space<vmem>>, vector<1x8x128xf32>,
    %c1_i32 = arith.constant 1 : i32
    %c0_33 = arith.constant 0 : index
    %c0_34 = arith.constant 0 : index
    %48 = vector.load %arg13[%c0_33, %c0_34] : memref<8x128xf32, #tpu.memory_space<vmem>>, vector<8x128xf32>
    %c0_35 = arith.constant 0 : index
    %c0_36 = arith.constant 0 : index
    %49 = vector.load %arg14[%c0_35, %c0_36] : memref<8x128xf32, #tpu.memory_space<vmem>>, vector<8x128xf32>
    %50 = arith.index_cast %c1_i32 : i32 to index
    %c0_37 = arith.constant 0 : index
    %c0_38 = arith.constant 0 : index
    %51 = vector.load %arg12[%50, %c0_37, %c0_38] : memref<8x8x128xf32, #tpu.memory_space<vmem>>, vector<1x8x128xf32>
    %52 = vector.shape_cast %51 : vector<1x8x128xf32> to vector<8x128xf32>
    %c0_39 = arith.constant 0 : index
    %c0_40 = arith.constant 0 : index
    %53 = vector.load %arg3[%c0_39, %c0_40] : memref<128x128xf32, #tpu.memory_space<vmem>>, vector<128x128xf32>
    %cst_41 = arith.constant dense<0.000000e+00> : vector<8x128xf32>
    %54 = tpu.matmul %48, %53, %cst_41 {dimension_numbers = #tpu.dot_dimension_numbers<[1], [0], [0], [1], [0, 0, 1, 1], [], []>} : vector<8x128xf32>, vector<128x128xf32>, vector<8x128xf32> -> vector<8x128xf32>
    %55 = arith.addf %52, %54 : vector<8x128xf32>
    %56 = math.tanh %55 : vector<8x128xf32>
    %57 = arith.negf %55 : vector<8x128xf32>
    %58 = math.exp %57 : vector<8x128xf32>
    %cst_42 = arith.constant 1.000000e+00 : f32
    %59 = vector.broadcast %cst_42 : f32 to vector<8x128xf32>
    %60 = arith.addf %59, %58 : vector<8x128xf32>
    %61 = arith.divf %59, %60 : vector<8x128xf32>
    %62 = arith.select %5, %56, %61 : vector<8x128xi1>, vector<8x128xf32>
    %c96_i32_43 = arith.constant 96 : i32
    %63 = tpu.dynamic_rotate %62 by %c96_i32_43 dim 1 : vector<8x128xf32>, i32 -> vector<8x128xf32>
    %c64_i32_44 = arith.constant 64 : i32
    %64 = tpu.dynamic_rotate %62 by %c64_i32_44 dim 1 : vector<8x128xf32>, i32 -> vector<8x128xf32>
    %c32_i32_45 = arith.constant 32 : i32
    %65 = tpu.dynamic_rotate %62 by %c32_i32_45 dim 1 : vector<8x128xf32>, i32 -> vector<8x128xf32>
    %66 = arith.mulf %63, %49 : vector<8x128xf32>
    %67 = arith.mulf %62, %64 : vector<8x128xf32>
    %68 = arith.addf %66, %67 : vector<8x128xf32>
    %69 = math.tanh %68 : vector<8x128xf32>
    %70 = arith.mulf %65, %69 : vector<8x128xf32>
    %c0_46 = arith.constant 0 : index
    %c0_47 = arith.constant 0 : index
    %71 = vector.load %arg14[%c0_46, %c0_47] : memref<8x128xf32, #tpu.memory_space<vmem>>, vector<8x128xf32>
    tpu.vector_store %arg14[%c0_46, %c0_47], %68 {strides = array<i32>} : memref<8x128xf32, #tpu.memory_space<vmem>>, vector<8x128xf32>,
    %c0_48 = arith.constant 0 : index
    %c0_49 = arith.constant 0 : index
    %72 = vector.load %arg13[%c0_48, %c0_49] : memref<8x128xf32, #tpu.memory_space<vmem>>, vector<8x128xf32>
    tpu.vector_store %arg13[%c0_48, %c0_49], %70 {strides = array<i32>} : memref<8x128xf32, #tpu.memory_space<vmem>>, vector<8x128xf32>,
    %73 = arith.index_cast %c1_i32 : i32 to index
    %c0_50 = arith.constant 0 : index
    %c0_51 = arith.constant 0 : index
    %74 = vector.load %arg11[%73, %c0_50, %c0_51] : memref<8x8x128xf32, #tpu.memory_space<vmem>>, vector<1x8x128xf32>
    %75 = vector.shape_cast %74 : vector<1x8x128xf32> to vector<8x128xf32>
    %76 = vector.shape_cast %70 : vector<8x128xf32> to vector<1x8x128xf32>
    tpu.vector_store %arg11[%73, %c0_50, %c0_51], %76 {strides = array<i32>} : memref<8x8x128xf32, #tpu.memory_space<vmem>>, vector<1x8x128xf32>,
    %c2_i32 = arith.constant 2 : i32
    %c0_52 = arith.constant 0 : index
    %c0_53 = arith.constant 0 : index
    %77 = vector.load %arg13[%c0_52, %c0_53] : memref<8x128xf32, #tpu.memory_space<vmem>>, vector<8x128xf32>
    %c0_54 = arith.constant 0 : index
    %c0_55 = arith.constant 0 : index
    %78 = vector.load %arg14[%c0_54, %c0_55] : memref<8x128xf32, #tpu.memory_space<vmem>>, vector<8x128xf32>
    %79 = arith.index_cast %c2_i32 : i32 to index
    %c0_56 = arith.constant 0 : index
    %c0_57 = arith.constant 0 : index
    %80 = vector.load %arg12[%79, %c0_56, %c0_57] : memref<8x8x128xf32, #tpu.memory_space<vmem>>, vector<1x8x128xf32>
    %81 = vector.shape_cast %80 : vector<1x8x128xf32> to vector<8x128xf32>
    %c0_58 = arith.constant 0 : index
    %c0_59 = arith.constant 0 : index
    %82 = vector.load %arg3[%c0_58, %c0_59] : memref<128x128xf32, #tpu.memory_space<vmem>>, vector<128x128xf32>
    %cst_60 = arith.constant dense<0.000000e+00> : vector<8x128xf32>
    %83 = tpu.matmul %77, %82, %cst_60 {dimension_numbers = #tpu.dot_dimension_numbers<[1], [0], [0], [1], [0, 0, 1, 1], [], []>} : vector<8x128xf32>, vector<128x128xf32>, vector<8x128xf32> -> vector<8x128xf32>
    %84 = arith.addf %81, %83 : vector<8x128xf32>
    %85 = math.tanh %84 : vector<8x128xf32>
    %86 = arith.negf %84 : vector<8x128xf32>
    %87 = math.exp %86 : vector<8x128xf32>
    %cst_61 = arith.constant 1.000000e+00 : f32
    %88 = vector.broadcast %cst_61 : f32 to vector<8x128xf32>
    %89 = arith.addf %88, %87 : vector<8x128xf32>
    %90 = arith.divf %88, %89 : vector<8x128xf32>
    %91 = arith.select %5, %85, %90 : vector<8x128xi1>, vector<8x128xf32>
    %c96_i32_62 = arith.constant 96 : i32
    %92 = tpu.dynamic_rotate %91 by %c96_i32_62 dim 1 : vector<8x128xf32>, i32 -> vector<8x128xf32>
    %c64_i32_63 = arith.constant 64 : i32
    %93 = tpu.dynamic_rotate %91 by %c64_i32_63 dim 1 : vector<8x128xf32>, i32 -> vector<8x128xf32>
    %c32_i32_64 = arith.constant 32 : i32
    %94 = tpu.dynamic_rotate %91 by %c32_i32_64 dim 1 : vector<8x128xf32>, i32 -> vector<8x128xf32>
    %95 = arith.mulf %92, %78 : vector<8x128xf32>
    %96 = arith.mulf %91, %93 : vector<8x128xf32>
    %97 = arith.addf %95, %96 : vector<8x128xf32>
    %98 = math.tanh %97 : vector<8x128xf32>
    %99 = arith.mulf %94, %98 : vector<8x128xf32>
    %c0_65 = arith.constant 0 : index
    %c0_66 = arith.constant 0 : index
    %100 = vector.load %arg14[%c0_65, %c0_66] : memref<8x128xf32, #tpu.memory_space<vmem>>, vector<8x128xf32>
    tpu.vector_store %arg14[%c0_65, %c0_66], %97 {strides = array<i32>} : memref<8x128xf32, #tpu.memory_space<vmem>>, vector<8x128xf32>,
    %c0_67 = arith.constant 0 : index
    %c0_68 = arith.constant 0 : index
    %101 = vector.load %arg13[%c0_67, %c0_68] : memref<8x128xf32, #tpu.memory_space<vmem>>, vector<8x128xf32>
    tpu.vector_store %arg13[%c0_67, %c0_68], %99 {strides = array<i32>} : memref<8x128xf32, #tpu.memory_space<vmem>>, vector<8x128xf32>,
    %102 = arith.index_cast %c2_i32 : i32 to index
    %c0_69 = arith.constant 0 : index
    %c0_70 = arith.constant 0 : index
    %103 = vector.load %arg11[%102, %c0_69, %c0_70] : memref<8x8x128xf32, #tpu.memory_space<vmem>>, vector<1x8x128xf32>
    %104 = vector.shape_cast %103 : vector<1x8x128xf32> to vector<8x128xf32>
    %105 = vector.shape_cast %99 : vector<8x128xf32> to vector<1x8x128xf32>
    tpu.vector_store %arg11[%102, %c0_69, %c0_70], %105 {strides = array<i32>} : memref<8x8x128xf32, #tpu.memory_space<vmem>>, vector<1x8x128xf32>,
    %c3_i32 = arith.constant 3 : i32
    %c0_71 = arith.constant 0 : index
    %c0_72 = arith.constant 0 : index
    %106 = vector.load %arg13[%c0_71, %c0_72] : memref<8x128xf32, #tpu.memory_space<vmem>>, vector<8x128xf32>
    %c0_73 = arith.constant 0 : index
    %c0_74 = arith.constant 0 : index
    %107 = vector.load %arg14[%c0_73, %c0_74] : memref<8x128xf32, #tpu.memory_space<vmem>>, vector<8x128xf32>
    %108 = arith.index_cast %c3_i32 : i32 to index
    %c0_75 = arith.constant 0 : index
    %c0_76 = arith.constant 0 : index
    %109 = vector.load %arg12[%108, %c0_75, %c0_76] : memref<8x8x128xf32, #tpu.memory_space<vmem>>, vector<1x8x128xf32>
    %110 = vector.shape_cast %109 : vector<1x8x128xf32> to vector<8x128xf32>
    %c0_77 = arith.constant 0 : index
    %c0_78 = arith.constant 0 : index
    %111 = vector.load %arg3[%c0_77, %c0_78] : memref<128x128xf32, #tpu.memory_space<vmem>>, vector<128x128xf32>
    %cst_79 = arith.constant dense<0.000000e+00> : vector<8x128xf32>
    %112 = tpu.matmul %106, %111, %cst_79 {dimension_numbers = #tpu.dot_dimension_numbers<[1], [0], [0], [1], [0, 0, 1, 1], [], []>} : vector<8x128xf32>, vector<128x128xf32>, vector<8x128xf32> -> vector<8x128xf32>
    %113 = arith.addf %110, %112 : vector<8x128xf32>
    %114 = math.tanh %113 : vector<8x128xf32>
    %115 = arith.negf %113 : vector<8x128xf32>
    %116 = math.exp %115 : vector<8x128xf32>
    %cst_80 = arith.constant 1.000000e+00 : f32
    %117 = vector.broadcast %cst_80 : f32 to vector<8x128xf32>
    %118 = arith.addf %117, %116 : vector<8x128xf32>
    %119 = arith.divf %117, %118 : vector<8x128xf32>
    %120 = arith.select %5, %114, %119 : vector<8x128xi1>, vector<8x128xf32>
    %c96_i32_81 = arith.constant 96 : i32
    %121 = tpu.dynamic_rotate %120 by %c96_i32_81 dim 1 : vector<8x128xf32>, i32 -> vector<8x128xf32>
    %c64_i32_82 = arith.constant 64 : i32
    %122 = tpu.dynamic_rotate %120 by %c64_i32_82 dim 1 : vector<8x128xf32>, i32 -> vector<8x128xf32>
    %c32_i32_83 = arith.constant 32 : i32
    %123 = tpu.dynamic_rotate %120 by %c32_i32_83 dim 1 : vector<8x128xf32>, i32 -> vector<8x128xf32>
    %124 = arith.mulf %121, %107 : vector<8x128xf32>
    %125 = arith.mulf %120, %122 : vector<8x128xf32>
    %126 = arith.addf %124, %125 : vector<8x128xf32>
    %127 = math.tanh %126 : vector<8x128xf32>
    %128 = arith.mulf %123, %127 : vector<8x128xf32>
    %c0_84 = arith.constant 0 : index
    %c0_85 = arith.constant 0 : index
    %129 = vector.load %arg14[%c0_84, %c0_85] : memref<8x128xf32, #tpu.memory_space<vmem>>, vector<8x128xf32>
    tpu.vector_store %arg14[%c0_84, %c0_85], %126 {strides = array<i32>} : memref<8x128xf32, #tpu.memory_space<vmem>>, vector<8x128xf32>,
    %c0_86 = arith.constant 0 : index
    %c0_87 = arith.constant 0 : index
    %130 = vector.load %arg13[%c0_86, %c0_87] : memref<8x128xf32, #tpu.memory_space<vmem>>, vector<8x128xf32>
    tpu.vector_store %arg13[%c0_86, %c0_87], %128 {strides = array<i32>} : memref<8x128xf32, #tpu.memory_space<vmem>>, vector<8x128xf32>,
    %131 = arith.index_cast %c3_i32 : i32 to index
    %c0_88 = arith.constant 0 : index
    %c0_89 = arith.constant 0 : index
    %132 = vector.load %arg11[%131, %c0_88, %c0_89] : memref<8x8x128xf32, #tpu.memory_space<vmem>>, vector<1x8x128xf32>
    %133 = vector.shape_cast %132 : vector<1x8x128xf32> to vector<8x128xf32>
    %134 = vector.shape_cast %128 : vector<8x128xf32> to vector<1x8x128xf32>
    tpu.vector_store %arg11[%131, %c0_88, %c0_89], %134 {strides = array<i32>} : memref<8x8x128xf32, #tpu.memory_space<vmem>>, vector<1x8x128xf32>,
    %c4_i32 = arith.constant 4 : i32
    %c0_90 = arith.constant 0 : index
    %c0_91 = arith.constant 0 : index
    %135 = vector.load %arg13[%c0_90, %c0_91] : memref<8x128xf32, #tpu.memory_space<vmem>>, vector<8x128xf32>
    %c0_92 = arith.constant 0 : index
    %c0_93 = arith.constant 0 : index
    %136 = vector.load %arg14[%c0_92, %c0_93] : memref<8x128xf32, #tpu.memory_space<vmem>>, vector<8x128xf32>
    %137 = arith.index_cast %c4_i32 : i32 to index
    %c0_94 = arith.constant 0 : index
    %c0_95 = arith.constant 0 : index
    %138 = vector.load %arg12[%137, %c0_94, %c0_95] : memref<8x8x128xf32, #tpu.memory_space<vmem>>, vector<1x8x128xf32>
    %139 = vector.shape_cast %138 : vector<1x8x128xf32> to vector<8x128xf32>
    %c0_96 = arith.constant 0 : index
    %c0_97 = arith.constant 0 : index
    %140 = vector.load %arg3[%c0_96, %c0_97] : memref<128x128xf32, #tpu.memory_space<vmem>>, vector<128x128xf32>
    %cst_98 = arith.constant dense<0.000000e+00> : vector<8x128xf32>
    %141 = tpu.matmul %135, %140, %cst_98 {dimension_numbers = #tpu.dot_dimension_numbers<[1], [0], [0], [1], [0, 0, 1, 1], [], []>} : vector<8x128xf32>, vector<128x128xf32>, vector<8x128xf32> -> vector<8x128xf32>
    %142 = arith.addf %139, %141 : vector<8x128xf32>
    %143 = math.tanh %142 : vector<8x128xf32>
    %144 = arith.negf %142 : vector<8x128xf32>
    %145 = math.exp %144 : vector<8x128xf32>
    %cst_99 = arith.constant 1.000000e+00 : f32
    %146 = vector.broadcast %cst_99 : f32 to vector<8x128xf32>
    %147 = arith.addf %146, %145 : vector<8x128xf32>
    %148 = arith.divf %146, %147 : vector<8x128xf32>
    %149 = arith.select %5, %143, %148 : vector<8x128xi1>, vector<8x128xf32>
    %c96_i32_100 = arith.constant 96 : i32
    %150 = tpu.dynamic_rotate %149 by %c96_i32_100 dim 1 : vector<8x128xf32>, i32 -> vector<8x128xf32>
    %c64_i32_101 = arith.constant 64 : i32
    %151 = tpu.dynamic_rotate %149 by %c64_i32_101 dim 1 : vector<8x128xf32>, i32 -> vector<8x128xf32>
    %c32_i32_102 = arith.constant 32 : i32
    %152 = tpu.dynamic_rotate %149 by %c32_i32_102 dim 1 : vector<8x128xf32>, i32 -> vector<8x128xf32>
    %153 = arith.mulf %150, %136 : vector<8x128xf32>
    %154 = arith.mulf %149, %151 : vector<8x128xf32>
    %155 = arith.addf %153, %154 : vector<8x128xf32>
    %156 = math.tanh %155 : vector<8x128xf32>
    %157 = arith.mulf %152, %156 : vector<8x128xf32>
    %c0_103 = arith.constant 0 : index
    %c0_104 = arith.constant 0 : index
    %158 = vector.load %arg14[%c0_103, %c0_104] : memref<8x128xf32, #tpu.memory_space<vmem>>, vector<8x128xf32>
    tpu.vector_store %arg14[%c0_103, %c0_104], %155 {strides = array<i32>} : memref<8x128xf32, #tpu.memory_space<vmem>>, vector<8x128xf32>,
    %c0_105 = arith.constant 0 : index
    %c0_106 = arith.constant 0 : index
    %159 = vector.load %arg13[%c0_105, %c0_106] : memref<8x128xf32, #tpu.memory_space<vmem>>, vector<8x128xf32>
    tpu.vector_store %arg13[%c0_105, %c0_106], %157 {strides = array<i32>} : memref<8x128xf32, #tpu.memory_space<vmem>>, vector<8x128xf32>,
    %160 = arith.index_cast %c4_i32 : i32 to index
    %c0_107 = arith.constant 0 : index
    %c0_108 = arith.constant 0 : index
    %161 = vector.load %arg11[%160, %c0_107, %c0_108] : memref<8x8x128xf32, #tpu.memory_space<vmem>>, vector<1x8x128xf32>
    %162 = vector.shape_cast %161 : vector<1x8x128xf32> to vector<8x128xf32>
    %163 = vector.shape_cast %157 : vector<8x128xf32> to vector<1x8x128xf32>
    tpu.vector_store %arg11[%160, %c0_107, %c0_108], %163 {strides = array<i32>} : memref<8x8x128xf32, #tpu.memory_space<vmem>>, vector<1x8x128xf32>,
    %c5_i32 = arith.constant 5 : i32
    %c0_109 = arith.constant 0 : index
    %c0_110 = arith.constant 0 : index
    %164 = vector.load %arg13[%c0_109, %c0_110] : memref<8x128xf32, #tpu.memory_space<vmem>>, vector<8x128xf32>
    %c0_111 = arith.constant 0 : index
    %c0_112 = arith.constant 0 : index
    %165 = vector.load %arg14[%c0_111, %c0_112] : memref<8x128xf32, #tpu.memory_space<vmem>>, vector<8x128xf32>
    %166 = arith.index_cast %c5_i32 : i32 to index
    %c0_113 = arith.constant 0 : index
    %c0_114 = arith.constant 0 : index
    %167 = vector.load %arg12[%166, %c0_113, %c0_114] : memref<8x8x128xf32, #tpu.memory_space<vmem>>, vector<1x8x128xf32>
    %168 = vector.shape_cast %167 : vector<1x8x128xf32> to vector<8x128xf32>
    %c0_115 = arith.constant 0 : index
    %c0_116 = arith.constant 0 : index
    %169 = vector.load %arg3[%c0_115, %c0_116] : memref<128x128xf32, #tpu.memory_space<vmem>>, vector<128x128xf32>
    %cst_117 = arith.constant dense<0.000000e+00> : vector<8x128xf32>
    %170 = tpu.matmul %164, %169, %cst_117 {dimension_numbers = #tpu.dot_dimension_numbers<[1], [0], [0], [1], [0, 0, 1, 1], [], []>} : vector<8x128xf32>, vector<128x128xf32>, vector<8x128xf32> -> vector<8x128xf32>
    %171 = arith.addf %168, %170 : vector<8x128xf32>
    %172 = math.tanh %171 : vector<8x128xf32>
    %173 = arith.negf %171 : vector<8x128xf32>
    %174 = math.exp %173 : vector<8x128xf32>
    %cst_118 = arith.constant 1.000000e+00 : f32
    %175 = vector.broadcast %cst_118 : f32 to vector<8x128xf32>
    %176 = arith.addf %175, %174 : vector<8x128xf32>
    %177 = arith.divf %175, %176 : vector<8x128xf32>
    %178 = arith.select %5, %172, %177 : vector<8x128xi1>, vector<8x128xf32>
    %c96_i32_119 = arith.constant 96 : i32
    %179 = tpu.dynamic_rotate %178 by %c96_i32_119 dim 1 : vector<8x128xf32>, i32 -> vector<8x128xf32>
    %c64_i32_120 = arith.constant 64 : i32
    %180 = tpu.dynamic_rotate %178 by %c64_i32_120 dim 1 : vector<8x128xf32>, i32 -> vector<8x128xf32>
    %c32_i32_121 = arith.constant 32 : i32
    %181 = tpu.dynamic_rotate %178 by %c32_i32_121 dim 1 : vector<8x128xf32>, i32 -> vector<8x128xf32>
    %182 = arith.mulf %179, %165 : vector<8x128xf32>
    %183 = arith.mulf %178, %180 : vector<8x128xf32>
    %184 = arith.addf %182, %183 : vector<8x128xf32>
    %185 = math.tanh %184 : vector<8x128xf32>
    %186 = arith.mulf %181, %185 : vector<8x128xf32>
    %c0_122 = arith.constant 0 : index
    %c0_123 = arith.constant 0 : index
    %187 = vector.load %arg14[%c0_122, %c0_123] : memref<8x128xf32, #tpu.memory_space<vmem>>, vector<8x128xf32>
    tpu.vector_store %arg14[%c0_122, %c0_123], %184 {strides = array<i32>} : memref<8x128xf32, #tpu.memory_space<vmem>>, vector<8x128xf32>,
    %c0_124 = arith.constant 0 : index
    %c0_125 = arith.constant 0 : index
    %188 = vector.load %arg13[%c0_124, %c0_125] : memref<8x128xf32, #tpu.memory_space<vmem>>, vector<8x128xf32>
    tpu.vector_store %arg13[%c0_124, %c0_125], %186 {strides = array<i32>} : memref<8x128xf32, #tpu.memory_space<vmem>>, vector<8x128xf32>,
    %189 = arith.index_cast %c5_i32 : i32 to index
    %c0_126 = arith.constant 0 : index
    %c0_127 = arith.constant 0 : index
    %190 = vector.load %arg11[%189, %c0_126, %c0_127] : memref<8x8x128xf32, #tpu.memory_space<vmem>>, vector<1x8x128xf32>
    %191 = vector.shape_cast %190 : vector<1x8x128xf32> to vector<8x128xf32>
    %192 = vector.shape_cast %186 : vector<8x128xf32> to vector<1x8x128xf32>
    tpu.vector_store %arg11[%189, %c0_126, %c0_127], %192 {strides = array<i32>} : memref<8x8x128xf32, #tpu.memory_space<vmem>>, vector<1x8x128xf32>,
    %c6_i32 = arith.constant 6 : i32
    %c0_128 = arith.constant 0 : index
    %c0_129 = arith.constant 0 : index
    %193 = vector.load %arg13[%c0_128, %c0_129] : memref<8x128xf32, #tpu.memory_space<vmem>>, vector<8x128xf32>
    %c0_130 = arith.constant 0 : index
    %c0_131 = arith.constant 0 : index
    %194 = vector.load %arg14[%c0_130, %c0_131] : memref<8x128xf32, #tpu.memory_space<vmem>>, vector<8x128xf32>
    %195 = arith.index_cast %c6_i32 : i32 to index
    %c0_132 = arith.constant 0 : index
    %c0_133 = arith.constant 0 : index
    %196 = vector.load %arg12[%195, %c0_132, %c0_133] : memref<8x8x128xf32, #tpu.memory_space<vmem>>, vector<1x8x128xf32>
    %197 = vector.shape_cast %196 : vector<1x8x128xf32> to vector<8x128xf32>
    %c0_134 = arith.constant 0 : index
    %c0_135 = arith.constant 0 : index
    %198 = vector.load %arg3[%c0_134, %c0_135] : memref<128x128xf32, #tpu.memory_space<vmem>>, vector<128x128xf32>
    %cst_136 = arith.constant dense<0.000000e+00> : vector<8x128xf32>
    %199 = tpu.matmul %193, %198, %cst_136 {dimension_numbers = #tpu.dot_dimension_numbers<[1], [0], [0], [1], [0, 0, 1, 1], [], []>} : vector<8x128xf32>, vector<128x128xf32>, vector<8x128xf32> -> vector<8x128xf32>
    %200 = arith.addf %197, %199 : vector<8x128xf32>
    %201 = math.tanh %200 : vector<8x128xf32>
    %202 = arith.negf %200 : vector<8x128xf32>
    %203 = math.exp %202 : vector<8x128xf32>
    %cst_137 = arith.constant 1.000000e+00 : f32
    %204 = vector.broadcast %cst_137 : f32 to vector<8x128xf32>
    %205 = arith.addf %204, %203 : vector<8x128xf32>
    %206 = arith.divf %204, %205 : vector<8x128xf32>
    %207 = arith.select %5, %201, %206 : vector<8x128xi1>, vector<8x128xf32>
    %c96_i32_138 = arith.constant 96 : i32
    %208 = tpu.dynamic_rotate %207 by %c96_i32_138 dim 1 : vector<8x128xf32>, i32 -> vector<8x128xf32>
    %c64_i32_139 = arith.constant 64 : i32
    %209 = tpu.dynamic_rotate %207 by %c64_i32_139 dim 1 : vector<8x128xf32>, i32 -> vector<8x128xf32>
    %c32_i32_140 = arith.constant 32 : i32
    %210 = tpu.dynamic_rotate %207 by %c32_i32_140 dim 1 : vector<8x128xf32>, i32 -> vector<8x128xf32>
    %211 = arith.mulf %208, %194 : vector<8x128xf32>
    %212 = arith.mulf %207, %209 : vector<8x128xf32>
    %213 = arith.addf %211, %212 : vector<8x128xf32>
    %214 = math.tanh %213 : vector<8x128xf32>
    %215 = arith.mulf %210, %214 : vector<8x128xf32>
    %c0_141 = arith.constant 0 : index
    %c0_142 = arith.constant 0 : index
    %216 = vector.load %arg14[%c0_141, %c0_142] : memref<8x128xf32, #tpu.memory_space<vmem>>, vector<8x128xf32>
    tpu.vector_store %arg14[%c0_141, %c0_142], %213 {strides = array<i32>} : memref<8x128xf32, #tpu.memory_space<vmem>>, vector<8x128xf32>,
    %c0_143 = arith.constant 0 : index
    %c0_144 = arith.constant 0 : index
    %217 = vector.load %arg13[%c0_143, %c0_144] : memref<8x128xf32, #tpu.memory_space<vmem>>, vector<8x128xf32>
    tpu.vector_store %arg13[%c0_143, %c0_144], %215 {strides = array<i32>} : memref<8x128xf32, #tpu.memory_space<vmem>>, vector<8x128xf32>,
    %218 = arith.index_cast %c6_i32 : i32 to index
    %c0_145 = arith.constant 0 : index
    %c0_146 = arith.constant 0 : index
    %219 = vector.load %arg11[%218, %c0_145, %c0_146] : memref<8x8x128xf32, #tpu.memory_space<vmem>>, vector<1x8x128xf32>
    %220 = vector.shape_cast %219 : vector<1x8x128xf32> to vector<8x128xf32>
    %221 = vector.shape_cast %215 : vector<8x128xf32> to vector<1x8x128xf32>
    tpu.vector_store %arg11[%218, %c0_145, %c0_146], %221 {strides = array<i32>} : memref<8x8x128xf32, #tpu.memory_space<vmem>>, vector<1x8x128xf32>,
    %c7_i32 = arith.constant 7 : i32
    %c0_147 = arith.constant 0 : index
    %c0_148 = arith.constant 0 : index
    %222 = vector.load %arg13[%c0_147, %c0_148] : memref<8x128xf32, #tpu.memory_space<vmem>>, vector<8x128xf32>
    %c0_149 = arith.constant 0 : index
    %c0_150 = arith.constant 0 : index
    %223 = vector.load %arg14[%c0_149, %c0_150] : memref<8x128xf32, #tpu.memory_space<vmem>>, vector<8x128xf32>
    %224 = arith.index_cast %c7_i32 : i32 to index
    %c0_151 = arith.constant 0 : index
    %c0_152 = arith.constant 0 : index
    %225 = vector.load %arg12[%224, %c0_151, %c0_152] : memref<8x8x128xf32, #tpu.memory_space<vmem>>, vector<1x8x128xf32>
    %226 = vector.shape_cast %225 : vector<1x8x128xf32> to vector<8x128xf32>
    %c0_153 = arith.constant 0 : index
    %c0_154 = arith.constant 0 : index
    %227 = vector.load %arg3[%c0_153, %c0_154] : memref<128x128xf32, #tpu.memory_space<vmem>>, vector<128x128xf32>
    %cst_155 = arith.constant dense<0.000000e+00> : vector<8x128xf32>
    %228 = tpu.matmul %222, %227, %cst_155 {dimension_numbers = #tpu.dot_dimension_numbers<[1], [0], [0], [1], [0, 0, 1, 1], [], []>} : vector<8x128xf32>, vector<128x128xf32>, vector<8x128xf32> -> vector<8x128xf32>
    %229 = arith.addf %226, %228 : vector<8x128xf32>
    %230 = math.tanh %229 : vector<8x128xf32>
    %231 = arith.negf %229 : vector<8x128xf32>
    %232 = math.exp %231 : vector<8x128xf32>
    %cst_156 = arith.constant 1.000000e+00 : f32
    %233 = vector.broadcast %cst_156 : f32 to vector<8x128xf32>
    %234 = arith.addf %233, %232 : vector<8x128xf32>
    %235 = arith.divf %233, %234 : vector<8x128xf32>
    %236 = arith.select %5, %230, %235 : vector<8x128xi1>, vector<8x128xf32>
    %c96_i32_157 = arith.constant 96 : i32
    %237 = tpu.dynamic_rotate %236 by %c96_i32_157 dim 1 : vector<8x128xf32>, i32 -> vector<8x128xf32>
    %c64_i32_158 = arith.constant 64 : i32
    %238 = tpu.dynamic_rotate %236 by %c64_i32_158 dim 1 : vector<8x128xf32>, i32 -> vector<8x128xf32>
    %c32_i32_159 = arith.constant 32 : i32
    %239 = tpu.dynamic_rotate %236 by %c32_i32_159 dim 1 : vector<8x128xf32>, i32 -> vector<8x128xf32>
    %240 = arith.mulf %237, %223 : vector<8x128xf32>
    %241 = arith.mulf %236, %238 : vector<8x128xf32>
    %242 = arith.addf %240, %241 : vector<8x128xf32>
    %243 = math.tanh %242 : vector<8x128xf32>
    %244 = arith.mulf %239, %243 : vector<8x128xf32>
    %c0_160 = arith.constant 0 : index
    %c0_161 = arith.constant 0 : index
    %245 = vector.load %arg14[%c0_160, %c0_161] : memref<8x128xf32, #tpu.memory_space<vmem>>, vector<8x128xf32>
    tpu.vector_store %arg14[%c0_160, %c0_161], %242 {strides = array<i32>} : memref<8x128xf32, #tpu.memory_space<vmem>>, vector<8x128xf32>,
    %c0_162 = arith.constant 0 : index
    %c0_163 = arith.constant 0 : index
    %246 = vector.load %arg13[%c0_162, %c0_163] : memref<8x128xf32, #tpu.memory_space<vmem>>, vector<8x128xf32>
    tpu.vector_store %arg13[%c0_162, %c0_163], %244 {strides = array<i32>} : memref<8x128xf32, #tpu.memory_space<vmem>>, vector<8x128xf32>,
    %247 = arith.index_cast %c7_i32 : i32 to index
    %c0_164 = arith.constant 0 : index
    %c0_165 = arith.constant 0 : index
    %248 = vector.load %arg11[%247, %c0_164, %c0_165] : memref<8x8x128xf32, #tpu.memory_space<vmem>>, vector<1x8x128xf32>
    %249 = vector.shape_cast %248 : vector<1x8x128xf32> to vector<8x128xf32>
    %250 = vector.shape_cast %244 : vector<8x128xf32> to vector<1x8x128xf32>
    tpu.vector_store %arg11[%247, %c0_164, %c0_165], %250 {strides = array<i32>} : memref<8x8x128xf32, #tpu.memory_space<vmem>>, vector<1x8x128xf32>,
    %c8_i32 = arith.constant 8 : i32
    %c0_166 = arith.constant 0 : index
    %c0_167 = arith.constant 0 : index
    %c0_168 = arith.constant 0 : index
    %251 = vector.load %arg11[%c0_166, %c0_167, %c0_168] : memref<8x8x128xf32, #tpu.memory_space<vmem>>, vector<8x8x128xf32>
    %252 = vector.shape_cast %251 : vector<8x8x128xf32> to vector<64x128xf32>
    %c0_169 = arith.constant 0 : index
    %c0_170 = arith.constant 0 : index
    %253 = vector.load %arg5[%c0_169, %c0_170] : memref<128x128xf32, #tpu.memory_space<vmem>>, vector<128x128xf32>
    %cst_171 = arith.constant dense<0.000000e+00> : vector<64x128xf32>
    %254 = tpu.matmul %252, %253, %cst_171 {dimension_numbers = #tpu.dot_dimension_numbers<[1], [0], [0], [1], [0, 0, 1, 1], [], []>} : vector<64x128xf32>, vector<128x128xf32>, vector<64x128xf32> -> vector<64x128xf32>
    %c0_172 = arith.constant 0 : index
    %c0_173 = arith.constant 0 : index
    %255 = vector.load %arg7[%c0_172, %c0_173] : memref<1x128xf32, #tpu.memory_space<vmem>>, vector<1x128xf32>
    %256 = vector.broadcast %255 : vector<1x128xf32> to vector<64x128xf32>
    %257 = arith.addf %254, %256 : vector<64x128xf32>
    %258 = vector.shape_cast %257 : vector<64x128xf32> to vector<8x8x128xf32>
    %c0_174 = arith.constant 0 : index
    %c0_175 = arith.constant 0 : index
    %c0_176 = arith.constant 0 : index
    %259 = vector.load %arg12[%c0_174, %c0_175, %c0_176] : memref<8x8x128xf32, #tpu.memory_space<vmem>>, vector<8x8x128xf32>
    tpu.vector_store %arg12[%c0_174, %c0_175, %c0_176], %258 {strides = array<i32>} : memref<8x8x128xf32, #tpu.memory_space<vmem>>, vector<8x8x128xf32>,
    %cst_177 = arith.constant 0.000000e+00 : f32
    %260 = vector.broadcast %cst_177 : f32 to vector<8x128xf32>
    %c0_178 = arith.constant 0 : index
    %c0_179 = arith.constant 0 : index
    %261 = vector.load %arg13[%c0_178, %c0_179] : memref<8x128xf32, #tpu.memory_space<vmem>>, vector<8x128xf32>
    tpu.vector_store %arg13[%c0_178, %c0_179], %260 {strides = array<i32>} : memref<8x128xf32, #tpu.memory_space<vmem>>, vector<8x128xf32>,
    %cst_180 = arith.constant 0.000000e+00 : f32
    %262 = vector.broadcast %cst_180 : f32 to vector<8x128xf32>
    %c0_181 = arith.constant 0 : index
    %c0_182 = arith.constant 0 : index
    %263 = vector.load %arg14[%c0_181, %c0_182] : memref<8x128xf32, #tpu.memory_space<vmem>>, vector<8x128xf32>
    tpu.vector_store %arg14[%c0_181, %c0_182], %262 {strides = array<i32>} : memref<8x128xf32, #tpu.memory_space<vmem>>, vector<8x128xf32>,
    %c0_i32_183 = arith.constant 0 : i32
    %c0_184 = arith.constant 0 : index
    %c0_185 = arith.constant 0 : index
    %264 = vector.load %arg13[%c0_184, %c0_185] : memref<8x128xf32, #tpu.memory_space<vmem>>, vector<8x128xf32>
    %c0_186 = arith.constant 0 : index
    %c0_187 = arith.constant 0 : index
    %265 = vector.load %arg14[%c0_186, %c0_187] : memref<8x128xf32, #tpu.memory_space<vmem>>, vector<8x128xf32>
    %266 = arith.index_cast %c0_i32_183 : i32 to index
    %c0_188 = arith.constant 0 : index
    %c0_189 = arith.constant 0 : index
    %267 = vector.load %arg12[%266, %c0_188, %c0_189] : memref<8x8x128xf32, #tpu.memory_space<vmem>>, vector<1x8x128xf32>
    %268 = vector.shape_cast %267 : vector<1x8x128xf32> to vector<8x128xf32>
    %c0_190 = arith.constant 0 : index
    %c0_191 = arith.constant 0 : index
    %269 = vector.load %arg6[%c0_190, %c0_191] : memref<128x128xf32, #tpu.memory_space<vmem>>, vector<128x128xf32>
    %cst_192 = arith.constant dense<0.000000e+00> : vector<8x128xf32>
    %270 = tpu.matmul %264, %269, %cst_192 {dimension_numbers = #tpu.dot_dimension_numbers<[1], [0], [0], [1], [0, 0, 1, 1], [], []>} : vector<8x128xf32>, vector<128x128xf32>, vector<8x128xf32> -> vector<8x128xf32>
    %271 = arith.addf %268, %270 : vector<8x128xf32>
    %272 = math.tanh %271 : vector<8x128xf32>
    %273 = arith.negf %271 : vector<8x128xf32>
    %274 = math.exp %273 : vector<8x128xf32>
    %cst_193 = arith.constant 1.000000e+00 : f32
    %275 = vector.broadcast %cst_193 : f32 to vector<8x128xf32>
    %276 = arith.addf %275, %274 : vector<8x128xf32>
    %277 = arith.divf %275, %276 : vector<8x128xf32>
    %278 = arith.select %5, %272, %277 : vector<8x128xi1>, vector<8x128xf32>
    %c96_i32_194 = arith.constant 96 : i32
    %279 = tpu.dynamic_rotate %278 by %c96_i32_194 dim 1 : vector<8x128xf32>, i32 -> vector<8x128xf32>
    %c64_i32_195 = arith.constant 64 : i32
    %280 = tpu.dynamic_rotate %278 by %c64_i32_195 dim 1 : vector<8x128xf32>, i32 -> vector<8x128xf32>
    %c32_i32_196 = arith.constant 32 : i32
    %281 = tpu.dynamic_rotate %278 by %c32_i32_196 dim 1 : vector<8x128xf32>, i32 -> vector<8x128xf32>
    %282 = arith.mulf %279, %265 : vector<8x128xf32>
    %283 = arith.mulf %278, %280 : vector<8x128xf32>
    %284 = arith.addf %282, %283 : vector<8x128xf32>
    %285 = math.tanh %284 : vector<8x128xf32>
    %286 = arith.mulf %281, %285 : vector<8x128xf32>
    %c0_197 = arith.constant 0 : index
    %c0_198 = arith.constant 0 : index
    %287 = vector.load %arg14[%c0_197, %c0_198] : memref<8x128xf32, #tpu.memory_space<vmem>>, vector<8x128xf32>
    tpu.vector_store %arg14[%c0_197, %c0_198], %284 {strides = array<i32>} : memref<8x128xf32, #tpu.memory_space<vmem>>, vector<8x128xf32>,
    %c0_199 = arith.constant 0 : index
    %c0_200 = arith.constant 0 : index
    %288 = vector.load %arg13[%c0_199, %c0_200] : memref<8x128xf32, #tpu.memory_space<vmem>>, vector<8x128xf32>
    tpu.vector_store %arg13[%c0_199, %c0_200], %286 {strides = array<i32>} : memref<8x128xf32, #tpu.memory_space<vmem>>, vector<8x128xf32>,
    %289 = arith.index_cast %c0_i32_183 : i32 to index
    %c0_201 = arith.constant 0 : index
    %c0_202 = arith.constant 0 : index
    %290 = vector.load %arg11[%289, %c0_201, %c0_202] : memref<8x8x128xf32, #tpu.memory_space<vmem>>, vector<1x8x128xf32>
    %291 = vector.shape_cast %290 : vector<1x8x128xf32> to vector<8x128xf32>
    %292 = vector.shape_cast %286 : vector<8x128xf32> to vector<1x8x128xf32>
    tpu.vector_store %arg11[%289, %c0_201, %c0_202], %292 {strides = array<i32>} : memref<8x8x128xf32, #tpu.memory_space<vmem>>, vector<1x8x128xf32>,
    %c1_i32_203 = arith.constant 1 : i32
    %c0_204 = arith.constant 0 : index
    %c0_205 = arith.constant 0 : index
    %293 = vector.load %arg13[%c0_204, %c0_205] : memref<8x128xf32, #tpu.memory_space<vmem>>, vector<8x128xf32>
    %c0_206 = arith.constant 0 : index
    %c0_207 = arith.constant 0 : index
    %294 = vector.load %arg14[%c0_206, %c0_207] : memref<8x128xf32, #tpu.memory_space<vmem>>, vector<8x128xf32>
    %295 = arith.index_cast %c1_i32_203 : i32 to index
    %c0_208 = arith.constant 0 : index
    %c0_209 = arith.constant 0 : index
    %296 = vector.load %arg12[%295, %c0_208, %c0_209] : memref<8x8x128xf32, #tpu.memory_space<vmem>>, vector<1x8x128xf32>
    %297 = vector.shape_cast %296 : vector<1x8x128xf32> to vector<8x128xf32>
    %c0_210 = arith.constant 0 : index
    %c0_211 = arith.constant 0 : index
    %298 = vector.load %arg6[%c0_210, %c0_211] : memref<128x128xf32, #tpu.memory_space<vmem>>, vector<128x128xf32>
    %cst_212 = arith.constant dense<0.000000e+00> : vector<8x128xf32>
    %299 = tpu.matmul %293, %298, %cst_212 {dimension_numbers = #tpu.dot_dimension_numbers<[1], [0], [0], [1], [0, 0, 1, 1], [], []>} : vector<8x128xf32>, vector<128x128xf32>, vector<8x128xf32> -> vector<8x128xf32>
    %300 = arith.addf %297, %299 : vector<8x128xf32>
    %301 = math.tanh %300 : vector<8x128xf32>
    %302 = arith.negf %300 : vector<8x128xf32>
    %303 = math.exp %302 : vector<8x128xf32>
    %cst_213 = arith.constant 1.000000e+00 : f32
    %304 = vector.broadcast %cst_213 : f32 to vector<8x128xf32>
    %305 = arith.addf %304, %303 : vector<8x128xf32>
    %306 = arith.divf %304, %305 : vector<8x128xf32>
    %307 = arith.select %5, %301, %306 : vector<8x128xi1>, vector<8x128xf32>
    %c96_i32_214 = arith.constant 96 : i32
    %308 = tpu.dynamic_rotate %307 by %c96_i32_214 dim 1 : vector<8x128xf32>, i32 -> vector<8x128xf32>
    %c64_i32_215 = arith.constant 64 : i32
    %309 = tpu.dynamic_rotate %307 by %c64_i32_215 dim 1 : vector<8x128xf32>, i32 -> vector<8x128xf32>
    %c32_i32_216 = arith.constant 32 : i32
    %310 = tpu.dynamic_rotate %307 by %c32_i32_216 dim 1 : vector<8x128xf32>, i32 -> vector<8x128xf32>
    %311 = arith.mulf %308, %294 : vector<8x128xf32>
    %312 = arith.mulf %307, %309 : vector<8x128xf32>
    %313 = arith.addf %311, %312 : vector<8x128xf32>
    %314 = math.tanh %313 : vector<8x128xf32>
    %315 = arith.mulf %310, %314 : vector<8x128xf32>
    %c0_217 = arith.constant 0 : index
    %c0_218 = arith.constant 0 : index
    %316 = vector.load %arg14[%c0_217, %c0_218] : memref<8x128xf32, #tpu.memory_space<vmem>>, vector<8x128xf32>
    tpu.vector_store %arg14[%c0_217, %c0_218], %313 {strides = array<i32>} : memref<8x128xf32, #tpu.memory_space<vmem>>, vector<8x128xf32>,
    %c0_219 = arith.constant 0 : index
    %c0_220 = arith.constant 0 : index
    %317 = vector.load %arg13[%c0_219, %c0_220] : memref<8x128xf32, #tpu.memory_space<vmem>>, vector<8x128xf32>
    tpu.vector_store %arg13[%c0_219, %c0_220], %315 {strides = array<i32>} : memref<8x128xf32, #tpu.memory_space<vmem>>, vector<8x128xf32>,
    %318 = arith.index_cast %c1_i32_203 : i32 to index
    %c0_221 = arith.constant 0 : index
    %c0_222 = arith.constant 0 : index
    %319 = vector.load %arg11[%318, %c0_221, %c0_222] : memref<8x8x128xf32, #tpu.memory_space<vmem>>, vector<1x8x128xf32>
    %320 = vector.shape_cast %319 : vector<1x8x128xf32> to vector<8x128xf32>
    %321 = vector.shape_cast %315 : vector<8x128xf32> to vector<1x8x128xf32>
    tpu.vector_store %arg11[%318, %c0_221, %c0_222], %321 {strides = array<i32>} : memref<8x8x128xf32, #tpu.memory_space<vmem>>, vector<1x8x128xf32>,
    %c2_i32_223 = arith.constant 2 : i32
    %c0_224 = arith.constant 0 : index
    %c0_225 = arith.constant 0 : index
    %322 = vector.load %arg13[%c0_224, %c0_225] : memref<8x128xf32, #tpu.memory_space<vmem>>, vector<8x128xf32>
    %c0_226 = arith.constant 0 : index
    %c0_227 = arith.constant 0 : index
    %323 = vector.load %arg14[%c0_226, %c0_227] : memref<8x128xf32, #tpu.memory_space<vmem>>, vector<8x128xf32>
    %324 = arith.index_cast %c2_i32_223 : i32 to index
    %c0_228 = arith.constant 0 : index
    %c0_229 = arith.constant 0 : index
    %325 = vector.load %arg12[%324, %c0_228, %c0_229] : memref<8x8x128xf32, #tpu.memory_space<vmem>>, vector<1x8x128xf32>
    %326 = vector.shape_cast %325 : vector<1x8x128xf32> to vector<8x128xf32>
    %c0_230 = arith.constant 0 : index
    %c0_231 = arith.constant 0 : index
    %327 = vector.load %arg6[%c0_230, %c0_231] : memref<128x128xf32, #tpu.memory_space<vmem>>, vector<128x128xf32>
    %cst_232 = arith.constant dense<0.000000e+00> : vector<8x128xf32>
    %328 = tpu.matmul %322, %327, %cst_232 {dimension_numbers = #tpu.dot_dimension_numbers<[1], [0], [0], [1], [0, 0, 1, 1], [], []>} : vector<8x128xf32>, vector<128x128xf32>, vector<8x128xf32> -> vector<8x128xf32>
    %329 = arith.addf %326, %328 : vector<8x128xf32>
    %330 = math.tanh %329 : vector<8x128xf32>
    %331 = arith.negf %329 : vector<8x128xf32>
    %332 = math.exp %331 : vector<8x128xf32>
    %cst_233 = arith.constant 1.000000e+00 : f32
    %333 = vector.broadcast %cst_233 : f32 to vector<8x128xf32>
    %334 = arith.addf %333, %332 : vector<8x128xf32>
    %335 = arith.divf %333, %334 : vector<8x128xf32>
    %336 = arith.select %5, %330, %335 : vector<8x128xi1>, vector<8x128xf32>
    %c96_i32_234 = arith.constant 96 : i32
    %337 = tpu.dynamic_rotate %336 by %c96_i32_234 dim 1 : vector<8x128xf32>, i32 -> vector<8x128xf32>
    %c64_i32_235 = arith.constant 64 : i32
    %338 = tpu.dynamic_rotate %336 by %c64_i32_235 dim 1 : vector<8x128xf32>, i32 -> vector<8x128xf32>
    %c32_i32_236 = arith.constant 32 : i32
    %339 = tpu.dynamic_rotate %336 by %c32_i32_236 dim 1 : vector<8x128xf32>, i32 -> vector<8x128xf32>
    %340 = arith.mulf %337, %323 : vector<8x128xf32>
    %341 = arith.mulf %336, %338 : vector<8x128xf32>
    %342 = arith.addf %340, %341 : vector<8x128xf32>
    %343 = math.tanh %342 : vector<8x128xf32>
    %344 = arith.mulf %339, %343 : vector<8x128xf32>
    %c0_237 = arith.constant 0 : index
    %c0_238 = arith.constant 0 : index
    %345 = vector.load %arg14[%c0_237, %c0_238] : memref<8x128xf32, #tpu.memory_space<vmem>>, vector<8x128xf32>
    tpu.vector_store %arg14[%c0_237, %c0_238], %342 {strides = array<i32>} : memref<8x128xf32, #tpu.memory_space<vmem>>, vector<8x128xf32>,
    %c0_239 = arith.constant 0 : index
    %c0_240 = arith.constant 0 : index
    %346 = vector.load %arg13[%c0_239, %c0_240] : memref<8x128xf32, #tpu.memory_space<vmem>>, vector<8x128xf32>
    tpu.vector_store %arg13[%c0_239, %c0_240], %344 {strides = array<i32>} : memref<8x128xf32, #tpu.memory_space<vmem>>, vector<8x128xf32>,
    %347 = arith.index_cast %c2_i32_223 : i32 to index
    %c0_241 = arith.constant 0 : index
    %c0_242 = arith.constant 0 : index
    %348 = vector.load %arg11[%347, %c0_241, %c0_242] : memref<8x8x128xf32, #tpu.memory_space<vmem>>, vector<1x8x128xf32>
    %349 = vector.shape_cast %348 : vector<1x8x128xf32> to vector<8x128xf32>
    %350 = vector.shape_cast %344 : vector<8x128xf32> to vector<1x8x128xf32>
    tpu.vector_store %arg11[%347, %c0_241, %c0_242], %350 {strides = array<i32>} : memref<8x8x128xf32, #tpu.memory_space<vmem>>, vector<1x8x128xf32>,
    %c3_i32_243 = arith.constant 3 : i32
    %c0_244 = arith.constant 0 : index
    %c0_245 = arith.constant 0 : index
    %351 = vector.load %arg13[%c0_244, %c0_245] : memref<8x128xf32, #tpu.memory_space<vmem>>, vector<8x128xf32>
    %c0_246 = arith.constant 0 : index
    %c0_247 = arith.constant 0 : index
    %352 = vector.load %arg14[%c0_246, %c0_247] : memref<8x128xf32, #tpu.memory_space<vmem>>, vector<8x128xf32>
    %353 = arith.index_cast %c3_i32_243 : i32 to index
    %c0_248 = arith.constant 0 : index
    %c0_249 = arith.constant 0 : index
    %354 = vector.load %arg12[%353, %c0_248, %c0_249] : memref<8x8x128xf32, #tpu.memory_space<vmem>>, vector<1x8x128xf32>
    %355 = vector.shape_cast %354 : vector<1x8x128xf32> to vector<8x128xf32>
    %c0_250 = arith.constant 0 : index
    %c0_251 = arith.constant 0 : index
    %356 = vector.load %arg6[%c0_250, %c0_251] : memref<128x128xf32, #tpu.memory_space<vmem>>, vector<128x128xf32>
    %cst_252 = arith.constant dense<0.000000e+00> : vector<8x128xf32>
    %357 = tpu.matmul %351, %356, %cst_252 {dimension_numbers = #tpu.dot_dimension_numbers<[1], [0], [0], [1], [0, 0, 1, 1], [], []>} : vector<8x128xf32>, vector<128x128xf32>, vector<8x128xf32> -> vector<8x128xf32>
    %358 = arith.addf %355, %357 : vector<8x128xf32>
    %359 = math.tanh %358 : vector<8x128xf32>
    %360 = arith.negf %358 : vector<8x128xf32>
    %361 = math.exp %360 : vector<8x128xf32>
    %cst_253 = arith.constant 1.000000e+00 : f32
    %362 = vector.broadcast %cst_253 : f32 to vector<8x128xf32>
    %363 = arith.addf %362, %361 : vector<8x128xf32>
    %364 = arith.divf %362, %363 : vector<8x128xf32>
    %365 = arith.select %5, %359, %364 : vector<8x128xi1>, vector<8x128xf32>
    %c96_i32_254 = arith.constant 96 : i32
    %366 = tpu.dynamic_rotate %365 by %c96_i32_254 dim 1 : vector<8x128xf32>, i32 -> vector<8x128xf32>
    %c64_i32_255 = arith.constant 64 : i32
    %367 = tpu.dynamic_rotate %365 by %c64_i32_255 dim 1 : vector<8x128xf32>, i32 -> vector<8x128xf32>
    %c32_i32_256 = arith.constant 32 : i32
    %368 = tpu.dynamic_rotate %365 by %c32_i32_256 dim 1 : vector<8x128xf32>, i32 -> vector<8x128xf32>
    %369 = arith.mulf %366, %352 : vector<8x128xf32>
    %370 = arith.mulf %365, %367 : vector<8x128xf32>
    %371 = arith.addf %369, %370 : vector<8x128xf32>
    %372 = math.tanh %371 : vector<8x128xf32>
    %373 = arith.mulf %368, %372 : vector<8x128xf32>
    %c0_257 = arith.constant 0 : index
    %c0_258 = arith.constant 0 : index
    %374 = vector.load %arg14[%c0_257, %c0_258] : memref<8x128xf32, #tpu.memory_space<vmem>>, vector<8x128xf32>
    tpu.vector_store %arg14[%c0_257, %c0_258], %371 {strides = array<i32>} : memref<8x128xf32, #tpu.memory_space<vmem>>, vector<8x128xf32>,
    %c0_259 = arith.constant 0 : index
    %c0_260 = arith.constant 0 : index
    %375 = vector.load %arg13[%c0_259, %c0_260] : memref<8x128xf32, #tpu.memory_space<vmem>>, vector<8x128xf32>
    tpu.vector_store %arg13[%c0_259, %c0_260], %373 {strides = array<i32>} : memref<8x128xf32, #tpu.memory_space<vmem>>, vector<8x128xf32>,
    %376 = arith.index_cast %c3_i32_243 : i32 to index
    %c0_261 = arith.constant 0 : index
    %c0_262 = arith.constant 0 : index
    %377 = vector.load %arg11[%376, %c0_261, %c0_262] : memref<8x8x128xf32, #tpu.memory_space<vmem>>, vector<1x8x128xf32>
    %378 = vector.shape_cast %377 : vector<1x8x128xf32> to vector<8x128xf32>
    %379 = vector.shape_cast %373 : vector<8x128xf32> to vector<1x8x128xf32>
    tpu.vector_store %arg11[%376, %c0_261, %c0_262], %379 {strides = array<i32>} : memref<8x8x128xf32, #tpu.memory_space<vmem>>, vector<1x8x128xf32>,
    %c4_i32_263 = arith.constant 4 : i32
    %c0_264 = arith.constant 0 : index
    %c0_265 = arith.constant 0 : index
    %380 = vector.load %arg13[%c0_264, %c0_265] : memref<8x128xf32, #tpu.memory_space<vmem>>, vector<8x128xf32>
    %c0_266 = arith.constant 0 : index
    %c0_267 = arith.constant 0 : index
    %381 = vector.load %arg14[%c0_266, %c0_267] : memref<8x128xf32, #tpu.memory_space<vmem>>, vector<8x128xf32>
    %382 = arith.index_cast %c4_i32_263 : i32 to index
    %c0_268 = arith.constant 0 : index
    %c0_269 = arith.constant 0 : index
    %383 = vector.load %arg12[%382, %c0_268, %c0_269] : memref<8x8x128xf32, #tpu.memory_space<vmem>>, vector<1x8x128xf32>
    %384 = vector.shape_cast %383 : vector<1x8x128xf32> to vector<8x128xf32>
    %c0_270 = arith.constant 0 : index
    %c0_271 = arith.constant 0 : index
    %385 = vector.load %arg6[%c0_270, %c0_271] : memref<128x128xf32, #tpu.memory_space<vmem>>, vector<128x128xf32>
    %cst_272 = arith.constant dense<0.000000e+00> : vector<8x128xf32>
    %386 = tpu.matmul %380, %385, %cst_272 {dimension_numbers = #tpu.dot_dimension_numbers<[1], [0], [0], [1], [0, 0, 1, 1], [], []>} : vector<8x128xf32>, vector<128x128xf32>, vector<8x128xf32> -> vector<8x128xf32>
    %387 = arith.addf %384, %386 : vector<8x128xf32>
    %388 = math.tanh %387 : vector<8x128xf32>
    %389 = arith.negf %387 : vector<8x128xf32>
    %390 = math.exp %389 : vector<8x128xf32>
    %cst_273 = arith.constant 1.000000e+00 : f32
    %391 = vector.broadcast %cst_273 : f32 to vector<8x128xf32>
    %392 = arith.addf %391, %390 : vector<8x128xf32>
    %393 = arith.divf %391, %392 : vector<8x128xf32>
    %394 = arith.select %5, %388, %393 : vector<8x128xi1>, vector<8x128xf32>
    %c96_i32_274 = arith.constant 96 : i32
    %395 = tpu.dynamic_rotate %394 by %c96_i32_274 dim 1 : vector<8x128xf32>, i32 -> vector<8x128xf32>
    %c64_i32_275 = arith.constant 64 : i32
    %396 = tpu.dynamic_rotate %394 by %c64_i32_275 dim 1 : vector<8x128xf32>, i32 -> vector<8x128xf32>
    %c32_i32_276 = arith.constant 32 : i32
    %397 = tpu.dynamic_rotate %394 by %c32_i32_276 dim 1 : vector<8x128xf32>, i32 -> vector<8x128xf32>
    %398 = arith.mulf %395, %381 : vector<8x128xf32>
    %399 = arith.mulf %394, %396 : vector<8x128xf32>
    %400 = arith.addf %398, %399 : vector<8x128xf32>
    %401 = math.tanh %400 : vector<8x128xf32>
    %402 = arith.mulf %397, %401 : vector<8x128xf32>
    %c0_277 = arith.constant 0 : index
    %c0_278 = arith.constant 0 : index
    %403 = vector.load %arg14[%c0_277, %c0_278] : memref<8x128xf32, #tpu.memory_space<vmem>>, vector<8x128xf32>
    tpu.vector_store %arg14[%c0_277, %c0_278], %400 {strides = array<i32>} : memref<8x128xf32, #tpu.memory_space<vmem>>, vector<8x128xf32>,
    %c0_279 = arith.constant 0 : index
    %c0_280 = arith.constant 0 : index
    %404 = vector.load %arg13[%c0_279, %c0_280] : memref<8x128xf32, #tpu.memory_space<vmem>>, vector<8x128xf32>
    tpu.vector_store %arg13[%c0_279, %c0_280], %402 {strides = array<i32>} : memref<8x128xf32, #tpu.memory_space<vmem>>, vector<8x128xf32>,
    %405 = arith.index_cast %c4_i32_263 : i32 to index
    %c0_281 = arith.constant 0 : index
    %c0_282 = arith.constant 0 : index
    %406 = vector.load %arg11[%405, %c0_281, %c0_282] : memref<8x8x128xf32, #tpu.memory_space<vmem>>, vector<1x8x128xf32>
    %407 = vector.shape_cast %406 : vector<1x8x128xf32> to vector<8x128xf32>
    %408 = vector.shape_cast %402 : vector<8x128xf32> to vector<1x8x128xf32>
    tpu.vector_store %arg11[%405, %c0_281, %c0_282], %408 {strides = array<i32>} : memref<8x8x128xf32, #tpu.memory_space<vmem>>, vector<1x8x128xf32>,
    %c5_i32_283 = arith.constant 5 : i32
    %c0_284 = arith.constant 0 : index
    %c0_285 = arith.constant 0 : index
    %409 = vector.load %arg13[%c0_284, %c0_285] : memref<8x128xf32, #tpu.memory_space<vmem>>, vector<8x128xf32>
    %c0_286 = arith.constant 0 : index
    %c0_287 = arith.constant 0 : index
    %410 = vector.load %arg14[%c0_286, %c0_287] : memref<8x128xf32, #tpu.memory_space<vmem>>, vector<8x128xf32>
    %411 = arith.index_cast %c5_i32_283 : i32 to index
    %c0_288 = arith.constant 0 : index
    %c0_289 = arith.constant 0 : index
    %412 = vector.load %arg12[%411, %c0_288, %c0_289] : memref<8x8x128xf32, #tpu.memory_space<vmem>>, vector<1x8x128xf32>
    %413 = vector.shape_cast %412 : vector<1x8x128xf32> to vector<8x128xf32>
    %c0_290 = arith.constant 0 : index
    %c0_291 = arith.constant 0 : index
    %414 = vector.load %arg6[%c0_290, %c0_291] : memref<128x128xf32, #tpu.memory_space<vmem>>, vector<128x128xf32>
    %cst_292 = arith.constant dense<0.000000e+00> : vector<8x128xf32>
    %415 = tpu.matmul %409, %414, %cst_292 {dimension_numbers = #tpu.dot_dimension_numbers<[1], [0], [0], [1], [0, 0, 1, 1], [], []>} : vector<8x128xf32>, vector<128x128xf32>, vector<8x128xf32> -> vector<8x128xf32>
    %416 = arith.addf %413, %415 : vector<8x128xf32>
    %417 = math.tanh %416 : vector<8x128xf32>
    %418 = arith.negf %416 : vector<8x128xf32>
    %419 = math.exp %418 : vector<8x128xf32>
    %cst_293 = arith.constant 1.000000e+00 : f32
    %420 = vector.broadcast %cst_293 : f32 to vector<8x128xf32>
    %421 = arith.addf %420, %419 : vector<8x128xf32>
    %422 = arith.divf %420, %421 : vector<8x128xf32>
    %423 = arith.select %5, %417, %422 : vector<8x128xi1>, vector<8x128xf32>
    %c96_i32_294 = arith.constant 96 : i32
    %424 = tpu.dynamic_rotate %423 by %c96_i32_294 dim 1 : vector<8x128xf32>, i32 -> vector<8x128xf32>
    %c64_i32_295 = arith.constant 64 : i32
    %425 = tpu.dynamic_rotate %423 by %c64_i32_295 dim 1 : vector<8x128xf32>, i32 -> vector<8x128xf32>
    %c32_i32_296 = arith.constant 32 : i32
    %426 = tpu.dynamic_rotate %423 by %c32_i32_296 dim 1 : vector<8x128xf32>, i32 -> vector<8x128xf32>
    %427 = arith.mulf %424, %410 : vector<8x128xf32>
    %428 = arith.mulf %423, %425 : vector<8x128xf32>
    %429 = arith.addf %427, %428 : vector<8x128xf32>
    %430 = math.tanh %429 : vector<8x128xf32>
    %431 = arith.mulf %426, %430 : vector<8x128xf32>
    %c0_297 = arith.constant 0 : index
    %c0_298 = arith.constant 0 : index
    %432 = vector.load %arg14[%c0_297, %c0_298] : memref<8x128xf32, #tpu.memory_space<vmem>>, vector<8x128xf32>
    tpu.vector_store %arg14[%c0_297, %c0_298], %429 {strides = array<i32>} : memref<8x128xf32, #tpu.memory_space<vmem>>, vector<8x128xf32>,
    %c0_299 = arith.constant 0 : index
    %c0_300 = arith.constant 0 : index
    %433 = vector.load %arg13[%c0_299, %c0_300] : memref<8x128xf32, #tpu.memory_space<vmem>>, vector<8x128xf32>
    tpu.vector_store %arg13[%c0_299, %c0_300], %431 {strides = array<i32>} : memref<8x128xf32, #tpu.memory_space<vmem>>, vector<8x128xf32>,
    %434 = arith.index_cast %c5_i32_283 : i32 to index
    %c0_301 = arith.constant 0 : index
    %c0_302 = arith.constant 0 : index
    %435 = vector.load %arg11[%434, %c0_301, %c0_302] : memref<8x8x128xf32, #tpu.memory_space<vmem>>, vector<1x8x128xf32>
    %436 = vector.shape_cast %435 : vector<1x8x128xf32> to vector<8x128xf32>
    %437 = vector.shape_cast %431 : vector<8x128xf32> to vector<1x8x128xf32>
    tpu.vector_store %arg11[%434, %c0_301, %c0_302], %437 {strides = array<i32>} : memref<8x8x128xf32, #tpu.memory_space<vmem>>, vector<1x8x128xf32>,
    %c6_i32_303 = arith.constant 6 : i32
    %c0_304 = arith.constant 0 : index
    %c0_305 = arith.constant 0 : index
    %438 = vector.load %arg13[%c0_304, %c0_305] : memref<8x128xf32, #tpu.memory_space<vmem>>, vector<8x128xf32>
    %c0_306 = arith.constant 0 : index
    %c0_307 = arith.constant 0 : index
    %439 = vector.load %arg14[%c0_306, %c0_307] : memref<8x128xf32, #tpu.memory_space<vmem>>, vector<8x128xf32>
    %440 = arith.index_cast %c6_i32_303 : i32 to index
    %c0_308 = arith.constant 0 : index
    %c0_309 = arith.constant 0 : index
    %441 = vector.load %arg12[%440, %c0_308, %c0_309] : memref<8x8x128xf32, #tpu.memory_space<vmem>>, vector<1x8x128xf32>
    %442 = vector.shape_cast %441 : vector<1x8x128xf32> to vector<8x128xf32>
    %c0_310 = arith.constant 0 : index
    %c0_311 = arith.constant 0 : index
    %443 = vector.load %arg6[%c0_310, %c0_311] : memref<128x128xf32, #tpu.memory_space<vmem>>, vector<128x128xf32>
    %cst_312 = arith.constant dense<0.000000e+00> : vector<8x128xf32>
    %444 = tpu.matmul %438, %443, %cst_312 {dimension_numbers = #tpu.dot_dimension_numbers<[1], [0], [0], [1], [0, 0, 1, 1], [], []>} : vector<8x128xf32>, vector<128x128xf32>, vector<8x128xf32> -> vector<8x128xf32>
    %445 = arith.addf %442, %444 : vector<8x128xf32>
    %446 = math.tanh %445 : vector<8x128xf32>
    %447 = arith.negf %445 : vector<8x128xf32>
    %448 = math.exp %447 : vector<8x128xf32>
    %cst_313 = arith.constant 1.000000e+00 : f32
    %449 = vector.broadcast %cst_313 : f32 to vector<8x128xf32>
    %450 = arith.addf %449, %448 : vector<8x128xf32>
    %451 = arith.divf %449, %450 : vector<8x128xf32>
    %452 = arith.select %5, %446, %451 : vector<8x128xi1>, vector<8x128xf32>
    %c96_i32_314 = arith.constant 96 : i32
    %453 = tpu.dynamic_rotate %452 by %c96_i32_314 dim 1 : vector<8x128xf32>, i32 -> vector<8x128xf32>
    %c64_i32_315 = arith.constant 64 : i32
    %454 = tpu.dynamic_rotate %452 by %c64_i32_315 dim 1 : vector<8x128xf32>, i32 -> vector<8x128xf32>
    %c32_i32_316 = arith.constant 32 : i32
    %455 = tpu.dynamic_rotate %452 by %c32_i32_316 dim 1 : vector<8x128xf32>, i32 -> vector<8x128xf32>
    %456 = arith.mulf %453, %439 : vector<8x128xf32>
    %457 = arith.mulf %452, %454 : vector<8x128xf32>
    %458 = arith.addf %456, %457 : vector<8x128xf32>
    %459 = math.tanh %458 : vector<8x128xf32>
    %460 = arith.mulf %455, %459 : vector<8x128xf32>
    %c0_317 = arith.constant 0 : index
    %c0_318 = arith.constant 0 : index
    %461 = vector.load %arg14[%c0_317, %c0_318] : memref<8x128xf32, #tpu.memory_space<vmem>>, vector<8x128xf32>
    tpu.vector_store %arg14[%c0_317, %c0_318], %458 {strides = array<i32>} : memref<8x128xf32, #tpu.memory_space<vmem>>, vector<8x128xf32>,
    %c0_319 = arith.constant 0 : index
    %c0_320 = arith.constant 0 : index
    %462 = vector.load %arg13[%c0_319, %c0_320] : memref<8x128xf32, #tpu.memory_space<vmem>>, vector<8x128xf32>
    tpu.vector_store %arg13[%c0_319, %c0_320], %460 {strides = array<i32>} : memref<8x128xf32, #tpu.memory_space<vmem>>, vector<8x128xf32>,
    %463 = arith.index_cast %c6_i32_303 : i32 to index
    %c0_321 = arith.constant 0 : index
    %c0_322 = arith.constant 0 : index
    %464 = vector.load %arg11[%463, %c0_321, %c0_322] : memref<8x8x128xf32, #tpu.memory_space<vmem>>, vector<1x8x128xf32>
    %465 = vector.shape_cast %464 : vector<1x8x128xf32> to vector<8x128xf32>
    %466 = vector.shape_cast %460 : vector<8x128xf32> to vector<1x8x128xf32>
    tpu.vector_store %arg11[%463, %c0_321, %c0_322], %466 {strides = array<i32>} : memref<8x8x128xf32, #tpu.memory_space<vmem>>, vector<1x8x128xf32>,
    %c7_i32_323 = arith.constant 7 : i32
    %c0_324 = arith.constant 0 : index
    %c0_325 = arith.constant 0 : index
    %467 = vector.load %arg13[%c0_324, %c0_325] : memref<8x128xf32, #tpu.memory_space<vmem>>, vector<8x128xf32>
    %c0_326 = arith.constant 0 : index
    %c0_327 = arith.constant 0 : index
    %468 = vector.load %arg14[%c0_326, %c0_327] : memref<8x128xf32, #tpu.memory_space<vmem>>, vector<8x128xf32>
    %469 = arith.index_cast %c7_i32_323 : i32 to index
    %c0_328 = arith.constant 0 : index
    %c0_329 = arith.constant 0 : index
    %470 = vector.load %arg12[%469, %c0_328, %c0_329] : memref<8x8x128xf32, #tpu.memory_space<vmem>>, vector<1x8x128xf32>
    %471 = vector.shape_cast %470 : vector<1x8x128xf32> to vector<8x128xf32>
    %c0_330 = arith.constant 0 : index
    %c0_331 = arith.constant 0 : index
    %472 = vector.load %arg6[%c0_330, %c0_331] : memref<128x128xf32, #tpu.memory_space<vmem>>, vector<128x128xf32>
    %cst_332 = arith.constant dense<0.000000e+00> : vector<8x128xf32>
    %473 = tpu.matmul %467, %472, %cst_332 {dimension_numbers = #tpu.dot_dimension_numbers<[1], [0], [0], [1], [0, 0, 1, 1], [], []>} : vector<8x128xf32>, vector<128x128xf32>, vector<8x128xf32> -> vector<8x128xf32>
    %474 = arith.addf %471, %473 : vector<8x128xf32>
    %475 = math.tanh %474 : vector<8x128xf32>
    %476 = arith.negf %474 : vector<8x128xf32>
    %477 = math.exp %476 : vector<8x128xf32>
    %cst_333 = arith.constant 1.000000e+00 : f32
    %478 = vector.broadcast %cst_333 : f32 to vector<8x128xf32>
    %479 = arith.addf %478, %477 : vector<8x128xf32>
    %480 = arith.divf %478, %479 : vector<8x128xf32>
    %481 = arith.select %5, %475, %480 : vector<8x128xi1>, vector<8x128xf32>
    %c96_i32_334 = arith.constant 96 : i32
    %482 = tpu.dynamic_rotate %481 by %c96_i32_334 dim 1 : vector<8x128xf32>, i32 -> vector<8x128xf32>
    %c64_i32_335 = arith.constant 64 : i32
    %483 = tpu.dynamic_rotate %481 by %c64_i32_335 dim 1 : vector<8x128xf32>, i32 -> vector<8x128xf32>
    %c32_i32_336 = arith.constant 32 : i32
    %484 = tpu.dynamic_rotate %481 by %c32_i32_336 dim 1 : vector<8x128xf32>, i32 -> vector<8x128xf32>
    %485 = arith.mulf %482, %468 : vector<8x128xf32>
    %486 = arith.mulf %481, %483 : vector<8x128xf32>
    %487 = arith.addf %485, %486 : vector<8x128xf32>
    %488 = math.tanh %487 : vector<8x128xf32>
    %489 = arith.mulf %484, %488 : vector<8x128xf32>
    %c0_337 = arith.constant 0 : index
    %c0_338 = arith.constant 0 : index
    %490 = vector.load %arg14[%c0_337, %c0_338] : memref<8x128xf32, #tpu.memory_space<vmem>>, vector<8x128xf32>
    tpu.vector_store %arg14[%c0_337, %c0_338], %487 {strides = array<i32>} : memref<8x128xf32, #tpu.memory_space<vmem>>, vector<8x128xf32>,
    %c0_339 = arith.constant 0 : index
    %c0_340 = arith.constant 0 : index
    %491 = vector.load %arg13[%c0_339, %c0_340] : memref<8x128xf32, #tpu.memory_space<vmem>>, vector<8x128xf32>
    tpu.vector_store %arg13[%c0_339, %c0_340], %489 {strides = array<i32>} : memref<8x128xf32, #tpu.memory_space<vmem>>, vector<8x128xf32>,
    %492 = arith.index_cast %c7_i32_323 : i32 to index
    %c0_341 = arith.constant 0 : index
    %c0_342 = arith.constant 0 : index
    %493 = vector.load %arg11[%492, %c0_341, %c0_342] : memref<8x8x128xf32, #tpu.memory_space<vmem>>, vector<1x8x128xf32>
    %494 = vector.shape_cast %493 : vector<1x8x128xf32> to vector<8x128xf32>
    %495 = vector.shape_cast %489 : vector<8x128xf32> to vector<1x8x128xf32>
    tpu.vector_store %arg11[%492, %c0_341, %c0_342], %495 {strides = array<i32>} : memref<8x8x128xf32, #tpu.memory_space<vmem>>, vector<1x8x128xf32>,
    %c8_i32_343 = arith.constant 8 : i32
    %c0_344 = arith.constant 0 : index
    %c0_345 = arith.constant 0 : index
    %496 = vector.load %arg13[%c0_344, %c0_345] : memref<8x128xf32, #tpu.memory_space<vmem>>, vector<8x128xf32>
    %c0_346 = arith.constant 0 : index
    %c0_347 = arith.constant 0 : index
    %497 = vector.load %arg8[%c0_346, %c0_347] : memref<128x128xf32, #tpu.memory_space<vmem>>, vector<128x128xf32>
    %cst_348 = arith.constant dense<0.000000e+00> : vector<8x128xf32>
    %498 = tpu.matmul %496, %497, %cst_348 {dimension_numbers = #tpu.dot_dimension_numbers<[1], [0], [0], [1], [0, 0, 1, 1], [], []>} : vector<8x128xf32>, vector<128x128xf32>, vector<8x128xf32> -> vector<8x128xf32>
    %c0_349 = arith.constant 0 : index
    %c0_350 = arith.constant 0 : index
    %499 = vector.load %arg9[%c0_349, %c0_350] : memref<1x128xf32, #tpu.memory_space<vmem>>, vector<1x128xf32>
    %500 = vector.broadcast %499 : vector<1x128xf32> to vector<8x128xf32>
    %501 = arith.addf %498, %500 : vector<8x128xf32>
    %c0_351 = arith.constant 0 : index
    %c0_352 = arith.constant 0 : index
    %502 = vector.load %arg10[%c0_351, %c0_352] : memref<8x128xf32, #tpu.memory_space<vmem>>, vector<8x128xf32>
    tpu.vector_store %arg10[%c0_351, %c0_352], %501 {strides = array<i32>} : memref<8x128xf32, #tpu.memory_space<vmem>>, vector<8x128xf32>,
    return
  }
  func.func @transform_0(%arg0: i32) -> (i32, i32, i32) {
    %c0_i32 = arith.constant 0 : i32
    %c0_i32_0 = arith.constant 0 : i32
    %c0_i32_1 = arith.constant 0 : i32
    return %c0_i32, %arg0, %c0_i32_0 : i32, i32, i32
  }
  func.func @transform_1(%arg0: i32) -> (i32, i32) {
    %c0_i32 = arith.constant 0 : i32
    %c0_i32_0 = arith.constant 0 : i32
    %c0_i32_1 = arith.constant 0 : i32
    return %c0_i32, %c0_i32_0 : i32, i32
  }
  func.func @transform_2(%arg0: i32) -> (i32, i32) {
    %c0_i32 = arith.constant 0 : i32
    %c0_i32_0 = arith.constant 0 : i32
    %c0_i32_1 = arith.constant 0 : i32
    return %c0_i32, %c0_i32_0 : i32, i32
  }
  func.func @transform_3(%arg0: i32) -> (i32, i32) {
    %c0_i32 = arith.constant 0 : i32
    %c0_i32_0 = arith.constant 0 : i32
    %c0_i32_1 = arith.constant 0 : i32
    return %c0_i32, %c0_i32_0 : i32, i32
  }
  func.func @transform_4(%arg0: i32) -> (i32, i32) {
    %c0_i32 = arith.constant 0 : i32
    %c0_i32_0 = arith.constant 0 : i32
    %c0_i32_1 = arith.constant 0 : i32
    return %c0_i32, %c0_i32_0 : i32, i32
  }
  func.func @transform_5(%arg0: i32) -> (i32, i32) {
    %c0_i32 = arith.constant 0 : i32
    %c0_i32_0 = arith.constant 0 : i32
    %c0_i32_1 = arith.constant 0 : i32
    return %c0_i32, %c0_i32_0 : i32, i32
  }
  func.func @transform_6(%arg0: i32) -> (i32, i32) {
    %c0_i32 = arith.constant 0 : i32
    %c0_i32_0 = arith.constant 0 : i32
    %c0_i32_1 = arith.constant 0 : i32
    return %c0_i32, %c0_i32_0 : i32, i32
  }
  func.func @transform_7(%arg0: i32) -> (i32, i32) {
    %c0_i32 = arith.constant 0 : i32
    %c0_i32_0 = arith.constant 0 : i32
    %c0_i32_1 = arith.constant 0 : i32
    return %c0_i32, %c0_i32_0 : i32, i32
  }
  func.func @transform_8(%arg0: i32) -> (i32, i32) {
    %c0_i32 = arith.constant 0 : i32
    %c0_i32_0 = arith.constant 0 : i32
    %c0_i32_1 = arith.constant 0 : i32
    return %c0_i32, %c0_i32_0 : i32, i32
  }
  func.func @transform_9(%arg0: i32) -> (i32, i32) {
    %c0_i32 = arith.constant 0 : i32
    %c0_i32_0 = arith.constant 0 : i32
    return %arg0, %c0_i32 : i32, i32
  }
}

</mosaic_0001>

<bundles_post_ra>
// kernel: tpu_custom_call.1
= control target key start
LH: loop header
LB: loop body
LE: loop exit
PB: predicated region body
PF: predicated region fallthrough
CT: control target
= control target key end

     0   :  { %14 = vsyncpa [#allocation7], 0  ;;  %s4556_s0 = inlined_call_operand.hbm [shape: f32[8,8,16], index: 0, kind: input, shape index: {}]   ;;  %s4557_s1 = inlined_call_operand.hbm [shape: f32[16,128], index: 1, kind: input, shape index: {}]   ;;  %s4558_s2 = inlined_call_operand.hbm [shape: f32[128,128], index: 2, kind: input, shape index: {}]   ;;  %s4559_s3 = inlined_call_operand.vmem [shape: f32[1,128], index: 3, kind: input, shape index: {}]   ;;  %s4560_s4 = inlined_call_operand.hbm [shape: f32[128,128], index: 4, kind: input, shape index: {}]   ;;  %s4561_s5 = inlined_call_operand.hbm [shape: f32[128,128], index: 5, kind: input, shape index: {}]   ;;  %s4562_s6 = inlined_call_operand.vmem [shape: f32[1,128], index: 6, kind: input, shape index: {}]   ;;  %s4563_s7 = inlined_call_operand.hbm [shape: f32[128,128], index: 7, kind: input, shape index: {}]   ;;  %s4564_s8 = inlined_call_operand.vmem [shape: f32[1,128], index: 8, kind: input, shape index: {}]   ;;  %s4565_s9 = inlined_call_operand.hbm [shape: f32[8,128], index: 9, kind: output, shape index: {}]  }
   0x1   :  { %15 = vsyncpa [#allocation10], 0 }
   0x2   :  { %16 = vsyncpa [#allocation13], 0 }
   0x3   :  { %17 = vsyncpa [#allocation16], 0 }
   0x4   :  { %18 = vsyncpa [#allocation8], 0  ;;  %s3640_s30 = smov [#allocation9]   ;;  %s3641_s11 = smov [#allocation12]  }
   0x5   :  { %s36_s10 = sshll.u32 %s3640_s30, 4  ;;  %s62_s12 = sshll.u32 %s3641_s11, 4  ;;  %s37_s10 = int_to_ptr.vmem [resolvable:$true] %s36_s10  ;;  %s63_s12 = int_to_ptr.vmem [resolvable:$true] %s62_s12 }
   0x6   :  { %s3498_s13 = scalar_lea.vmem %s37_s10, 256  ;;  %p3503_p1 = scmp.lt.s32.totalorder %s37_s10, %s37_s10 }
   0x7   :  { %p3499_p0 = scmp.ne.s32.totalorder %s37_s10, %s3498_s13  ;;  %p3504_p2 = scmp.lt.s32.totalorder %s3498_s13, %s3498_s13 }
   0x9   :  { %p3505_p3 = por %p3504_p2, %p3503_p1 }
   0xb   :  { %p3506_p4 = pnand %p3505_p3, %p3499_p0 }
   0xd   :  { %3509 = shalt.err (!%p3506_p4)
}
   0xe   :  { %s3642_s14 = smov 128   ;;  %s3643_s15 = smov 8  }
   0xf   :  { %42 = dma.hbm_to_vmem [thread:$0]  %s4557_s1, 256, %s37_s10, [#allocation10], %s3642_s14, %s3642_s14, %s3643_s15  }
  0x10   :  { %s3518_s18 = scalar_lea.vmem %s63_s12, 2048  ;;  %p3523_p6 = scmp.lt.s32.totalorder %s63_s12, %s63_s12 }
  0x11   :  { %p3519_p5 = scmp.ne.s32.totalorder %s63_s12, %s3518_s18  ;;  %p3524_p7 = scmp.lt.s32.totalorder %s3518_s18, %s3518_s18 }
  0x13   :  { %p3525_p8 = por %p3524_p7, %p3523_p6 }
  0x15   :  { %p3526_p9 = pnand %p3525_p8, %p3519_p5 }
  0x17   :  { %3529 = shalt.err (!%p3526_p9)
}
  0x18   :  { %68 = dma.hbm_to_vmem [thread:$0]  %s4560_s4, 2048, %s63_s12, [#allocation13], %s3642_s14, %s3642_s14, %s3643_s15  }
  0x19   :  { %s3644_s21 = smov [#allocation6]   ;;  %s3645_s23 = smov [#allocation11]  }
  0x1a   :  { %s24_s22 = sshll.u32 %s3644_s21, 4  ;;  %s48_s24 = sshll.u32 %s3645_s23, 4  ;;  %s25_s22 = int_to_ptr.vmem [resolvable:$true] %s24_s22  ;;  %s49_s24 = int_to_ptr.vmem [resolvable:$true] %s48_s24 }
  0x1b   :  { %s3538_s1 = scalar_lea.vmem %s25_s22, 1024  ;;  %p3543_p11 = scmp.lt.s32.totalorder %s25_s22, %s25_s22 }
  0x1c   :  { %p3539_p10 = scmp.ne.s32.totalorder %s25_s22, %s3538_s1  ;;  %p3544_p12 = scmp.lt.s32.totalorder %s3538_s1, %s3538_s1 }
  0x1e   :  { %p3545_p13 = por %p3544_p12, %p3543_p11 }
  0x20   :  { %p3546_p0 = pnand %p3545_p13, %p3539_p10 }
  0x22   :  { %3549 = shalt.err (!%p3546_p0)
}
  0x23   :  { %30 = dma.hbm_to_vmem [thread:$0]  %s4556_s0, 1024, %s25_s22, [#allocation7], %s3642_s14, %s3642_s14, %s3643_s15  }
  0x24   :  { %s3558_s4 = scalar_lea.vmem %s49_s24, 2048  ;;  %p3563_p2 = scmp.lt.s32.totalorder %s49_s24, %s49_s24 }
  0x25   :  { %p3559_p1 = scmp.ne.s32.totalorder %s49_s24, %s3558_s4  ;;  %p3564_p3 = scmp.lt.s32.totalorder %s3558_s4, %s3558_s4 }
  0x27   :  { %p3565_p4 = por %p3564_p3, %p3563_p2 }
  0x29   :  { %p3566_p5 = pnand %p3565_p4, %p3559_p1 }
  0x2b   :  { %3569 = shalt.err (!%p3566_p5)
}
  0x2c   :  { %54 = dma.hbm_to_vmem [thread:$0]  %s4558_s2, 2048, %s49_s24, [#allocation10], %s3642_s14, %s3642_s14, %s3643_s15  }
  0x2d   :  { %s3646_s29 = smov [#allocation14]   ;;  %s3647_s10 = smov [#allocation15]  }
  0x2e   :  { %s74_s30 = sshll.u32 %s3646_s29, 4  ;;  %s88_s11 = sshll.u32 %s3647_s10, 4  ;;  %s75_s30 = int_to_ptr.vmem [resolvable:$true] %s74_s30  ;;  %s89_s11 = int_to_ptr.vmem [resolvable:$true] %s88_s11 }
  0x2f   :  { %s3578_s0 = scalar_lea.vmem %s75_s30, 2048  ;;  %p3583_p7 = scmp.lt.s32.totalorder %s75_s30, %s75_s30 }
  0x30   :  { %p3579_p6 = scmp.ne.s32.totalorder %s75_s30, %s3578_s0  ;;  %p3584_p8 = scmp.lt.s32.totalorder %s3578_s0, %s3578_s0 }
  0x32   :  { %p3585_p9 = por %p3584_p8, %p3583_p7 }
  0x34   :  { %p3586_p10 = pnand %p3585_p9, %p3579_p6 }
  0x36   :  { %3589 = shalt.err (!%p3586_p10)
}
  0x37   :  { %80 = dma.hbm_to_vmem [thread:$0]  %s4561_s5, 2048, %s75_s30, [#allocation13], %s3642_s14, %s3642_s14, %s3643_s15  }
  0x38   :  { %s3598_s2 = scalar_lea.vmem %s89_s11, 2048  ;;  %p3603_p12 = scmp.lt.s32.totalorder %s89_s11, %s89_s11 }
  0x39   :  { %p3599_p11 = scmp.ne.s32.totalorder %s89_s11, %s3598_s2  ;;  %p3604_p13 = scmp.lt.s32.totalorder %s3598_s2, %s3598_s2 }
  0x3b   :  { %p3605_p0 = por %p3604_p13, %p3603_p12 }
  0x3d   :  { %p3606_p1 = pnand %p3605_p0, %p3599_p11 }
  0x3f   :  { %3609 = shalt.err (!%p3606_p1)
}
  0x40   :  { %94 = dma.hbm_to_vmem [thread:$0]  %s4563_s7, 2048, %s89_s11, [#allocation16], %s3642_s14, %s3642_s14, %s3643_s15  }
  0x41   :  { %3630 = dma.done.wait [#allocation7], 1024  }
  0x42   :  { %3631 = vsyncadd [#allocation7], 4294966272 }
  0x43   :  { %3632 = dma.done.wait [#allocation10], 2304  }
  0x44   :  { %3633 = vsyncadd [#allocation10], 4294964992 }
  0x45   :  { %3634 = dma.done.wait [#allocation13], 4096  }
  0x46   :  { %3635 = vsyncadd [#allocation13], 4294963200 }
  0x47   :  { %3636 = dma.done.wait [#allocation16], 2048  }
  0x48   :  { %3637 = vsyncadd [#allocation16], 4294965248  ;;  %v3648_v0 = vmov 0.0   ;;  %vm3649_vm0 = vmmov 0   ;;  %v3743_v1 = vld [vmem:[#allocation11 + $0x78] sm:$0xff]  ;;  %v3745_v2 = vld [vmem:[#allocation11 + $0x70] sm:$0xff]  ;;  %v115_v31 = vlaneseq }
  0x49   :  { %2708 = vmatprep.subr.mxu1 %v3648_v0  ;;  %2740 = vmatprep.mubr.msk.f32.mxu1 %vm3649_vm0, %v3648_v0  ;;  %v3749_v3 = vld [vmem:[#allocation11 + $0x68] sm:$0xff]  ;;  %v129_v4 = vld [vmem:[#allocation9 + $0x8] sm:$0xff]  ;;  %v3753_v5 = vld [vmem:[#allocation11 + $0x60] sm:$0xff]  ;;  %vm137_vm1 = vcmask 130048   ;;  %s3650_s14 = smov 32   ;;  %s3651_s15 = smov 96  }
  0x4a   :  { %2709 = vmatpush3.msra.mxu1 %v3743_v1  ;;  %2692 = vmatprep.subr.mxu0 %v129_v4  ;;  %v128_v6 = vld [vmem:[#allocation9] sm:$0xff]  ;;  %v3757_v8 = vld [vmem:[#allocation11 + $0x58] sm:$0xff]  ;;  %v3767_v11 = vld [vmem:[#allocation11 + $0x48] sm:$0xff]  ;;  %v116_v32 = vand.u32 127, %v115_v31  ;;  %s3652_s18 = smov 64   ;;  %s3653_s23 = smov [#allocation17]  }
  0x4b   :  { %2710 = vmatprep.subr.mxu1 %v3648_v0  ;;  %2693 = vmatpush3.msra.mxu0 %v129_v4  ;;  %v120_v7 = vld [vmem:[#allocation6] sm:$0xff]  ;;  %v121_v9 = vld [vmem:[#allocation6 + $0x8] sm:$0xff]  ;;  %v3773_v12 = vld [vmem:[#allocation11 + $0x40] sm:$0xff]  ;;  %s2330_s24 = sshll.u32 %s3653_s23, 4  ;;  %s2331_s24 = int_to_ptr.vmem [resolvable:$true] %s2330_s24 }
  0x4c   :  { %2711 = vmatpush3.msra.mxu1 %v3745_v2  ;;  %2694 = vmatprep.subr.mxu0 %v128_v6  ;;  %v3761_v10 = vld [vmem:[#allocation11 + $0x50] sm:$0xff]  ;;  %v3779_v13 = vld [vmem:[#allocation11 + $0x38] sm:$0xff]  ;;  %v3791_v15 = vld [vmem:[#allocation11 + $0x28] sm:$0xff]  ;;  %vm117_vm2 = vcmp.ge.s32.totalorder %v116_v32, 64  ;;  %vm118_vm3 = vcmp.lt.s32.totalorder %v116_v32, 96  ;;  %s3610_s1 = scalar_lea.vmem %s2331_s24, 128  ;;  %p3615_p3 = scmp.lt.s32.totalorder %s2331_s24, %s2331_s24 }
  0x4d   :  { %2712 = vmatprep.subr.mxu1 %v3648_v0  ;;  %2695 = vmatpush3.msra.mxu0 %v128_v6  ;;  %v3785_v14 = vld [vmem:[#allocation11 + $0x30] sm:$0xff]  ;;  %v3797_v16 = vld [vmem:[#allocation11 + $0x20] sm:$0xff]  ;;  %v3803_v17 = vld [vmem:[#allocation11 + $0x18] sm:$0xff]  ;;  %p3611_p2 = scmp.ne.s32.totalorder %s2331_s24, %s3610_s1  ;;  %p3616_p4 = scmp.lt.s32.totalorder %s3610_s1, %s3610_s1 }
  0x4e   :  { %2713 = vmatpush3.msra.mxu1 %v3749_v3  ;;  %2696 = vmatprep.mubr.msk.f32.mxu0 %vm137_vm1, %v120_v7  ;;  %v3809_v18 = vld [vmem:[#allocation11 + $0x10] sm:$0xff]  ;;  %v3815_v19 = vld [vmem:[#allocation11 + $0x8] sm:$0xff]  ;;  %v3821_v20 = vld [vmem:[#allocation11] sm:$0xff] }
  0x4f   :  { %2714 = vmatprep.subr.mxu1 %v3648_v0  ;;  %2697 = vmatmul.mubr.msk.f32.vlgmr.msra.gmra.mxu0 %vm137_vm1, %v121_v9  ;;  %v3882_v22 = vld [vmem:[%s4559_s3] ss:$0 sm:$0xff]  ;;  %v122_v33 = vld [vmem:[#allocation6 + $0x10] sm:$0xff]  ;;  %v123_v34 = vld [vmem:[#allocation6 + $0x18] sm:$0xff]  ;;  %p3617_p5 = por %p3616_p4, %p3615_p3 }
  0x50   :  { %2715 = vmatpush3.msra.mxu1 %v3753_v5  ;;  %2743 = vmatprep.subr.mxu0 %v3648_v0  ;;  %v124_v35 = vld [vmem:[#allocation6 + $0x20] sm:$0xff]  ;;  %vm3885_vm4 = vmand %vm117_vm2, %vm118_vm3  ;;  %v125_v39 = vld [vmem:[#allocation6 + $0x28] sm:$0xff] }
  0x51   :  { %2716 = vmatprep.subr.mxu1 %v3648_v0  ;;  %2744 = vmatpush3.msra.mxu0 %v3743_v1  ;;  %v126_v41 = vld [vmem:[#allocation6 + $0x30] sm:$0xff]  ;;  %v127_v42 = vld [vmem:[#allocation6 + $0x38] sm:$0xff]  ;;  %p3618_p6 = pnand %p3617_p5, %p3611_p2 }
  0x52   :  { %2717 = vmatpush3.msra.mxu1 %v3757_v8  ;;  %2745 = vmatprep.subr.mxu0 %v3648_v0  ;;  %v2230_v36 = vld [vmem:[#allocation15] sm:$0xff] }
  0x53   :  { %2718 = vmatprep.subr.mxu1 %v3648_v0  ;;  %2746 = vmatpush3.msra.mxu0 %v3745_v2 }
  0x54   :  { %2719 = vmatpush3.msra.mxu1 %v3761_v10  ;;  %2747 = vmatprep.subr.mxu0 %v3648_v0 }
  0x55   :  { %2720 = vmatprep.subr.mxu1 %v3648_v0  ;;  %2748 = vmatpush3.msra.mxu0 %v3749_v3 }
  0x56   :  { %2721 = vmatpush3.msra.mxu1 %v3767_v11  ;;  %2749 = vmatprep.subr.mxu0 %v3648_v0 }
  0x57   :  { %2722 = vmatprep.subr.mxu1 %v3648_v0  ;;  %2750 = vmatpush3.msra.mxu0 %v3753_v5 }
  0x58   :  { %2723 = vmatpush3.msra.mxu1 %v3773_v12  ;;  %2751 = vmatprep.subr.mxu0 %v3648_v0 }
  0x59   :  { %2724 = vmatprep.subr.mxu1 %v3648_v0  ;;  %2752 = vmatpush3.msra.mxu0 %v3757_v8 }
  0x5a   :  { %2725 = vmatpush3.msra.mxu1 %v3779_v13  ;;  %2753 = vmatprep.subr.mxu0 %v3648_v0 }
  0x5b   :  { %2726 = vmatprep.subr.mxu1 %v3648_v0  ;;  %2754 = vmatpush3.msra.mxu0 %v3761_v10 }
  0x5c   :  { %2727 = vmatpush3.msra.mxu1 %v3785_v14  ;;  %2755 = vmatprep.subr.mxu0 %v3648_v0 }
  0x5d   :  { %2728 = vmatprep.subr.mxu1 %v3648_v0  ;;  %2756 = vmatpush3.msra.mxu0 %v3767_v11 }
  0x5e   :  { %2729 = vmatpush3.msra.mxu1 %v3791_v15  ;;  %2757 = vmatprep.subr.mxu0 %v3648_v0 }
  0x5f   :  { %2730 = vmatprep.subr.mxu1 %v3648_v0  ;;  %2758 = vmatpush3.msra.mxu0 %v3773_v12 }
  0x60   :  { %2731 = vmatpush3.msra.mxu1 %v3797_v16  ;;  %2759 = vmatprep.subr.mxu0 %v3648_v0 }
  0x61   :  { %2732 = vmatprep.subr.mxu1 %v3648_v0  ;;  %2760 = vmatpush3.msra.mxu0 %v3779_v13 }
  0x62   :  { %2733 = vmatpush3.msra.mxu1 %v3803_v17  ;;  %2761 = vmatprep.subr.mxu0 %v3648_v0 }
  0x63   :  { %2734 = vmatprep.subr.mxu1 %v3648_v0  ;;  %2762 = vmatpush3.msra.mxu0 %v3785_v14 }
  0x64   :  { %2735 = vmatpush3.msra.mxu1 %v3809_v18  ;;  %2763 = vmatprep.subr.mxu0 %v3648_v0 }
  0x65   :  { %2736 = vmatprep.subr.mxu1 %v3648_v0  ;;  %2764 = vmatpush3.msra.mxu0 %v3791_v15 }
  0x66   :  { %2737 = vmatpush3.msra.mxu1 %v3815_v19  ;;  %2765 = vmatprep.subr.mxu0 %v3648_v0 }
  0x67   :  { %2738 = vmatprep.subr.mxu1 %v3648_v0  ;;  %2766 = vmatpush3.msra.mxu0 %v3797_v16 }
  0x68   :  { %2739 = vmatpush3.msra.mxu1 %v3821_v20  ;;  %2767 = vmatprep.subr.mxu0 %v3648_v0 }
  0x69   :  { %2741 = vmatmul.mubr.f32.vlgmr.msra.gmra.mxu1 %v3648_v0  ;;  %2778 = vmatprep.subr.mxu1 %v3648_v0 }
  0x6a   :  { %2779 = vmatpush3.msra.mxu1 %v3743_v1  ;;  %2768 = vmatpush3.msra.mxu0 %v3803_v17 }
  0x6b   :  { %2780 = vmatprep.subr.mxu1 %v3648_v0  ;;  %2769 = vmatprep.subr.mxu0 %v3648_v0 }
  0x6c   :  { %2781 = vmatpush3.msra.mxu1 %v3745_v2  ;;  %2770 = vmatpush3.msra.mxu0 %v3809_v18 }
  0x6d   :  { %2782 = vmatprep.subr.mxu1 %v3648_v0  ;;  %2771 = vmatprep.subr.mxu0 %v3648_v0 }
  0x6e   :  { %2783 = vmatpush3.msra.mxu1 %v3749_v3  ;;  %2772 = vmatpush3.msra.mxu0 %v3815_v19 }
  0x6f   :  { %2784 = vmatprep.subr.mxu1 %v3648_v0  ;;  %2773 = vmatprep.subr.mxu0 %v3648_v0 }
  0x70   :  { %2785 = vmatpush3.msra.mxu1 %v3753_v5  ;;  %2774 = vmatpush3.msra.mxu0 %v3821_v20 }
  0x71   :  { %2786 = vmatprep.subr.mxu1 %v3648_v0  ;;  %2810 = vmatprep.mubr.msk.f32.mxu1 %vm3649_vm0, %v3648_v0 }
  0x72   :  { %2787 = vmatpush3.msra.mxu1 %v3757_v8  ;;  %2813 = vmatprep.subr.mxu0 %v3648_v0 }
  0x73   :  { %2788 = vmatprep.subr.mxu1 %v3648_v0  ;;  %2699 = vmatprep.mubr.msk.f32.mxu0 %vm137_vm1, %v122_v33 }
  0x74   :  { %2789 = vmatpush3.msra.mxu1 %v3761_v10  ;;  %2700 = vmatmul.mubr.msk.f32.gmra.mxu0 %vm137_vm1, %v123_v34 }
  0x75   :  { %2790 = vmatprep.subr.mxu1 %v3648_v0  ;;  %2702 = vmatprep.mubr.msk.f32.mxu0 %vm137_vm1, %v124_v35 }
  0x76   :  { %2791 = vmatpush3.msra.mxu1 %v3767_v11 }
  0x77   :  { %2792 = vmatprep.subr.mxu1 %v3648_v0 }
  0x78   :  { %2793 = vmatpush3.msra.mxu1 %v3773_v12  ;;  %2703 = vmatmul.mubr.msk.f32.gmra.mxu0 %vm137_vm1, %v125_v39 }
  0x79   :  { %2794 = vmatprep.subr.mxu1 %v3648_v0  ;;  %2705 = vmatprep.mubr.msk.f32.mxu0 %vm137_vm1, %v126_v41 }
  0x7a   :  { %2795 = vmatpush3.msra.mxu1 %v3779_v13 }
  0x7b   :  { %2796 = vmatprep.subr.mxu1 %v3648_v0 }
  0x7c   :  { %2797 = vmatpush3.msra.mxu1 %v3785_v14  ;;  %2706 = vmatmul.mubr.msk.f32.gmra.mxu0 %vm137_vm1, %v127_v42 }
  0x7d   :  { %2798 = vmatprep.subr.mxu1 %v3648_v0  ;;  %2775 = vmatprep.mubr.msk.f32.mxu0 %vm3649_vm0, %v3648_v0 }
  0x7e   :  { %2799 = vmatpush3.msra.mxu1 %v3791_v15 }
  0x7f   :  { %2800 = vmatprep.subr.mxu1 %v3648_v0 }
  0x80   :  { %2801 = vmatpush3.msra.mxu1 %v3797_v16 }
  0x81   :  { %2802 = vmatprep.subr.mxu1 %v3648_v0 }
  0x82   :  { %2803 = vmatpush3.msra.mxu1 %v3803_v17 }
  0x83   :  { %2804 = vmatprep.subr.mxu1 %v3648_v0 }
  0x84   :  { %2805 = vmatpush3.msra.mxu1 %v3809_v18 }
  0x85   :  { %2806 = vmatprep.subr.mxu1 %v3648_v0 }
  0x86   :  { %2807 = vmatpush3.msra.mxu1 %v3815_v19 }
  0x87   :  { %2808 = vmatprep.subr.mxu1 %v3648_v0 }
  0x88   :  { %2809 = vmatpush3.msra.mxu1 %v3821_v20 }
  0x89   :  { %2848 = vmatprep.subr.mxu1 %v3648_v0 }
 0x10f   :  { %v3877_v21 = vpop.f32.mrf.mxu0 }
 0x110   :  { %v234_v57 = vadd.f32 %v3877_v21, %v3882_v22 }
 0x111   :  { %v228_v23 = vpop.f32.mrf.mxu0 }
 0x112   :  { %v229_v24 = vadd.f32 %v3882_v22, %v228_v23 }
 0x129   :  { %v362_v25 = vpop.f32.mrf.mxu1 }
 0x12a   :  { %v366_v26 = vadd.f32 %v362_v25, %v229_v24 }
 0x12b   :  { %v2742_v27 = vpop.f32.mrf.mxu1 }
 0x12c   :  { %v2351_v28 = vmul.f32 -1.442695, %v366_v26 }
 0x12e   :  { %3361 = vpow2.f32 %v2351_v28 }
 0x12f   :  { %3363 = vtanh.f32 %v366_v26 }
 0x134   :  { %v3942_v51 = vpop.f32.mrf.mxu0 }
 0x136   :  { %v3944_v52 = vpop.f32.mrf.mxu0 }
 0x138   :  { %v3946_v53 = vpop.f32.mrf.mxu0 }
 0x13a   :  { %v3948_v54 = vpop.f32.mrf.mxu0 }
 0x13b   :  { %v3362_v29 = vpop.eup %3361 }
 0x13c   :  { %v371_v30 = vadd.f32 1.0, %v3362_v29  ;;  %v3364_v37 = vpop.eup %3363  ;;  %v3950_v55 = vpop.f32.mrf.mxu0  ;;  %v239_v29 = vadd.f32 %v3882_v22, %v3944_v52 }
 0x13e   :  { %3365 = vrcp.f32 %v371_v30  ;;  %v3952_v56 = vpop.f32.mrf.mxu0 }
 0x14b   :  { %v3366_v38 = vpop.eup %3365 }
 0x14c   :  { %v374_v40 = vsel %vm3885_vm4, %v3364_v37, %v3366_v38 }
 0x14d   :  { %379 = vrot.lane.b32.xlu1 %v374_v40, %s3650_s14  ;;  %375 = vrot.lane.b32.xlu0 %v374_v40, %s3651_s15 }
 0x151   :  { %377 = vrot.lane.b32.xlu0 %v374_v40, %s3652_s18 }
 0x1bf   :  { %v376_v43 = vpop.permute.xlu0 %375  ;;  %v380_v49 = vpop.permute.xlu1 %379 }
 0x1c0   :  { %v381_v45 = vmul.f32 0.0, %v376_v43 }
 0x1c3   :  { %v378_v44 = vpop.permute.xlu0 %377 }
 0x1c4   :  { %v382_v46 = vmul.f32 %v378_v44, %v374_v40 }
 0x1c6   :  { %v3902_v47 = vadd.f32 %v382_v46, %v381_v45 }
 0x1c8   :  { %3367 = vtanh.f32 %v3902_v47 }
 0x1d5   :  { %v3368_v48 = vpop.eup %3367 }
 0x1d6   :  { %v3905_v50 = vmul.f32 %v3368_v48, %v380_v49  ;;  %v244_v48 = vadd.f32 %v3942_v51, %v3882_v22 }
 0x1d8   :  { %2776 = vmatmul.mubr.f32.vlgmr.msra.gmra.mxu0 %v3905_v50 }
 0x1d9   :  { %2814 = vmatpush3.msra.mxu0 %v3743_v1  ;;  %2845 = vmatprep.mubr.msk.f32.mxu0 %vm3649_vm0, %v3648_v0 }
 0x1da   :  { %2815 = vmatprep.subr.mxu0 %v3648_v0 }
 0x1db   :  { %2816 = vmatpush3.msra.mxu0 %v3745_v2 }
 0x1dc   :  { %2817 = vmatprep.subr.mxu0 %v3648_v0 }
 0x1dd   :  { %2818 = vmatpush3.msra.mxu0 %v3749_v3 }
 0x1de   :  { %2819 = vmatprep.subr.mxu0 %v3648_v0 }
 0x1df   :  { %2820 = vmatpush3.msra.mxu0 %v3753_v5 }
 0x1e0   :  { %2821 = vmatprep.subr.mxu0 %v3648_v0 }
 0x1e1   :  { %2822 = vmatpush3.msra.mxu0 %v3757_v8 }
 0x1e2   :  { %2823 = vmatprep.subr.mxu0 %v3648_v0 }
 0x1e3   :  { %2824 = vmatpush3.msra.mxu0 %v3761_v10 }
 0x1e4   :  { %2825 = vmatprep.subr.mxu0 %v3648_v0 }
 0x1e5   :  { %2826 = vmatpush3.msra.mxu0 %v3767_v11 }
 0x1e6   :  { %2827 = vmatprep.subr.mxu0 %v3648_v0 }
 0x1e7   :  { %2828 = vmatpush3.msra.mxu0 %v3773_v12 }
 0x1e8   :  { %2829 = vmatprep.subr.mxu0 %v3648_v0 }
 0x1e9   :  { %2830 = vmatpush3.msra.mxu0 %v3779_v13 }
 0x1ea   :  { %2831 = vmatprep.subr.mxu0 %v3648_v0 }
 0x1eb   :  { %2832 = vmatpush3.msra.mxu0 %v3785_v14 }
 0x1ec   :  { %2833 = vmatprep.subr.mxu0 %v3648_v0 }
 0x1ed   :  { %2834 = vmatpush3.msra.mxu0 %v3791_v15 }
 0x1ee   :  { %2835 = vmatprep.subr.mxu0 %v3648_v0 }
 0x1ef   :  { %2836 = vmatpush3.msra.mxu0 %v3797_v16 }
 0x1f0   :  { %2837 = vmatprep.subr.mxu0 %v3648_v0 }
 0x1f1   :  { %2838 = vmatpush3.msra.mxu0 %v3803_v17 }
 0x1f2   :  { %2839 = vmatprep.subr.mxu0 %v3648_v0 }
 0x1f3   :  { %2840 = vmatpush3.msra.mxu0 %v3809_v18 }
 0x1f4   :  { %2841 = vmatprep.subr.mxu0 %v3648_v0 }
 0x1f5   :  { %2842 = vmatpush3.msra.mxu0 %v3815_v19 }
 0x1f6   :  { %2843 = vmatprep.subr.mxu0 %v3648_v0 }
 0x1f7   :  { %2844 = vmatpush3.msra.mxu0 %v3821_v20 }
 0x1f8   :  { %2883 = vmatprep.subr.mxu0 %v3648_v0 }
 0x298   :  { %v475_v58 = vpop.f32.mrf.mxu0 }
 0x299   :  { %v479_v59 = vadd.f32 %v475_v58, %v234_v57 }
 0x29a   :  { %v2777_v60 = vpop.f32.mrf.mxu0 }
 0x29b   :  { %v2352_v61 = vmul.f32 -1.442695, %v479_v59 }
 0x29d   :  { %3369 = vpow2.f32 %v2352_v61 }
 0x29e   :  { %3371 = vtanh.f32 %v479_v59 }
 0x2aa   :  { %v3370_v62 = vpop.eup %3369 }
 0x2ab   :  { %v484_v63 = vadd.f32 1.0, %v3370_v62  ;;  %v3372_v4 = vpop.eup %3371 }
 0x2ad   :  { %3373 = vrcp.f32 %v484_v63 }
 0x2ba   :  { %v3374_v6 = vpop.eup %3373 }
 0x2bb   :  { %v487_v7 = vsel %vm3885_vm4, %v3372_v4, %v3374_v6 }
 0x2bc   :  { %490 = vrot.lane.b32.xlu0 %v487_v7, %s3652_s18  ;;  %488 = vrot.lane.b32.xlu1 %v487_v7, %s3651_s15 }
 0x2c0   :  { %492 = vrot.lane.b32.xlu1 %v487_v7, %s3650_s14 }
 0x32e   :  { %v491_v9 = vpop.permute.xlu0 %490  ;;  %v489_v21 = vpop.permute.xlu1 %488 }
 0x32f   :  { %v495_v23 = vmul.f32 %v491_v9, %v487_v7  ;;  %v494_v24 = vmul.f32 %v489_v21, %v3902_v47 }
 0x331   :  { %v496_v25 = vadd.f32 %v495_v23, %v494_v24 }
 0x332   :  { %v493_v27 = vpop.permute.xlu1 %492 }
 0x333   :  { %3375 = vtanh.f32 %v496_v25 }
 0x340   :  { %v3376_v26 = vpop.eup %3375 }
 0x341   :  { %v3962_v28 = vmul.f32 %v3376_v26, %v493_v27  ;;  %v254_v26 = vadd.f32 %v3946_v53, %v3882_v22  ;;  %v1210_v53 = vld [vmem:[#allocation12 + $0x78] sm:$0xff] }
 0x343   :  { %2811 = vmatmul.mubr.f32.vlgmr.msra.gmra.mxu1 %v3962_v28 }
 0x344   :  { %2849 = vmatpush3.msra.mxu1 %v3743_v1  ;;  %2880 = vmatprep.mubr.msk.f32.mxu1 %vm3649_vm0, %v3648_v0 }
 0x345   :  { %2850 = vmatprep.subr.mxu1 %v3648_v0 }
 0x346   :  { %2851 = vmatpush3.msra.mxu1 %v3745_v2 }
 0x347   :  { %2852 = vmatprep.subr.mxu1 %v3648_v0 }
 0x348   :  { %2853 = vmatpush3.msra.mxu1 %v3749_v3 }
 0x349   :  { %2854 = vmatprep.subr.mxu1 %v3648_v0 }
 0x34a   :  { %2855 = vmatpush3.msra.mxu1 %v3753_v5 }
 0x34b   :  { %2856 = vmatprep.subr.mxu1 %v3648_v0 }
 0x34c   :  { %2857 = vmatpush3.msra.mxu1 %v3757_v8 }
 0x34d   :  { %2858 = vmatprep.subr.mxu1 %v3648_v0 }
 0x34e   :  { %2859 = vmatpush3.msra.mxu1 %v3761_v10 }
 0x34f   :  { %2860 = vmatprep.subr.mxu1 %v3648_v0 }
 0x350   :  { %2861 = vmatpush3.msra.mxu1 %v3767_v11 }
 0x351   :  { %2862 = vmatprep.subr.mxu1 %v3648_v0 }
 0x352   :  { %2863 = vmatpush3.msra.mxu1 %v3773_v12 }
 0x353   :  { %2864 = vmatprep.subr.mxu1 %v3648_v0 }
 0x354   :  { %2865 = vmatpush3.msra.mxu1 %v3779_v13 }
 0x355   :  { %2866 = vmatprep.subr.mxu1 %v3648_v0 }
 0x356   :  { %2867 = vmatpush3.msra.mxu1 %v3785_v14 }
 0x357   :  { %2868 = vmatprep.subr.mxu1 %v3648_v0 }
 0x358   :  { %2869 = vmatpush3.msra.mxu1 %v3791_v15 }
 0x359   :  { %2870 = vmatprep.subr.mxu1 %v3648_v0 }
 0x35a   :  { %2871 = vmatpush3.msra.mxu1 %v3797_v16 }
 0x35b   :  { %2872 = vmatprep.subr.mxu1 %v3648_v0 }
 0x35c   :  { %2873 = vmatpush3.msra.mxu1 %v3803_v17 }
 0x35d   :  { %2874 = vmatprep.subr.mxu1 %v3648_v0 }
 0x35e   :  { %2875 = vmatpush3.msra.mxu1 %v3809_v18 }
 0x35f   :  { %2876 = vmatprep.subr.mxu1 %v3648_v0 }
 0x360   :  { %2877 = vmatpush3.msra.mxu1 %v3815_v19 }
 0x361   :  { %2878 = vmatprep.subr.mxu1 %v3648_v0 }
 0x362   :  { %2879 = vmatpush3.msra.mxu1 %v3821_v20 }
 0x363   :  { %2918 = vmatprep.subr.mxu1 %v3648_v0 }
 0x403   :  { %v589_v30 = vpop.f32.mrf.mxu1 }
 0x404   :  { %v593_v31 = vadd.f32 %v589_v30, %v239_v29 }
 0x405   :  { %v2812_v32 = vpop.f32.mrf.mxu1 }
 0x406   :  { %v2353_v33 = vmul.f32 -1.442695, %v593_v31 }
 0x408   :  { %3377 = vpow2.f32 %v2353_v33 }
 0x409   :  { %3379 = vtanh.f32 %v593_v31 }
 0x415   :  { %v3378_v34 = vpop.eup %3377 }
 0x416   :  { %v598_v35 = vadd.f32 1.0, %v3378_v34  ;;  %v3380_v37 = vpop.eup %3379 }
 0x418   :  { %3381 = vrcp.f32 %v598_v35 }
 0x425   :  { %v3382_v38 = vpop.eup %3381 }
 0x426   :  { %v601_v39 = vsel %vm3885_vm4, %v3380_v37, %v3382_v38 }
 0x427   :  { %604 = vrot.lane.b32.xlu1 %v601_v39, %s3652_s18  ;;  %602 = vrot.lane.b32.xlu0 %v601_v39, %s3651_s15 }
 0x42b   :  { %606 = vrot.lane.b32.xlu0 %v601_v39, %s3650_s14 }
 0x499   :  { %v605_v40 = vpop.permute.xlu1 %604  ;;  %v603_v41 = vpop.permute.xlu0 %602 }
 0x49a   :  { %v609_v42 = vmul.f32 %v605_v40, %v601_v39  ;;  %v608_v43 = vmul.f32 %v603_v41, %v496_v25 }
 0x49c   :  { %v610_v44 = vadd.f32 %v609_v42, %v608_v43 }
 0x49d   :  { %v607_v46 = vpop.permute.xlu0 %606 }
 0x49e   :  { %3383 = vtanh.f32 %v610_v44 }
 0x4ab   :  { %v3384_v45 = vpop.eup %3383 }
 0x4ac   :  { %v4006_v47 = vmul.f32 %v3384_v45, %v607_v46  ;;  %v1209_v46 = vld [vmem:[#allocation12 + $0x70] sm:$0xff] }
 0x4ae   :  { %2846 = vmatmul.mubr.f32.vlgmr.msra.gmra.mxu0 %v4006_v47 }
 0x4af   :  { %2884 = vmatpush3.msra.mxu0 %v3743_v1  ;;  %2915 = vmatprep.mubr.msk.f32.mxu0 %vm3649_vm0, %v3648_v0 }
 0x4b0   :  { %2885 = vmatprep.subr.mxu0 %v3648_v0 }
 0x4b1   :  { %2886 = vmatpush3.msra.mxu0 %v3745_v2 }
 0x4b2   :  { %2887 = vmatprep.subr.mxu0 %v3648_v0 }
 0x4b3   :  { %2888 = vmatpush3.msra.mxu0 %v3749_v3 }
 0x4b4   :  { %2889 = vmatprep.subr.mxu0 %v3648_v0 }
 0x4b5   :  { %2890 = vmatpush3.msra.mxu0 %v3753_v5 }
 0x4b6   :  { %2891 = vmatprep.subr.mxu0 %v3648_v0 }
 0x4b7   :  { %2892 = vmatpush3.msra.mxu0 %v3757_v8 }
 0x4b8   :  { %2893 = vmatprep.subr.mxu0 %v3648_v0 }
 0x4b9   :  { %2894 = vmatpush3.msra.mxu0 %v3761_v10 }
 0x4ba   :  { %2895 = vmatprep.subr.mxu0 %v3648_v0 }
 0x4bb   :  { %2896 = vmatpush3.msra.mxu0 %v3767_v11 }
 0x4bc   :  { %2897 = vmatprep.subr.mxu0 %v3648_v0 }
 0x4bd   :  { %2898 = vmatpush3.msra.mxu0 %v3773_v12 }
 0x4be   :  { %2899 = vmatprep.subr.mxu0 %v3648_v0 }
 0x4bf   :  { %2900 = vmatpush3.msra.mxu0 %v3779_v13 }
 0x4c0   :  { %2901 = vmatprep.subr.mxu0 %v3648_v0 }
 0x4c1   :  { %2902 = vmatpush3.msra.mxu0 %v3785_v14 }
 0x4c2   :  { %2903 = vmatprep.subr.mxu0 %v3648_v0 }
 0x4c3   :  { %2904 = vmatpush3.msra.mxu0 %v3791_v15 }
 0x4c4   :  { %2905 = vmatprep.subr.mxu0 %v3648_v0 }
 0x4c5   :  { %2906 = vmatpush3.msra.mxu0 %v3797_v16 }
 0x4c6   :  { %2907 = vmatprep.subr.mxu0 %v3648_v0 }
 0x4c7   :  { %2908 = vmatpush3.msra.mxu0 %v3803_v17 }
 0x4c8   :  { %2909 = vmatprep.subr.mxu0 %v3648_v0 }
 0x4c9   :  { %2910 = vmatpush3.msra.mxu0 %v3809_v18 }
 0x4ca   :  { %2911 = vmatprep.subr.mxu0 %v3648_v0 }
 0x4cb   :  { %2912 = vmatpush3.msra.mxu0 %v3815_v19 }
 0x4cc   :  { %2913 = vmatprep.subr.mxu0 %v3648_v0 }
 0x4cd   :  { %2914 = vmatpush3.msra.mxu0 %v3821_v20 }
 0x4ce   :  { %2953 = vmatprep.subr.mxu0 %v3648_v0 }
 0x56e   :  { %v703_v49 = vpop.f32.mrf.mxu0 }
 0x56f   :  { %v707_v52 = vadd.f32 %v703_v49, %v244_v48  ;;  %v1208_v48 = vld [vmem:[#allocation12 + $0x68] sm:$0xff]  ;;  %v1207_v49 = vld [vmem:[#allocation12 + $0x60] sm:$0xff] }
 0x570   :  { %v2847_v57 = vpop.f32.mrf.mxu0 }
 0x571   :  { %v2354_v58 = vmul.f32 -1.442695, %v707_v52  ;;  %v1205_v57 = vld [vmem:[#allocation12 + $0x50] sm:$0xff] }
 0x573   :  { %3385 = vpow2.f32 %v2354_v58  ;;  %v1204_v58 = vld [vmem:[#allocation12 + $0x48] sm:$0xff] }
 0x574   :  { %3387 = vtanh.f32 %v707_v52  ;;  %v1206_v52 = vld [vmem:[#allocation12 + $0x58] sm:$0xff] }
 0x580   :  { %v3386_v59 = vpop.eup %3385 }
 0x581   :  { %v712_v60 = vadd.f32 1.0, %v3386_v59  ;;  %v3388_v61 = vpop.eup %3387  ;;  %v1203_v59 = vld [vmem:[#allocation12 + $0x40] sm:$0xff] }
 0x583   :  { %3389 = vrcp.f32 %v712_v60  ;;  %v1202_v60 = vld [vmem:[#allocation12 + $0x38] sm:$0xff] }
 0x590   :  { %v3390_v62 = vpop.eup %3389 }
 0x591   :  { %v715_v63 = vsel %vm3885_vm4, %v3388_v61, %v3390_v62  ;;  %v1200_v61 = vld [vmem:[#allocation12 + $0x28] sm:$0xff]  ;;  %v1199_v62 = vld [vmem:[#allocation12 + $0x20] sm:$0xff] }
 0x592   :  { %718 = vrot.lane.b32.xlu0 %v715_v63, %s3652_s18  ;;  %716 = vrot.lane.b32.xlu1 %v715_v63, %s3651_s15 }
 0x596   :  { %720 = vrot.lane.b32.xlu1 %v715_v63, %s3650_s14 }
 0x604   :  { %v719_v51 = vpop.permute.xlu0 %718  ;;  %v717_v4 = vpop.permute.xlu1 %716 }
 0x605   :  { %v723_v6 = vmul.f32 %v719_v51, %v715_v63  ;;  %v722_v7 = vmul.f32 %v717_v4, %v610_v44  ;;  %v1198_v63 = vld [vmem:[#allocation12 + $0x18] sm:$0xff]  ;;  %v1197_v51 = vld [vmem:[#allocation12 + $0x10] sm:$0xff]  ;;  %v1196_v4 = vld [vmem:[#allocation12 + $0x8] sm:$0xff] }
 0x607   :  { %v724_v9 = vadd.f32 %v723_v6, %v722_v7  ;;  %v1195_v6 = vld [vmem:[#allocation12] sm:$0xff]  ;;  %v1092_v7 = vld [vmem:[#allocation11 + $0x78] sm:$0xff] }
 0x608   :  { %v721_v23 = vpop.permute.xlu1 %720 }
 0x609   :  { %3391 = vtanh.f32 %v724_v9 }
 0x616   :  { %v3392_v21 = vpop.eup %3391 }
 0x617   :  { %v4050_v24 = vmul.f32 %v3392_v21, %v721_v23  ;;  %v1090_v21 = vld [vmem:[#allocation11 + $0x68] sm:$0xff]  ;;  %v1089_v23 = vld [vmem:[#allocation11 + $0x60] sm:$0xff] }
 0x619   :  { %2881 = vmatmul.mubr.f32.vlgmr.msra.gmra.mxu1 %v4050_v24 }
 0x61a   :  { %2919 = vmatpush3.msra.mxu1 %v3743_v1  ;;  %2950 = vmatprep.mubr.msk.f32.mxu1 %vm3649_vm0, %v3648_v0  ;;  %v249_v1 = vadd.f32 %v3882_v22, %v3948_v54 }
 0x61b   :  { %2920 = vmatprep.subr.mxu1 %v3648_v0 }
 0x61c   :  { %2921 = vmatpush3.msra.mxu1 %v3745_v2 }
 0x61d   :  { %2922 = vmatprep.subr.mxu1 %v3648_v0 }
 0x61e   :  { %2923 = vmatpush3.msra.mxu1 %v3749_v3 }
 0x61f   :  { %2924 = vmatprep.subr.mxu1 %v3648_v0 }
 0x620   :  { %2925 = vmatpush3.msra.mxu1 %v3753_v5 }
 0x621   :  { %2926 = vmatprep.subr.mxu1 %v3648_v0 }
 0x622   :  { %2927 = vmatpush3.msra.mxu1 %v3757_v8 }
 0x623   :  { %2928 = vmatprep.subr.mxu1 %v3648_v0 }
 0x624   :  { %2929 = vmatpush3.msra.mxu1 %v3761_v10 }
 0x625   :  { %2930 = vmatprep.subr.mxu1 %v3648_v0 }
 0x626   :  { %2931 = vmatpush3.msra.mxu1 %v3767_v11 }
 0x627   :  { %2932 = vmatprep.subr.mxu1 %v3648_v0 }
 0x628   :  { %2933 = vmatpush3.msra.mxu1 %v3773_v12 }
 0x629   :  { %2934 = vmatprep.subr.mxu1 %v3648_v0 }
 0x62a   :  { %2935 = vmatpush3.msra.mxu1 %v3779_v13 }
 0x62b   :  { %2936 = vmatprep.subr.mxu1 %v3648_v0 }
 0x62c   :  { %2937 = vmatpush3.msra.mxu1 %v3785_v14 }
 0x62d   :  { %2938 = vmatprep.subr.mxu1 %v3648_v0 }
 0x62e   :  { %2939 = vmatpush3.msra.mxu1 %v3791_v15 }
 0x62f   :  { %2940 = vmatprep.subr.mxu1 %v3648_v0 }
 0x630   :  { %2941 = vmatpush3.msra.mxu1 %v3797_v16 }
 0x631   :  { %2942 = vmatprep.subr.mxu1 %v3648_v0 }
 0x632   :  { %2943 = vmatpush3.msra.mxu1 %v3803_v17 }
 0x633   :  { %2944 = vmatprep.subr.mxu1 %v3648_v0 }
 0x634   :  { %2945 = vmatpush3.msra.mxu1 %v3809_v18 }
 0x635   :  { %2946 = vmatprep.subr.mxu1 %v3648_v0 }
 0x636   :  { %2947 = vmatpush3.msra.mxu1 %v3815_v19 }
 0x637   :  { %2948 = vmatprep.subr.mxu1 %v3648_v0 }
 0x638   :  { %2949 = vmatpush3.msra.mxu1 %v3821_v20 }
 0x639   :  { %2988 = vmatprep.subr.mxu1 %v1210_v53 }
 0x6d9   :  { %v817_v2 = vpop.f32.mrf.mxu1 }
 0x6da   :  { %v821_v3 = vadd.f32 %v817_v2, %v249_v1 }
 0x6db   :  { %v2882_v5 = vpop.f32.mrf.mxu1 }
 0x6dc   :  { %v2355_v8 = vmul.f32 -1.442695, %v821_v3 }
 0x6de   :  { %3393 = vpow2.f32 %v2355_v8 }
 0x6df   :  { %3395 = vtanh.f32 %v821_v3 }
 0x6eb   :  { %v3394_v10 = vpop.eup %3393 }
 0x6ec   :  { %v826_v11 = vadd.f32 1.0, %v3394_v10  ;;  %v3396_v12 = vpop.eup %3395 }
 0x6ee   :  { %3397 = vrcp.f32 %v826_v11  ;;  %v1086_v11 = vld [vmem:[#allocation11 + $0x48] sm:$0xff] }
 0x6fb   :  { %v3398_v13 = vpop.eup %3397 }
 0x6fc   :  { %v829_v14 = vsel %vm3885_vm4, %v3396_v12, %v3398_v13  ;;  %v1085_v12 = vld [vmem:[#allocation11 + $0x40] sm:$0xff]  ;;  %v1084_v13 = vld [vmem:[#allocation11 + $0x38] sm:$0xff] }
 0x6fd   :  { %832 = vrot.lane.b32.xlu1 %v829_v14, %s3652_s18  ;;  %830 = vrot.lane.b32.xlu0 %v829_v14, %s3651_s15 }
 0x701   :  { %834 = vrot.lane.b32.xlu0 %v829_v14, %s3650_s14 }
 0x76f   :  { %v833_v15 = vpop.permute.xlu1 %832  ;;  %v831_v16 = vpop.permute.xlu0 %830 }
 0x770   :  { %v837_v17 = vmul.f32 %v833_v15, %v829_v14  ;;  %v836_v18 = vmul.f32 %v831_v16, %v724_v9  ;;  %v1091_v9 = vld [vmem:[#allocation11 + $0x70] sm:$0xff]  ;;  %v1081_v15 = vld [vmem:[#allocation11 + $0x20] sm:$0xff] }
 0x772   :  { %v838_v19 = vadd.f32 %v837_v17, %v836_v18  ;;  %v1080_v18 = vld [vmem:[#allocation11 + $0x18] sm:$0xff] }
 0x773   :  { %v835_v54 = vpop.permute.xlu0 %834 }
 0x774   :  { %3399 = vtanh.f32 %v838_v19 }
 0x781   :  { %v3400_v20 = vpop.eup %3399 }
 0x782   :  { %v4093_v25 = vmul.f32 %v3400_v20, %v835_v54  ;;  %v1078_v20 = vld [vmem:[#allocation11 + $0x8] sm:$0xff]  ;;  %v1077_v54 = vld [vmem:[#allocation11] sm:$0xff] }
 0x784   :  { %2916 = vmatmul.mubr.f32.vlgmr.msra.gmra.mxu0 %v4093_v25 }
 0x785   :  { %2985 = vmatprep.mubr.msk.f32.mxu0 %vm3649_vm0, %v3648_v0  ;;  %2954 = vmatpush3.msra.mxu0 %v1092_v7 }
 0x786   :  { %2955 = vmatprep.subr.mxu0 %v3648_v0 }
 0x787   :  { %2956 = vmatpush3.msra.mxu0 %v1091_v9 }
 0x788   :  { %2957 = vmatprep.subr.mxu0 %v3648_v0 }
 0x789   :  { %2958 = vmatpush3.msra.mxu0 %v1090_v21 }
 0x78a   :  { %2959 = vmatprep.subr.mxu0 %v3648_v0 }
 0x78b   :  { %2960 = vmatpush3.msra.mxu0 %v1089_v23 }
 0x78c   :  { %2961 = vmatprep.subr.mxu0 %v3648_v0 }
 0x844   :  { %v931_v27 = vpop.f32.mrf.mxu0 }
 0x845   :  { %v935_v29 = vadd.f32 %v931_v27, %v254_v26  ;;  %v4145_v26 = vld [vmem:[#allocation14 + $0x70] sm:$0xff]  ;;  %v4149_v27 = vld [vmem:[#allocation14 + $0x68] sm:$0xff] }
 0x846   :  { %v2917_v30 = vpop.f32.mrf.mxu0 }
 0x847   :  { %v2356_v31 = vmul.f32 -1.442695, %v935_v29  ;;  %v4157_v30 = vld [vmem:[#allocation14 + $0x58] sm:$0xff] }
 0x849   :  { %3401 = vpow2.f32 %v2356_v31  ;;  %v4161_v31 = vld [vmem:[#allocation14 + $0x50] sm:$0xff] }
 0x84a   :  { %3403 = vtanh.f32 %v935_v29  ;;  %v4153_v29 = vld [vmem:[#allocation14 + $0x60] sm:$0xff] }
 0x856   :  { %v3402_v32 = vpop.eup %3401 }
 0x857   :  { %v940_v33 = vadd.f32 1.0, %v3402_v32  ;;  %v3404_v34 = vpop.eup %3403  ;;  %v4165_v32 = vld [vmem:[#allocation14 + $0x48] sm:$0xff] }
 0x859   :  { %3405 = vrcp.f32 %v940_v33  ;;  %v4169_v33 = vld [vmem:[#allocation14 + $0x40] sm:$0xff] }
 0x866   :  { %v3406_v35 = vpop.eup %3405 }
 0x867   :  { %v943_v37 = vsel %vm3885_vm4, %v3404_v34, %v3406_v35  ;;  %v4173_v34 = vld [vmem:[#allocation14 + $0x38] sm:$0xff]  ;;  %v4177_v35 = vld [vmem:[#allocation14 + $0x30] sm:$0xff] }
 0x868   :  { %946 = vrot.lane.b32.xlu0 %v943_v37, %s3652_s18  ;;  %944 = vrot.lane.b32.xlu1 %v943_v37, %s3651_s15 }
 0x86c   :  { %948 = vrot.lane.b32.xlu1 %v943_v37, %s3650_s14 }
 0x8da   :  { %v947_v38 = vpop.permute.xlu0 %946  ;;  %v945_v39 = vpop.permute.xlu1 %944 }
 0x8db   :  { %v951_v40 = vmul.f32 %v947_v38, %v943_v37  ;;  %v950_v41 = vmul.f32 %v945_v39, %v838_v19  ;;  %v1079_v19 = vld [vmem:[#allocation11 + $0x10] sm:$0xff]  ;;  %v4181_v37 = vld [vmem:[#allocation14 + $0x28] sm:$0xff]  ;;  %v4189_v38 = vld [vmem:[#allocation14 + $0x18] sm:$0xff] }
 0x8dc   :  { %v4193_v39 = vld [vmem:[#allocation14 + $0x10] sm:$0xff] }
 0x8dd   :  { %v4105_v42 = vadd.f32 %v951_v40, %v950_v41  ;;  %v4197_v40 = vld [vmem:[#allocation14 + $0x8] sm:$0xff]  ;;  %v4201_v41 = vld [vmem:[#allocation14] sm:$0xff] }
 0x8de   :  { %v949_v44 = vpop.permute.xlu1 %948 }
 0x8df   :  { %3407 = vtanh.f32 %v4105_v42 }
 0x8ec   :  { %v3408_v43 = vpop.eup %3407 }
 0x8ed   :  { %v954_v45 = vmul.f32 %v3408_v43, %v949_v44 }
 0x8ef   :  { %2951 = vmatmul.mubr.f32.vlgmr.msra.gmra.mxu1 %v954_v45 }
 0x8f0   :  { %2989 = vmatpush3.msra.mxu1 %v1210_v53  ;;  %3020 = vmatprep.mubr.f32.mxu1 %v3905_v50  ;;  %v1201_v50 = vld [vmem:[#allocation12 + $0x30] sm:$0xff]  ;;  %v4185_v53 = vld [vmem:[#allocation14 + $0x20] sm:$0xff] }
 0x8f1   :  { %2990 = vmatprep.subr.mxu1 %v1209_v46 }
 0x8f2   :  { %2991 = vmatpush3.msra.mxu1 %v1209_v46 }
 0x8f3   :  { %2992 = vmatprep.subr.mxu1 %v1208_v48 }
 0x8f4   :  { %2993 = vmatpush3.msra.mxu1 %v1208_v48 }
 0x8f5   :  { %2994 = vmatprep.subr.mxu1 %v1207_v49 }
 0x8f6   :  { %2995 = vmatpush3.msra.mxu1 %v1207_v49 }
 0x8f7   :  { %2996 = vmatprep.subr.mxu1 %v1206_v52 }
 0x8f8   :  { %2997 = vmatpush3.msra.mxu1 %v1206_v52 }
 0x8f9   :  { %2998 = vmatprep.subr.mxu1 %v1205_v57 }
 0x8fa   :  { %2999 = vmatpush3.msra.mxu1 %v1205_v57 }
 0x8fb   :  { %3000 = vmatprep.subr.mxu1 %v1204_v58 }
 0x8fc   :  { %3001 = vmatpush3.msra.mxu1 %v1204_v58 }
 0x8fd   :  { %3002 = vmatprep.subr.mxu1 %v1203_v59 }
 0x8fe   :  { %3003 = vmatpush3.msra.mxu1 %v1203_v59 }
 0x8ff   :  { %3004 = vmatprep.subr.mxu1 %v1202_v60 }
 0x900   :  { %3005 = vmatpush3.msra.mxu1 %v1202_v60 }
 0x901   :  { %3006 = vmatprep.subr.mxu1 %v1201_v50 }
 0x902   :  { %3007 = vmatpush3.msra.mxu1 %v1201_v50 }
 0x903   :  { %3008 = vmatprep.subr.mxu1 %v1200_v61 }
 0x904   :  { %3009 = vmatpush3.msra.mxu1 %v1200_v61 }
 0x905   :  { %3010 = vmatprep.subr.mxu1 %v1199_v62 }
 0x906   :  { %3011 = vmatpush3.msra.mxu1 %v1199_v62 }
 0x907   :  { %3012 = vmatprep.subr.mxu1 %v1198_v63 }
 0x908   :  { %3013 = vmatpush3.msra.mxu1 %v1198_v63 }
 0x909   :  { %3014 = vmatprep.subr.mxu1 %v1197_v51 }
 0x90a   :  { %3015 = vmatpush3.msra.mxu1 %v1197_v51 }
 0x90b   :  { %3016 = vmatprep.subr.mxu1 %v1196_v4 }
 0x90c   :  { %3017 = vmatpush3.msra.mxu1 %v1196_v4 }
 0x90d   :  { %3018 = vmatprep.subr.mxu1 %v1195_v6 }
 0x90e   :  { %3019 = vmatpush3.msra.mxu1 %v1195_v6  ;;  %v4289_v6 = vld [vmem:[%s4562_s6] ss:$0 sm:$0xff] }
 0x90f   :  { %3021 = vmatmul.mubr.f32.vlgmr.msra.gmra.mxu1 %v3962_v28  ;;  %3067 = vmatprep.subr.mxu1 %v3648_v0  ;;  %v1088_v28 = vld [vmem:[#allocation11 + $0x58] sm:$0xff] }
 0x910   :  { %3023 = vmatprep.mubr.f32.mxu1 %v4006_v47  ;;  %v1087_v47 = vld [vmem:[#allocation11 + $0x50] sm:$0xff]  ;;  %2962 = vmatpush3.msra.mxu0 %v1088_v28 }
 0x911   :  { %2963 = vmatprep.subr.mxu0 %v3648_v0 }
 0x912   :  { %2964 = vmatpush3.msra.mxu0 %v1087_v47 }
 0x913   :  { %3024 = vmatmul.mubr.f32.gmra.mxu1 %v4050_v24  ;;  %2965 = vmatprep.subr.mxu0 %v3648_v0  ;;  %v259_v24 = vadd.f32 %v3882_v22, %v3952_v56  ;;  %v1083_v22 = vld [vmem:[#allocation11 + $0x30] sm:$0xff]  ;;  %v1082_v56 = vld [vmem:[#allocation11 + $0x28] sm:$0xff] }
 0x914   :  { %3026 = vmatprep.mubr.f32.mxu1 %v4093_v25  ;;  %2966 = vmatpush3.msra.mxu0 %v1086_v11  ;;  %v4141_v25 = vld [vmem:[#allocation14 + $0x78] sm:$0xff] }
 0x915   :  { %2967 = vmatprep.subr.mxu0 %v3648_v0  ;;  %3068 = vmatpush3.msra.mxu1 %v4141_v25 }
 0x916   :  { %2968 = vmatpush3.msra.mxu0 %v1085_v12  ;;  %3069 = vmatprep.subr.mxu1 %v3648_v0 }
 0x917   :  { %3027 = vmatmul.mubr.f32.gmra.mxu1 %v954_v45  ;;  %2969 = vmatprep.subr.mxu0 %v3648_v0 }
 0x918   :  { %2970 = vmatpush3.msra.mxu0 %v1084_v13  ;;  %3070 = vmatpush3.msra.mxu1 %v4145_v26 }
 0x919   :  { %2971 = vmatprep.subr.mxu0 %v3648_v0  ;;  %3071 = vmatprep.subr.mxu1 %v3648_v0 }
 0x91a   :  { %2972 = vmatpush3.msra.mxu0 %v1083_v22  ;;  %3072 = vmatpush3.msra.mxu1 %v4149_v27 }
 0x91b   :  { %2973 = vmatprep.subr.mxu0 %v3648_v0  ;;  %3073 = vmatprep.subr.mxu1 %v3648_v0 }
 0x91c   :  { %2974 = vmatpush3.msra.mxu0 %v1082_v56  ;;  %3074 = vmatpush3.msra.mxu1 %v4153_v29 }
 0x91d   :  { %2975 = vmatprep.subr.mxu0 %v3648_v0  ;;  %3075 = vmatprep.subr.mxu1 %v3648_v0 }
 0x91e   :  { %2976 = vmatpush3.msra.mxu0 %v1081_v15  ;;  %3076 = vmatpush3.msra.mxu1 %v4157_v30 }
 0x91f   :  { %2977 = vmatprep.subr.mxu0 %v3648_v0  ;;  %3077 = vmatprep.subr.mxu1 %v3648_v0 }
 0x920   :  { %2978 = vmatpush3.msra.mxu0 %v1080_v18  ;;  %3078 = vmatpush3.msra.mxu1 %v4161_v31 }
 0x921   :  { %2979 = vmatprep.subr.mxu0 %v3648_v0  ;;  %3079 = vmatprep.subr.mxu1 %v3648_v0 }
 0x922   :  { %2980 = vmatpush3.msra.mxu0 %v1079_v19  ;;  %3080 = vmatpush3.msra.mxu1 %v4165_v32 }
 0x923   :  { %2981 = vmatprep.subr.mxu0 %v3648_v0  ;;  %3081 = vmatprep.subr.mxu1 %v3648_v0 }
 0x924   :  { %2982 = vmatpush3.msra.mxu0 %v1078_v20  ;;  %3082 = vmatpush3.msra.mxu1 %v4169_v33 }
 0x925   :  { %2983 = vmatprep.subr.mxu0 %v3648_v0  ;;  %3083 = vmatprep.subr.mxu1 %v3648_v0 }
 0x926   :  { %2984 = vmatpush3.msra.mxu0 %v1077_v54  ;;  %3084 = vmatpush3.msra.mxu1 %v4173_v34 }
 0x927   :  { %3032 = vmatprep.subr.mxu0 %v3648_v0  ;;  %3085 = vmatprep.subr.mxu1 %v3648_v0 }
 0x928   :  { %3086 = vmatpush3.msra.mxu1 %v4177_v35 }
 0x929   :  { %3087 = vmatprep.subr.mxu1 %v3648_v0 }
 0x92a   :  { %3088 = vmatpush3.msra.mxu1 %v4181_v37 }
 0x92b   :  { %3089 = vmatprep.subr.mxu1 %v3648_v0 }
 0x92c   :  { %3090 = vmatpush3.msra.mxu1 %v4185_v53 }
 0x92d   :  { %3091 = vmatprep.subr.mxu1 %v3648_v0 }
 0x92e   :  { %3092 = vmatpush3.msra.mxu1 %v4189_v38 }
 0x92f   :  { %3093 = vmatprep.subr.mxu1 %v3648_v0 }
 0x930   :  { %3094 = vmatpush3.msra.mxu1 %v4193_v39 }
 0x931   :  { %3095 = vmatprep.subr.mxu1 %v3648_v0 }
 0x932   :  { %3096 = vmatpush3.msra.mxu1 %v4197_v40 }
 0x933   :  { %3097 = vmatprep.subr.mxu1 %v3648_v0 }
 0x934   :  { %3098 = vmatpush3.msra.mxu1 %v4201_v41 }
 0x935   :  { %3137 = vmatprep.subr.mxu1 %v3648_v0 }
 0x9af   :  { %v1045_v1 = vpop.f32.mrf.mxu1 }
 0x9b0   :  { %v1049_v2 = vadd.f32 %v1045_v1, %v259_v24 }
 0x9b1   :  { %v2952_v3 = vpop.f32.mrf.mxu1 }
 0x9b2   :  { %v2357_v5 = vmul.f32 -1.442695, %v1049_v2 }
 0x9b4   :  { %3409 = vpow2.f32 %v2357_v5 }
 0x9b5   :  { %3411 = vtanh.f32 %v1049_v2 }
 0x9c1   :  { %v3410_v8 = vpop.eup %3409 }
 0x9c2   :  { %v1054_v10 = vadd.f32 1.0, %v3410_v8  ;;  %v3412_v14 = vpop.eup %3411 }
 0x9c4   :  { %3413 = vrcp.f32 %v1054_v10 }
 0x9cf   :  { %v4284_v51 = vpop.f32.mrf.mxu1 }
 0x9d1   :  { %v3414_v16 = vpop.eup %3413  ;;  %v1284_v4 = vpop.f32.mrf.mxu1 }
 0x9d2   :  { %v4129_v17 = vsel %vm3885_vm4, %v3412_v14, %v3414_v16  ;;  %v1285_v7 = vadd.f32 %v4289_v6, %v1284_v4 }
 0x9d3   :  { %1060 = vrot.lane.b32.xlu1 %v4129_v17, %s3652_s18  ;;  %1058 = vrot.lane.b32.xlu0 %v4129_v17, %s3651_s15 }
 0x9d7   :  { %1062 = vrot.lane.b32.xlu0 %v4129_v17, %s3650_s14 }
 0xa45   :  { %v1061_v43 = vpop.permute.xlu1 %1060  ;;  %v1059_v44 = vpop.permute.xlu0 %1058 }
 0xa46   :  { %v1065_v45 = vmul.f32 %v1061_v43, %v4129_v17  ;;  %v1064_v46 = vmul.f32 %v1059_v44, %v4105_v42  ;;  %v3489_v42 = vld [vmem:[%s4559_s3] ss:$0 sm:$0xff] }
 0xa47   :  { %v264_v58 = vadd.f32 %v3489_v42, %v3950_v55  ;;  %v1290_v42 = vadd.f32 %v4284_v51, %v4289_v6 }
 0xa48   :  { %v4208_v48 = vadd.f32 %v1065_v45, %v1064_v46  ;;  %v4342_v45 = vpop.f32.mrf.mxu1 }
 0xa49   :  { %v1063_v52 = vpop.permute.xlu0 %1062 }
 0xa4a   :  { %3415 = vtanh.f32 %v4208_v48  ;;  %v4344_v46 = vpop.f32.mrf.mxu1 }
 0xa57   :  { %v3416_v49 = vpop.eup %3415 }
 0xa58   :  { %v1068_v57 = vmul.f32 %v3416_v49, %v1063_v52 }
 0xa5a   :  { %2986 = vmatmul.mubr.f32.vlgmr.msra.gmra.mxu0 %v1068_v57  ;;  %3029 = vmatprep.mubr.f32.mxu1 %v1068_v57 }
 0xa5b   :  { %3033 = vmatpush3.msra.mxu0 %v4141_v25  ;;  %3064 = vmatprep.mubr.msk.f32.mxu0 %vm3649_vm0, %v3648_v0 }
 0xa5c   :  { %3034 = vmatprep.subr.mxu0 %v3648_v0 }
 0xa5d   :  { %3035 = vmatpush3.msra.mxu0 %v4145_v26 }
 0xa5e   :  { %3036 = vmatprep.subr.mxu0 %v3648_v0 }
 0xa5f   :  { %3037 = vmatpush3.msra.mxu0 %v4149_v27 }
 0xa60   :  { %3038 = vmatprep.subr.mxu0 %v3648_v0 }
 0xa61   :  { %3039 = vmatpush3.msra.mxu0 %v4153_v29 }
 0xa62   :  { %3040 = vmatprep.subr.mxu0 %v3648_v0 }
 0xa63   :  { %3041 = vmatpush3.msra.mxu0 %v4157_v30 }
 0xa64   :  { %3042 = vmatprep.subr.mxu0 %v3648_v0 }
 0xa65   :  { %3043 = vmatpush3.msra.mxu0 %v4161_v31 }
 0xa66   :  { %3044 = vmatprep.subr.mxu0 %v3648_v0 }
 0xa67   :  { %3045 = vmatpush3.msra.mxu0 %v4165_v32 }
 0xa68   :  { %3046 = vmatprep.subr.mxu0 %v3648_v0 }
 0xa69   :  { %3047 = vmatpush3.msra.mxu0 %v4169_v33 }
 0xa6a   :  { %3048 = vmatprep.subr.mxu0 %v3648_v0 }
 0xa6b   :  { %3049 = vmatpush3.msra.mxu0 %v4173_v34 }
 0xa6c   :  { %3050 = vmatprep.subr.mxu0 %v3648_v0 }
 0xa6d   :  { %3051 = vmatpush3.msra.mxu0 %v4177_v35 }
 0xa6e   :  { %3052 = vmatprep.subr.mxu0 %v3648_v0 }
 0xa6f   :  { %3053 = vmatpush3.msra.mxu0 %v4181_v37 }
 0xa70   :  { %3054 = vmatprep.subr.mxu0 %v3648_v0 }
 0xa71   :  { %3055 = vmatpush3.msra.mxu0 %v4185_v53 }
 0xa72   :  { %3056 = vmatprep.subr.mxu0 %v3648_v0 }
 0xa73   :  { %3057 = vmatpush3.msra.mxu0 %v4189_v38 }
 0xa74   :  { %3058 = vmatprep.subr.mxu0 %v3648_v0 }
 0xa75   :  { %3059 = vmatpush3.msra.mxu0 %v4193_v39 }
 0xa76   :  { %3060 = vmatprep.subr.mxu0 %v3648_v0 }
 0xa77   :  { %3061 = vmatpush3.msra.mxu0 %v4197_v40 }
 0xa78   :  { %3062 = vmatprep.subr.mxu0 %v3648_v0 }
 0xa79   :  { %3063 = vmatpush3.msra.mxu0 %v4201_v41 }
 0xa7a   :  { %3065 = vmatmul.mubr.f32.vlgmr.msra.gmra.mxu0 %v3648_v0  ;;  %3102 = vmatprep.subr.mxu0 %v3648_v0 }
 0xa7b   :  { %3103 = vmatpush3.msra.mxu0 %v4141_v25  ;;  %3134 = vmatprep.mubr.msk.f32.mxu0 %vm3649_vm0, %v3648_v0 }
 0xa7c   :  { %3104 = vmatprep.subr.mxu0 %v3648_v0 }
 0xa7d   :  { %3105 = vmatpush3.msra.mxu0 %v4145_v26 }
 0xa7e   :  { %3106 = vmatprep.subr.mxu0 %v3648_v0 }
 0xa7f   :  { %3107 = vmatpush3.msra.mxu0 %v4149_v27 }
 0xa80   :  { %3108 = vmatprep.subr.mxu0 %v3648_v0 }
 0xa81   :  { %3109 = vmatpush3.msra.mxu0 %v4153_v29 }
 0xa82   :  { %3110 = vmatprep.subr.mxu0 %v3648_v0 }
 0xa83   :  { %3111 = vmatpush3.msra.mxu0 %v4157_v30 }
 0xa84   :  { %3112 = vmatprep.subr.mxu0 %v3648_v0 }
 0xa85   :  { %3113 = vmatpush3.msra.mxu0 %v4161_v31 }
 0xa86   :  { %3114 = vmatprep.subr.mxu0 %v3648_v0 }
 0xa87   :  { %3115 = vmatpush3.msra.mxu0 %v4165_v32 }
 0xa88   :  { %3116 = vmatprep.subr.mxu0 %v3648_v0 }
 0xa89   :  { %3117 = vmatpush3.msra.mxu0 %v4169_v33 }
 0xa8a   :  { %3118 = vmatprep.subr.mxu0 %v3648_v0 }
 0xa8b   :  { %3119 = vmatpush3.msra.mxu0 %v4173_v34 }
 0xa8c   :  { %3120 = vmatprep.subr.mxu0 %v3648_v0 }
 0xa8d   :  { %3121 = vmatpush3.msra.mxu0 %v4177_v35 }
 0xa8e   :  { %3122 = vmatprep.subr.mxu0 %v3648_v0 }
 0xa8f   :  { %3123 = vmatpush3.msra.mxu0 %v4181_v37 }
 0xa90   :  { %3124 = vmatprep.subr.mxu0 %v3648_v0 }
 0xa91   :  { %3125 = vmatpush3.msra.mxu0 %v4185_v53 }
 0xa92   :  { %3126 = vmatprep.subr.mxu0 %v3648_v0 }
 0xa93   :  { %3127 = vmatpush3.msra.mxu0 %v4189_v38 }
 0xa94   :  { %3128 = vmatprep.subr.mxu0 %v3648_v0 }
 0xa95   :  { %3129 = vmatpush3.msra.mxu0 %v4193_v39 }
 0xa96   :  { %3130 = vmatprep.subr.mxu0 %v3648_v0 }
 0xa97   :  { %3131 = vmatpush3.msra.mxu0 %v4197_v40 }
 0xa98   :  { %3132 = vmatprep.subr.mxu0 %v3648_v0 }
 0xa99   :  { %3133 = vmatpush3.msra.mxu0 %v4201_v41 }
 0xa9a   :  { %3172 = vmatprep.subr.mxu0 %v3648_v0 }
 0xb1a   :  { %v1159_v59 = vpop.f32.mrf.mxu0 }
 0xb1b   :  { %v1163_v60 = vadd.f32 %v1159_v59, %v264_v58 }
 0xb1c   :  { %v2987_v50 = vpop.f32.mrf.mxu0 }
 0xb1d   :  { %v2358_v61 = vmul.f32 -1.442695, %v1163_v60 }
 0xb1f   :  { %3417 = vpow2.f32 %v2358_v61 }
 0xb20   :  { %3419 = vtanh.f32 %v1163_v60 }
 0xb2c   :  { %v3418_v62 = vpop.eup %3417 }
 0xb2d   :  { %v1168_v63 = vadd.f32 1.0, %v3418_v62  ;;  %v3420_v9 = vpop.eup %3419 }
 0xb2f   :  { %3421 = vrcp.f32 %v1168_v63 }
 0xb3a   :  { %v1418_v55 = vpop.f32.mrf.mxu0 }
 0xb3b   :  { %v1422_v21 = vadd.f32 %v1418_v55, %v1285_v7 }
 0xb3c   :  { %v3422_v23 = vpop.eup %3421  ;;  %v3066_v28 = vpop.f32.mrf.mxu0 }
 0xb3d   :  { %v2360_v47 = vmul.f32 -1.442695, %v1422_v21  ;;  %v1171_v24 = vsel %vm3885_vm4, %v3420_v9, %v3422_v23 }
 0xb3e   :  { %1174 = vrot.lane.b32.xlu0 %v1171_v24, %s3652_s18  ;;  %1172 = vrot.lane.b32.xlu1 %v1171_v24, %s3651_s15 }
 0xb3f   :  { %3423 = vpow2.f32 %v2360_v47 }
 0xb40   :  { %3425 = vtanh.f32 %v1422_v21 }
 0xb4c   :  { %v3424_v1 = vpop.eup %3423 }
 0xb4d   :  { %v1427_v2 = vadd.f32 1.0, %v3424_v1  ;;  %v3426_v3 = vpop.eup %3425  ;;  %v1295_v1 = vadd.f32 %v4289_v6, %v4344_v46 }
 0xb4f   :  { %3427 = vrcp.f32 %v1427_v2 }
 0xb5c   :  { %v3428_v5 = vpop.eup %3427 }
 0xb5d   :  { %v1430_v8 = vsel %vm3885_vm4, %v3426_v3, %v3428_v5 }
 0xb5e   :  { %1433 = vrot.lane.b32.xlu0 %v1430_v8, %s3652_s18  ;;  %1431 = vrot.lane.b32.xlu1 %v1430_v8, %s3651_s15 }
 0xb62   :  { %1435 = vrot.lane.b32.xlu0 %v1430_v8, %s3650_s14  ;;  %1176 = vrot.lane.b32.xlu1 %v1171_v24, %s3650_s14 }
 0xbb0   :  { %v1175_v10 = vpop.permute.xlu0 %1174  ;;  %v1173_v11 = vpop.permute.xlu1 %1172 }
 0xbb1   :  { %v1179_v12 = vmul.f32 %v1175_v10, %v1171_v24  ;;  %v1178_v13 = vmul.f32 %v1173_v11, %v4208_v48  ;;  %v4346_v48 = vpop.f32.mrf.mxu1 }
 0xbb3   :  { %v1180_v22 = vadd.f32 %v1179_v12, %v1178_v13  ;;  %v4348_v49 = vpop.f32.mrf.mxu1 }
 0xbb5   :  { %3429 = vtanh.f32 %v1180_v22 }
 0xbc2   :  { %v3430_v18 = vpop.eup %3429 }
 0xbd0   :  { %v1434_v56 = vpop.permute.xlu0 %1433  ;;  %v1432_v14 = vpop.permute.xlu1 %1431 }
 0xbd1   :  { %v1438_v15 = vmul.f32 %v1434_v56, %v1430_v8  ;;  %v1437_v16 = vmul.f32 0.0, %v1432_v14 }
 0xbd3   :  { %v4303_v17 = vadd.f32 %v1438_v15, %v1437_v16 }
 0xbd4   :  { %v1177_v19 = vpop.permute.xlu1 %1176  ;;  %v1436_v43 = vpop.permute.xlu0 %1435 }
 0xbd5   :  { %3431 = vtanh.f32 %v4303_v17  ;;  %v1182_v20 = vmul.f32 %v3430_v18, %v1177_v19 }
 0xbd7   :  { %3030 = vmatmul.mubr.f32.gmra.mxu1 %v1182_v20 }
 0xbd8   :  { %3099 = vmatprep.mubr.msk.f32.mxu1 %vm3649_vm0, %v3648_v0 }
 0xbe2   :  { %v3432_v54 = vpop.eup %3431 }
 0xbe3   :  { %v1441_v44 = vmul.f32 %v3432_v54, %v1436_v43  ;;  %v1300_v54 = vadd.f32 %v4342_v45, %v4289_v6 }
 0xbe5   :  { %3100 = vmatmul.mubr.f32.vlgmr.msra.gmra.mxu1 %v1441_v44 }
 0xbe6   :  { %3138 = vmatpush3.msra.mxu1 %v4141_v25  ;;  %3169 = vmatprep.mubr.msk.f32.mxu1 %vm3649_vm0, %v3648_v0 }
 0xbe7   :  { %3139 = vmatprep.subr.mxu1 %v3648_v0 }
 0xbe8   :  { %3140 = vmatpush3.msra.mxu1 %v4145_v26 }
 0xbe9   :  { %3141 = vmatprep.subr.mxu1 %v3648_v0 }
 0xbea   :  { %3142 = vmatpush3.msra.mxu1 %v4149_v27 }
 0xbeb   :  { %3143 = vmatprep.subr.mxu1 %v3648_v0 }
 0xbec   :  { %3144 = vmatpush3.msra.mxu1 %v4153_v29 }
 0xbed   :  { %3145 = vmatprep.subr.mxu1 %v3648_v0 }
 0xbee   :  { %3146 = vmatpush3.msra.mxu1 %v4157_v30 }
 0xbef   :  { %3147 = vmatprep.subr.mxu1 %v3648_v0 }
 0xbf0   :  { %3148 = vmatpush3.msra.mxu1 %v4161_v31 }
 0xbf1   :  { %3149 = vmatprep.subr.mxu1 %v3648_v0 }
 0xbf2   :  { %3150 = vmatpush3.msra.mxu1 %v4165_v32 }
 0xbf3   :  { %3151 = vmatprep.subr.mxu1 %v3648_v0 }
 0xbf4   :  { %3152 = vmatpush3.msra.mxu1 %v4169_v33 }
 0xbf5   :  { %3153 = vmatprep.subr.mxu1 %v3648_v0 }
 0xbf6   :  { %3154 = vmatpush3.msra.mxu1 %v4173_v34 }
 0xbf7   :  { %3155 = vmatprep.subr.mxu1 %v3648_v0 }
 0xbf8   :  { %3156 = vmatpush3.msra.mxu1 %v4177_v35 }
 0xbf9   :  { %3157 = vmatprep.subr.mxu1 %v3648_v0 }
 0xbfa   :  { %3158 = vmatpush3.msra.mxu1 %v4181_v37 }
 0xbfb   :  { %3159 = vmatprep.subr.mxu1 %v3648_v0 }
 0xbfc   :  { %3160 = vmatpush3.msra.mxu1 %v4185_v53 }
 0xbfd   :  { %3161 = vmatprep.subr.mxu1 %v3648_v0 }
 0xbfe   :  { %3162 = vmatpush3.msra.mxu1 %v4189_v38 }
 0xbff   :  { %3163 = vmatprep.subr.mxu1 %v3648_v0 }
 0xc00   :  { %3164 = vmatpush3.msra.mxu1 %v4193_v39 }
 0xc01   :  { %3165 = vmatprep.subr.mxu1 %v3648_v0 }
 0xc02   :  { %3166 = vmatpush3.msra.mxu1 %v4197_v40 }
 0xc03   :  { %3167 = vmatprep.subr.mxu1 %v3648_v0 }
 0xc04   :  { %3168 = vmatpush3.msra.mxu1 %v4201_v41 }
 0xc05   :  { %3207 = vmatprep.subr.mxu1 %v3648_v0 }
 0xc97   :  { %v4350_v52 = vpop.f32.mrf.mxu1 }
 0xc99   :  { %v4352_v57 = vpop.f32.mrf.mxu1 }
 0xca5   :  { %v1530_v58 = vpop.f32.mrf.mxu1 }
 0xca6   :  { %v1534_v59 = vadd.f32 %v1530_v58, %v1290_v42 }
 0xca7   :  { %v3101_v60 = vpop.f32.mrf.mxu1 }
 0xca8   :  { %v2361_v50 = vmul.f32 -1.442695, %v1534_v59 }
 0xcaa   :  { %3433 = vpow2.f32 %v2361_v50 }
 0xcab   :  { %3435 = vtanh.f32 %v1534_v59 }
 0xcb7   :  { %v3434_v61 = vpop.eup %3433 }
 0xcb8   :  { %v1539_v62 = vadd.f32 1.0, %v3434_v61  ;;  %v3436_v63 = vpop.eup %3435 }
 0xcba   :  { %3437 = vrcp.f32 %v1539_v62 }
 0xcc7   :  { %v3438_v4 = vpop.eup %3437 }
 0xcc8   :  { %v1542_v7 = vsel %vm3885_vm4, %v3436_v63, %v3438_v4 }
 0xcc9   :  { %1545 = vrot.lane.b32.xlu0 %v1542_v7, %s3652_s18  ;;  %1543 = vrot.lane.b32.xlu1 %v1542_v7, %s3651_s15 }
 0xccd   :  { %1547 = vrot.lane.b32.xlu1 %v1542_v7, %s3650_s14 }
 0xd3b   :  { %v1546_v51 = vpop.permute.xlu0 %1545  ;;  %v1544_v55 = vpop.permute.xlu1 %1543 }
 0xd3c   :  { %v1550_v9 = vmul.f32 %v1546_v51, %v1542_v7  ;;  %v1549_v21 = vmul.f32 %v1544_v55, %v4303_v17 }
 0xd3e   :  { %v1551_v23 = vadd.f32 %v1550_v9, %v1549_v21 }
 0xd3f   :  { %v1548_v47 = vpop.permute.xlu1 %1547 }
 0xd40   :  { %3439 = vtanh.f32 %v1551_v23 }
 0xd4d   :  { %v3440_v28 = vpop.eup %3439 }
 0xd4e   :  { %v1553_v24 = vmul.f32 %v3440_v28, %v1548_v47 }
 0xd50   :  { %3135 = vmatmul.mubr.f32.vlgmr.msra.gmra.mxu0 %v1553_v24 }
 0xd51   :  { %3173 = vmatpush3.msra.mxu0 %v4141_v25  ;;  %3204 = vmatprep.mubr.msk.f32.mxu0 %vm3649_vm0, %v3648_v0 }
 0xd52   :  { %3174 = vmatprep.subr.mxu0 %v3648_v0 }
 0xd53   :  { %3175 = vmatpush3.msra.mxu0 %v4145_v26 }
 0xd54   :  { %3176 = vmatprep.subr.mxu0 %v3648_v0 }
 0xd55   :  { %3177 = vmatpush3.msra.mxu0 %v4149_v27 }
 0xd56   :  { %3178 = vmatprep.subr.mxu0 %v3648_v0 }
 0xd57   :  { %3179 = vmatpush3.msra.mxu0 %v4153_v29 }
 0xd58   :  { %3180 = vmatprep.subr.mxu0 %v3648_v0 }
 0xd59   :  { %3181 = vmatpush3.msra.mxu0 %v4157_v30 }
 0xd5a   :  { %3182 = vmatprep.subr.mxu0 %v3648_v0 }
 0xd5b   :  { %3183 = vmatpush3.msra.mxu0 %v4161_v31 }
 0xd5c   :  { %3184 = vmatprep.subr.mxu0 %v3648_v0 }
 0xd5d   :  { %3185 = vmatpush3.msra.mxu0 %v4165_v32 }
 0xd5e   :  { %3186 = vmatprep.subr.mxu0 %v3648_v0 }
 0xd5f   :  { %3187 = vmatpush3.msra.mxu0 %v4169_v33 }
 0xd60   :  { %3188 = vmatprep.subr.mxu0 %v3648_v0 }
 0xd61   :  { %3189 = vmatpush3.msra.mxu0 %v4173_v34 }
 0xd62   :  { %3190 = vmatprep.subr.mxu0 %v3648_v0 }
 0xd63   :  { %3191 = vmatpush3.msra.mxu0 %v4177_v35 }
 0xd64   :  { %3192 = vmatprep.subr.mxu0 %v3648_v0 }
 0xd65   :  { %3193 = vmatpush3.msra.mxu0 %v4181_v37 }
 0xd66   :  { %3194 = vmatprep.subr.mxu0 %v3648_v0 }
 0xd67   :  { %3195 = vmatpush3.msra.mxu0 %v4185_v53 }
 0xd68   :  { %3196 = vmatprep.subr.mxu0 %v3648_v0 }
 0xd69   :  { %3197 = vmatpush3.msra.mxu0 %v4189_v38 }
 0xd6a   :  { %3198 = vmatprep.subr.mxu0 %v3648_v0 }
 0xd6b   :  { %3199 = vmatpush3.msra.mxu0 %v4193_v39 }
 0xd6c   :  { %3200 = vmatprep.subr.mxu0 %v3648_v0 }
 0xd6d   :  { %3201 = vmatpush3.msra.mxu0 %v4197_v40 }
 0xd6e   :  { %3202 = vmatprep.subr.mxu0 %v3648_v0 }
 0xd6f   :  { %3203 = vmatpush3.msra.mxu0 %v4201_v41 }
 0xd70   :  { %3242 = vmatprep.subr.mxu0 %v3648_v0 }
 0xe10   :  { %v1642_v2 = vpop.f32.mrf.mxu0 }
 0xe11   :  { %v1646_v3 = vadd.f32 %v1642_v2, %v1295_v1 }
 0xe12   :  { %v3136_v5 = vpop.f32.mrf.mxu0 }
 0xe13   :  { %v2362_v8 = vmul.f32 -1.442695, %v1646_v3 }
 0xe15   :  { %3441 = vpow2.f32 %v2362_v8 }
 0xe16   :  { %3443 = vtanh.f32 %v1646_v3 }
 0xe22   :  { %v3442_v10 = vpop.eup %3441 }
 0xe23   :  { %v1651_v11 = vadd.f32 1.0, %v3442_v10  ;;  %v3444_v12 = vpop.eup %3443 }
 0xe25   :  { %3445 = vrcp.f32 %v1651_v11 }
 0xe32   :  { %v3446_v13 = vpop.eup %3445 }
 0xe33   :  { %v1654_v22 = vsel %vm3885_vm4, %v3444_v12, %v3446_v13 }
 0xe34   :  { %1657 = vrot.lane.b32.xlu1 %v1654_v22, %s3652_s18  ;;  %1655 = vrot.lane.b32.xlu0 %v1654_v22, %s3651_s15 }
 0xe38   :  { %1659 = vrot.lane.b32.xlu0 %v1654_v22, %s3650_s14 }
 0xea6   :  { %v1658_v56 = vpop.permute.xlu1 %1657  ;;  %v1656_v14 = vpop.permute.xlu0 %1655 }
 0xea7   :  { %v1662_v15 = vmul.f32 %v1658_v56, %v1654_v22  ;;  %v1661_v16 = vmul.f32 %v1656_v14, %v1551_v23 }
 0xea9   :  { %v1663_v17 = vadd.f32 %v1662_v15, %v1661_v16  ;;  %v1315_v16 = vadd.f32 %v4289_v6, %v4352_v57  ;;  %v2126_v57 = vld [vmem:[#allocation14 + $0x30] sm:$0xff] }
 0xeaa   :  { %v1660_v19 = vpop.permute.xlu0 %1659 }
 0xeab   :  { %3447 = vtanh.f32 %v1663_v17 }
 0xeb8   :  { %v3448_v18 = vpop.eup %3447 }
 0xeb9   :  { %v1665_v20 = vmul.f32 %v3448_v18, %v1660_v19 }
 0xebb   :  { %3170 = vmatmul.mubr.f32.vlgmr.msra.gmra.mxu1 %v1665_v20 }
 0xebc   :  { %3208 = vmatpush3.msra.mxu1 %v4141_v25  ;;  %3239 = vmatprep.mubr.msk.f32.mxu1 %vm3649_vm0, %v3648_v0 }
 0xebd   :  { %3209 = vmatprep.subr.mxu1 %v3648_v0 }
 0xebe   :  { %3210 = vmatpush3.msra.mxu1 %v4145_v26 }
 0xebf   :  { %3211 = vmatprep.subr.mxu1 %v3648_v0 }
 0xec0   :  { %3212 = vmatpush3.msra.mxu1 %v4149_v27 }
 0xec1   :  { %3213 = vmatprep.subr.mxu1 %v3648_v0 }
 0xec2   :  { %3214 = vmatpush3.msra.mxu1 %v4153_v29 }
 0xec3   :  { %3215 = vmatprep.subr.mxu1 %v3648_v0 }
 0xec4   :  { %3216 = vmatpush3.msra.mxu1 %v4157_v30 }
 0xec5   :  { %3217 = vmatprep.subr.mxu1 %v3648_v0 }
 0xec6   :  { %3218 = vmatpush3.msra.mxu1 %v4161_v31 }
 0xec7   :  { %3219 = vmatprep.subr.mxu1 %v3648_v0 }
 0xec8   :  { %3220 = vmatpush3.msra.mxu1 %v4165_v32 }
 0xec9   :  { %3221 = vmatprep.subr.mxu1 %v3648_v0 }
 0xeca   :  { %3222 = vmatpush3.msra.mxu1 %v4169_v33 }
 0xecb   :  { %3223 = vmatprep.subr.mxu1 %v3648_v0 }
 0xecc   :  { %3224 = vmatpush3.msra.mxu1 %v4173_v34 }
 0xecd   :  { %3225 = vmatprep.subr.mxu1 %v3648_v0 }
 0xece   :  { %3226 = vmatpush3.msra.mxu1 %v4177_v35 }
 0xecf   :  { %3227 = vmatprep.subr.mxu1 %v3648_v0 }
 0xed0   :  { %3228 = vmatpush3.msra.mxu1 %v4181_v37 }
 0xed1   :  { %3229 = vmatprep.subr.mxu1 %v3648_v0 }
 0xed2   :  { %3230 = vmatpush3.msra.mxu1 %v4185_v53 }
 0xed3   :  { %3231 = vmatprep.subr.mxu1 %v3648_v0 }
 0xed4   :  { %3232 = vmatpush3.msra.mxu1 %v4189_v38 }
 0xed5   :  { %3233 = vmatprep.subr.mxu1 %v3648_v0 }
 0xed6   :  { %3234 = vmatpush3.msra.mxu1 %v4193_v39 }
 0xed7   :  { %3235 = vmatprep.subr.mxu1 %v3648_v0 }
 0xed8   :  { %3236 = vmatpush3.msra.mxu1 %v4197_v40 }
 0xed9   :  { %3237 = vmatprep.subr.mxu1 %v3648_v0 }
 0xeda   :  { %3238 = vmatpush3.msra.mxu1 %v4201_v41 }
 0xedb   :  { %3277 = vmatprep.subr.mxu1 %v3648_v0 }
 0xf7b   :  { %v1754_v43 = vpop.f32.mrf.mxu1 }
 0xf7c   :  { %v1758_v44 = vadd.f32 %v1754_v43, %v1300_v54 }
 0xf7d   :  { %v3171_v46 = vpop.f32.mrf.mxu1 }
 0xf7e   :  { %v2363_v42 = vmul.f32 -1.442695, %v1758_v44  ;;  %v2128_v46 = vld [vmem:[#allocation14 + $0x40] sm:$0xff] }
 0xf80   :  { %3449 = vpow2.f32 %v2363_v42  ;;  %v2127_v42 = vld [vmem:[#allocation14 + $0x38] sm:$0xff] }
 0xf81   :  { %3451 = vtanh.f32 %v1758_v44  ;;  %v2129_v44 = vld [vmem:[#allocation14 + $0x48] sm:$0xff] }
 0xf8d   :  { %v3450_v58 = vpop.eup %3449 }
 0xf8e   :  { %v1763_v59 = vadd.f32 1.0, %v3450_v58  ;;  %v3452_v60 = vpop.eup %3451  ;;  %v2125_v58 = vld [vmem:[#allocation14 + $0x28] sm:$0xff] }
 0xf90   :  { %3453 = vrcp.f32 %v1763_v59 }
 0xf9d   :  { %v3454_v50 = vpop.eup %3453 }
 0xf9e   :  { %v1766_v61 = vsel %vm3885_vm4, %v3452_v60, %v3454_v50  ;;  %v2124_v60 = vld [vmem:[#allocation14 + $0x20] sm:$0xff] }
 0xf9f   :  { %1769 = vrot.lane.b32.xlu0 %v1766_v61, %s3652_s18  ;;  %1767 = vrot.lane.b32.xlu1 %v1766_v61, %s3651_s15 }
 0xfa3   :  { %1771 = vrot.lane.b32.xlu1 %v1766_v61, %s3650_s14 }
0x1011   :  { %v1770_v45 = vpop.permute.xlu0 %1769  ;;  %v1768_v62 = vpop.permute.xlu1 %1767 }
0x1012   :  { %v1774_v63 = vmul.f32 %v1770_v45, %v1766_v61  ;;  %v1773_v4 = vmul.f32 %v1768_v62, %v1663_v17  ;;  %v2123_v45 = vld [vmem:[#allocation14 + $0x18] sm:$0xff]  ;;  %v2122_v62 = vld [vmem:[#allocation14 + $0x10] sm:$0xff] }
0x1014   :  { %v1775_v7 = vadd.f32 %v1774_v63, %v1773_v4  ;;  %v2121_v63 = vld [vmem:[#allocation14 + $0x8] sm:$0xff]  ;;  %v2120_v4 = vld [vmem:[#allocation14] sm:$0xff] }
0x1015   :  { %v1772_v55 = vpop.permute.xlu1 %1771 }
0x1016   :  { %3455 = vtanh.f32 %v1775_v7 }
0x1023   :  { %v3456_v51 = vpop.eup %3455 }
0x1024   :  { %v1777_v9 = vmul.f32 %v3456_v51, %v1772_v55 }
0x1026   :  { %3205 = vmatmul.mubr.f32.vlgmr.msra.gmra.mxu0 %v1777_v9 }
0x1027   :  { %3243 = vmatpush3.msra.mxu0 %v4141_v25  ;;  %3274 = vmatprep.mubr.msk.f32.mxu0 %vm3649_vm0, %v3648_v0 }
0x1028   :  { %3244 = vmatprep.subr.mxu0 %v3648_v0 }
0x1029   :  { %3245 = vmatpush3.msra.mxu0 %v4145_v26 }
0x102a   :  { %3246 = vmatprep.subr.mxu0 %v3648_v0 }
0x102b   :  { %3247 = vmatpush3.msra.mxu0 %v4149_v27 }
0x102c   :  { %3248 = vmatprep.subr.mxu0 %v3648_v0 }
0x102d   :  { %3249 = vmatpush3.msra.mxu0 %v4153_v29 }
0x102e   :  { %3250 = vmatprep.subr.mxu0 %v3648_v0 }
0x102f   :  { %3251 = vmatpush3.msra.mxu0 %v4157_v30 }
0x1030   :  { %3252 = vmatprep.subr.mxu0 %v3648_v0 }
0x1031   :  { %3253 = vmatpush3.msra.mxu0 %v4161_v31 }
0x1032   :  { %3254 = vmatprep.subr.mxu0 %v3648_v0 }
0x1033   :  { %3255 = vmatpush3.msra.mxu0 %v4165_v32  ;;  %v1305_v32 = vadd.f32 %v4289_v6, %v4348_v49 }
0x1034   :  { %3256 = vmatprep.subr.mxu0 %v3648_v0 }
0x1035   :  { %3257 = vmatpush3.msra.mxu0 %v4169_v33 }
0x1036   :  { %3258 = vmatprep.subr.mxu0 %v3648_v0 }
0x1037   :  { %3259 = vmatpush3.msra.mxu0 %v4173_v34 }
0x1038   :  { %3260 = vmatprep.subr.mxu0 %v3648_v0 }
0x1039   :  { %3261 = vmatpush3.msra.mxu0 %v4177_v35 }
0x103a   :  { %3262 = vmatprep.subr.mxu0 %v3648_v0 }
0x103b   :  { %3263 = vmatpush3.msra.mxu0 %v4181_v37 }
0x103c   :  { %3264 = vmatprep.subr.mxu0 %v3648_v0 }
0x103d   :  { %3265 = vmatpush3.msra.mxu0 %v4185_v53 }
0x103e   :  { %3266 = vmatprep.subr.mxu0 %v3648_v0 }
0x103f   :  { %3267 = vmatpush3.msra.mxu0 %v4189_v38 }
0x1040   :  { %3268 = vmatprep.subr.mxu0 %v3648_v0 }
0x1041   :  { %3269 = vmatpush3.msra.mxu0 %v4193_v39 }
0x1042   :  { %3270 = vmatprep.subr.mxu0 %v3648_v0 }
0x1043   :  { %3271 = vmatpush3.msra.mxu0 %v4197_v40 }
0x1044   :  { %3272 = vmatprep.subr.mxu0 %v3648_v0 }
0x1045   :  { %3273 = vmatpush3.msra.mxu0 %v4201_v41 }
0x1046   :  { %3312 = vmatprep.subr.mxu0 %v3648_v0 }
0x10e6   :  { %v1866_v33 = vpop.f32.mrf.mxu0 }
0x10e7   :  { %v1870_v34 = vadd.f32 %v1866_v33, %v1305_v32 }
0x10e8   :  { %v3206_v35 = vpop.f32.mrf.mxu0 }
0x10e9   :  { %v2364_v37 = vmul.f32 -1.442695, %v1870_v34 }
0x10eb   :  { %3457 = vpow2.f32 %v2364_v37  ;;  %v2245_v37 = vld [vmem:[#allocation15 + $0x78] sm:$0xff] }
0x10ec   :  { %3459 = vtanh.f32 %v1870_v34 }
0x10f8   :  { %v3458_v53 = vpop.eup %3457 }
0x10f9   :  { %v1875_v38 = vadd.f32 1.0, %v3458_v53  ;;  %v3460_v39 = vpop.eup %3459  ;;  %v2244_v53 = vld [vmem:[#allocation15 + $0x70] sm:$0xff] }
0x10fb   :  { %3461 = vrcp.f32 %v1875_v38  ;;  %v2243_v38 = vld [vmem:[#allocation15 + $0x68] sm:$0xff] }
0x1108   :  { %v3462_v40 = vpop.eup %3461 }
0x1109   :  { %v1878_v21 = vsel %vm3885_vm4, %v3460_v39, %v3462_v40  ;;  %v2242_v39 = vld [vmem:[#allocation15 + $0x60] sm:$0xff]  ;;  %v2241_v40 = vld [vmem:[#allocation15 + $0x58] sm:$0xff] }
0x110a   :  { %1881 = vrot.lane.b32.xlu1 %v1878_v21, %s3652_s18  ;;  %1879 = vrot.lane.b32.xlu0 %v1878_v21, %s3651_s15 }
0x110e   :  { %1883 = vrot.lane.b32.xlu0 %v1878_v21, %s3650_s14 }
0x117c   :  { %v1882_v41 = vpop.permute.xlu1 %1881  ;;  %v1880_v49 = vpop.permute.xlu0 %1879 }
0x117d   :  { %v1886_v23 = vmul.f32 %v1882_v41, %v1878_v21  ;;  %v1885_v28 = vmul.f32 %v1880_v49, %v1775_v7  ;;  %v2240_v21 = vld [vmem:[#allocation15 + $0x50] sm:$0xff]  ;;  %v1320_v41 = vadd.f32 %v4350_v52, %v4289_v6  ;;  %v2235_v52 = vld [vmem:[#allocation15 + $0x28] sm:$0xff] }
0x117f   :  { %v1887_v47 = vadd.f32 %v1886_v23, %v1885_v28 }
0x1180   :  { %v1884_v1 = vpop.permute.xlu0 %1883 }
0x1181   :  { %3463 = vtanh.f32 %v1887_v47 }
0x118e   :  { %v3464_v24 = vpop.eup %3463 }
0x118f   :  { %v1889_v2 = vmul.f32 %v3464_v24, %v1884_v1 }
0x1191   :  { %3240 = vmatmul.mubr.f32.vlgmr.msra.gmra.mxu1 %v1889_v2  ;;  %v2239_v2 = vld [vmem:[#allocation15 + $0x48] sm:$0xff] }
0x1192   :  { %3278 = vmatpush3.msra.mxu1 %v4141_v25  ;;  %3309 = vmatprep.mubr.msk.f32.mxu1 %vm3649_vm0, %v3648_v0  ;;  %v1310_v25 = vadd.f32 %v4346_v48, %v4289_v6  ;;  %v2236_v6 = vld [vmem:[#allocation15 + $0x30] sm:$0xff] }
0x1193   :  { %3279 = vmatprep.subr.mxu1 %v3648_v0 }
0x1194   :  { %3280 = vmatpush3.msra.mxu1 %v4145_v26 }
0x1195   :  { %3281 = vmatprep.subr.mxu1 %v3648_v0 }
0x1196   :  { %3282 = vmatpush3.msra.mxu1 %v4149_v27 }
0x1197   :  { %3283 = vmatprep.subr.mxu1 %v3648_v0 }
0x1198   :  { %3284 = vmatpush3.msra.mxu1 %v4153_v29 }
0x1199   :  { %3285 = vmatprep.subr.mxu1 %v3648_v0 }
0x119a   :  { %3286 = vmatpush3.msra.mxu1 %v4157_v30 }
0x119b   :  { %3287 = vmatprep.subr.mxu1 %v3648_v0 }
0x119c   :  { %3288 = vmatpush3.msra.mxu1 %v4161_v31 }
0x119d   :  { %3289 = vmatprep.subr.mxu1 %v3648_v0 }
0x119e   :  { %3290 = vmatpush3.msra.mxu1 %v2129_v44 }
0x119f   :  { %3291 = vmatprep.subr.mxu1 %v3648_v0 }
0x11a0   :  { %3292 = vmatpush3.msra.mxu1 %v2128_v46 }
0x11a1   :  { %3293 = vmatprep.subr.mxu1 %v3648_v0 }
0x11a2   :  { %3294 = vmatpush3.msra.mxu1 %v2127_v42 }
0x11a3   :  { %3295 = vmatprep.subr.mxu1 %v3648_v0 }
0x11a4   :  { %3296 = vmatpush3.msra.mxu1 %v2126_v57 }
0x11a5   :  { %3297 = vmatprep.subr.mxu1 %v3648_v0 }
0x11a6   :  { %3298 = vmatpush3.msra.mxu1 %v2125_v58 }
0x11a7   :  { %3299 = vmatprep.subr.mxu1 %v3648_v0 }
0x11a8   :  { %3300 = vmatpush3.msra.mxu1 %v2124_v60 }
0x11a9   :  { %3301 = vmatprep.subr.mxu1 %v3648_v0 }
0x11aa   :  { %3302 = vmatpush3.msra.mxu1 %v2123_v45 }
0x11ab   :  { %3303 = vmatprep.subr.mxu1 %v3648_v0 }
0x11ac   :  { %3304 = vmatpush3.msra.mxu1 %v2122_v62 }
0x11ad   :  { %3305 = vmatprep.subr.mxu1 %v3648_v0 }
0x11ae   :  { %3306 = vmatpush3.msra.mxu1 %v2121_v63 }
0x11af   :  { %3307 = vmatprep.subr.mxu1 %v3648_v0 }
0x11b0   :  { %3308 = vmatpush3.msra.mxu1 %v2120_v4 }
0x1251   :  { %v1978_v26 = vpop.f32.mrf.mxu1 }
0x1252   :  { %v1982_v3 = vadd.f32 %v1978_v26, %v1310_v25  ;;  %v2238_v25 = vld [vmem:[#allocation15 + $0x40] sm:$0xff]  ;;  %v2237_v26 = vld [vmem:[#allocation15 + $0x38] sm:$0xff] }
0x1253   :  { %v3241_v27 = vpop.f32.mrf.mxu1 }
0x1254   :  { %v2365_v5 = vmul.f32 -1.442695, %v1982_v3  ;;  %v2234_v27 = vld [vmem:[#allocation15 + $0x20] sm:$0xff] }
0x1256   :  { %3465 = vpow2.f32 %v2365_v5 }
0x1257   :  { %3467 = vtanh.f32 %v1982_v3 }
0x1263   :  { %v3466_v8 = vpop.eup %3465 }
0x1264   :  { %v1987_v29 = vadd.f32 1.0, %v3466_v8  ;;  %v3468_v10 = vpop.eup %3467 }
0x1266   :  { %3469 = vrcp.f32 %v1987_v29  ;;  %v2233_v29 = vld [vmem:[#allocation15 + $0x18] sm:$0xff] }
0x1273   :  { %v3470_v30 = vpop.eup %3469 }
0x1274   :  { %v1990_v11 = vsel %vm3885_vm4, %v3468_v10, %v3470_v30  ;;  %v2232_v10 = vld [vmem:[#allocation15 + $0x10] sm:$0xff]  ;;  %v2231_v30 = vld [vmem:[#allocation15 + $0x8] sm:$0xff] }
0x1275   :  { %1993 = vrot.lane.b32.xlu0 %v1990_v11, %s3652_s18  ;;  %1991 = vrot.lane.b32.xlu1 %v1990_v11, %s3651_s15 }
0x1279   :  { %1995 = vrot.lane.b32.xlu1 %v1990_v11, %s3650_s14 }
0x12e7   :  { %v1994_v31 = vpop.permute.xlu0 %1993  ;;  %v1992_v48 = vpop.permute.xlu1 %1991 }
0x12e8   :  { %v1998_v12 = vmul.f32 %v1994_v31, %v1990_v11  ;;  %v1997_v13 = vmul.f32 %v1992_v48, %v1887_v47 }
0x12ea   :  { %v1999_v22 = vadd.f32 %v1998_v12, %v1997_v13 }
0x12eb   :  { %v1996_v14 = vpop.permute.xlu1 %1995 }
0x12ec   :  { %3471 = vtanh.f32 %v1999_v22 }
0x12f9   :  { %v3472_v56 = vpop.eup %3471 }
0x12fa   :  { %v2001_v15 = vmul.f32 %v3472_v56, %v1996_v14 }
0x12fc   :  { %3275 = vmatmul.mubr.f32.vlgmr.msra.gmra.mxu0 %v2001_v15  ;;  %v2368_v15 = vld [vmem:[%s4564_s8] ss:$0 sm:$0xff] }
0x12fd   :  { %3344 = vmatprep.mubr.msk.f32.mxu0 %vm3649_vm0, %v3648_v0  ;;  %3313 = vmatpush3.msra.mxu0 %v2245_v37 }
0x12fe   :  { %3314 = vmatprep.subr.mxu0 %v3648_v0 }
0x12ff   :  { %3315 = vmatpush3.msra.mxu0 %v2244_v53 }
0x1300   :  { %3316 = vmatprep.subr.mxu0 %v3648_v0 }
0x1301   :  { %3317 = vmatpush3.msra.mxu0 %v2243_v38 }
0x1302   :  { %3318 = vmatprep.subr.mxu0 %v3648_v0 }
0x1303   :  { %3319 = vmatpush3.msra.mxu0 %v2242_v39 }
0x1304   :  { %3320 = vmatprep.subr.mxu0 %v3648_v0 }
0x1305   :  { %3321 = vmatpush3.msra.mxu0 %v2241_v40 }
0x1306   :  { %3322 = vmatprep.subr.mxu0 %v3648_v0 }
0x1307   :  { %3323 = vmatpush3.msra.mxu0 %v2240_v21 }
0x1308   :  { %3324 = vmatprep.subr.mxu0 %v3648_v0 }
0x1309   :  { %3325 = vmatpush3.msra.mxu0 %v2239_v2 }
0x130a   :  { %3326 = vmatprep.subr.mxu0 %v3648_v0 }
0x130b   :  { %3327 = vmatpush3.msra.mxu0 %v2238_v25 }
0x130c   :  { %3328 = vmatprep.subr.mxu0 %v3648_v0 }
0x130d   :  { %3329 = vmatpush3.msra.mxu0 %v2237_v26 }
0x130e   :  { %3330 = vmatprep.subr.mxu0 %v3648_v0 }
0x130f   :  { %3331 = vmatpush3.msra.mxu0 %v2236_v6 }
0x1310   :  { %3332 = vmatprep.subr.mxu0 %v3648_v0 }
0x1311   :  { %3333 = vmatpush3.msra.mxu0 %v2235_v52 }
0x1312   :  { %3334 = vmatprep.subr.mxu0 %v3648_v0 }
0x1313   :  { %3335 = vmatpush3.msra.mxu0 %v2234_v27 }
0x1314   :  { %3336 = vmatprep.subr.mxu0 %v3648_v0 }
0x1315   :  { %3337 = vmatpush3.msra.mxu0 %v2233_v29 }
0x1316   :  { %3338 = vmatprep.subr.mxu0 %v3648_v0 }
0x1317   :  { %3339 = vmatpush3.msra.mxu0 %v2232_v10 }
0x1318   :  { %3340 = vmatprep.subr.mxu0 %v3648_v0 }
0x1319   :  { %3341 = vmatpush3.msra.mxu0 %v2231_v30 }
0x131a   :  { %3342 = vmatprep.subr.mxu0 %v3648_v0 }
0x131b   :  { %3343 = vmatpush3.msra.mxu0 %v2230_v36 }
0x13bc   :  { %v2090_v17 = vpop.f32.mrf.mxu0 }
0x13bd   :  { %v2094_v18 = vadd.f32 %v2090_v17, %v1315_v16 }
0x13be   :  { %v3276_v19 = vpop.f32.mrf.mxu0 }
0x13bf   :  { %v2366_v20 = vmul.f32 -1.442695, %v2094_v18 }
0x13c1   :  { %3473 = vpow2.f32 %v2366_v20 }
0x13c2   :  { %3475 = vtanh.f32 %v2094_v18 }
0x13ce   :  { %v3474_v54 = vpop.eup %3473 }
0x13cf   :  { %v2099_v43 = vadd.f32 1.0, %v3474_v54  ;;  %v3476_v59 = vpop.eup %3475 }
0x13d1   :  { %3477 = vrcp.f32 %v2099_v43 }
0x13de   :  { %v3478_v50 = vpop.eup %3477 }
0x13df   :  { %v2102_v61 = vsel %vm3885_vm4, %v3476_v59, %v3478_v50 }
0x13e0   :  { %2105 = vrot.lane.b32.xlu1 %v2102_v61, %s3652_s18  ;;  %2103 = vrot.lane.b32.xlu0 %v2102_v61, %s3651_s15 }
0x13e4   :  { %2107 = vrot.lane.b32.xlu0 %v2102_v61, %s3650_s14 }
0x1452   :  { %v2106_v7 = vpop.permute.xlu1 %2105  ;;  %v2104_v51 = vpop.permute.xlu0 %2103 }
0x1453   :  { %v2110_v55 = vmul.f32 %v2106_v7, %v2102_v61  ;;  %v2109_v9 = vmul.f32 %v2104_v51, %v1999_v22 }
0x1455   :  { %v4524_v32 = vadd.f32 %v2110_v55, %v2109_v9 }
0x1456   :  { %v2108_v34 = vpop.permute.xlu0 %2107 }
0x1457   :  { %3479 = vtanh.f32 %v4524_v32 }
0x1464   :  { %v3480_v33 = vpop.eup %3479 }
0x1465   :  { %v2113_v35 = vmul.f32 %v3480_v33, %v2108_v34 }
0x1467   :  { %3310 = vmatmul.mubr.f32.vlgmr.msra.gmra.mxu1 %v2113_v35 }
0x1527   :  { %v2202_v49 = vpop.f32.mrf.mxu1 }
0x1528   :  { %v2206_v23 = vadd.f32 %v2202_v49, %v1320_v41 }
0x1529   :  { %v3311_v28 = vpop.f32.mrf.mxu1 }
0x152a   :  { %v2367_v47 = vmul.f32 -1.442695, %v2206_v23 }
0x152c   :  { %3481 = vpow2.f32 %v2367_v47 }
0x152d   :  { %3483 = vtanh.f32 %v2206_v23 }
0x1539   :  { %v3482_v24 = vpop.eup %3481 }
0x153a   :  { %v2211_v1 = vadd.f32 1.0, %v3482_v24  ;;  %v3484_v3 = vpop.eup %3483 }
0x153c   :  { %3485 = vrcp.f32 %v2211_v1 }
0x1549   :  { %v3486_v5 = vpop.eup %3485 }
0x154a   :  { %v2214_v8 = vsel %vm3885_vm4, %v3484_v3, %v3486_v5 }
0x154b   :  { %2217 = vrot.lane.b32.xlu0 %v2214_v8, %s3652_s18  ;;  %2215 = vrot.lane.b32.xlu1 %v2214_v8, %s3651_s15 }
0x154f   :  { %2219 = vrot.lane.b32.xlu1 %v2214_v8, %s3650_s14 }
0x15bd   :  { %v2218_v11 = vpop.permute.xlu0 %2217  ;;  %v2216_v31 = vpop.permute.xlu1 %2215 }
0x15be   :  { %v2222_v48 = vmul.f32 %v2218_v11, %v2214_v8  ;;  %v2221_v12 = vmul.f32 %v2216_v31, %v4524_v32 }
0x15c0   :  { %v2223_v13 = vadd.f32 %v2222_v48, %v2221_v12 }
0x15c1   :  { %v2220_v56 = vpop.permute.xlu1 %2219 }
0x15c2   :  { %3487 = vtanh.f32 %v2223_v13 }
0x15cf   :  { %v3488_v22 = vpop.eup %3487 }
0x15d0   :  { %v2225_v14 = vmul.f32 %v3488_v22, %v2220_v56 }
0x15d2   :  { %3345 = vmatmul.mubr.f32.vlgmr.msra.gmra.mxu0 %v2225_v14 }
0x1692   :  { %v2319_v16 = vpop.f32.mrf.mxu0 }
0x1693   :  { %v2320_v0 = vadd.f32 %v2368_v15, %v2319_v16 }
0x1694   :  { %v3346_v17 = vpop.f32.mrf.mxu0 }
0x1695   :  { %2323 = vst [vmem:[#allocation17] sm:$0xff] %v2320_v0 }
0x1696   :  { %3621 = shalt.err (!%p3618_p6)
}
0x1697   :  { %2333 = dma.vmem_to_hbm [thread:$0]  %s2331_s24, 128, %s4565_s9, [#allocation8]  }
0x1698   :  { %3638 = dma.done.wait [#allocation8], 128  }
0x1699   :  { %3639 = vsyncadd [#allocation8], 4294967168 }
0x169a   :  { %2337 = vsyncpa [#allocation7], 1 }
0x169b   :  { %2338 = vsyncpa [#allocation10], 1 }
0x169c   :  { %2339 = vsyncpa [#allocation13], 1 }
0x169d   :  { %2340 = vsyncpa [#allocation16], 1 }
0x169e   :  { %2341 = vsyncpa [#allocation8], 1 }

</bundles_post_ra>
